<compile_context>
chip_gen: v7x
topology: tpu7x:2x2x1
jax: 0.10.0
libtpu: 0.0.40
codegen_flags: <defaults>
</compile_context>

<pallas_src>
import functools

import jax
import jax.numpy as jnp
from jax import lax
from jax.experimental import pallas as pl
from jax.experimental.pallas import tpu as pltpu

ROW_TILE = 512                      # rows per grid step for token-slab kernels
MAX_COL_TILE = 1024                 # output-column / hidden-chunk tile width
MAX_Q_TILE = 512                    # query rows per attention grid step
VMEM_LIMIT = 64 * 1024 * 1024       # explicit scoped-VMEM budget
LN_EPS = 1e-5                       # nn.LayerNorm default


def _compiler_params(dims):
    return pltpu.CompilerParams(dimension_semantics=dims,
                                vmem_limit_bytes=VMEM_LIMIT)


# ----------------------------------------------------------------------------
# In-kernel helpers (pure value functions)
# ----------------------------------------------------------------------------
def _layernorm_f32(x, g, b):
    mu = jnp.mean(x, axis=-1, keepdims=True)
    var = jnp.mean(jnp.square(x - mu), axis=-1, keepdims=True)
    return (x - mu) * lax.rsqrt(var + LN_EPS) * g + b


def _softmax_rows(s):
    s = s - jnp.max(s, axis=-1, keepdims=True)
    p = jnp.exp(s)
    # reciprocal goes to the EUP slot instead of a VALU divide
    return p * pl.reciprocal(jnp.sum(p, axis=-1, keepdims=True), approx=True)


# ----------------------------------------------------------------------------
# Kernels
# ----------------------------------------------------------------------------
def _matmul_kernel(x_ref, w_ref, o_ref, *, compute_dtype):
    o_ref[...] = jnp.dot(
        x_ref[...].astype(compute_dtype), w_ref[...].astype(compute_dtype),
        preferred_element_type=jnp.float32).astype(o_ref.dtype)


def _add_pos_ln_kernel(x_ref, pos_ref, g_ref, b_ref, o_ref):
    # fused (x + positional_embedding) -> ln_pre for one batch element
    x = x_ref[0].astype(jnp.float32) + pos_ref[...].astype(jnp.float32)
    o_ref[0] = _layernorm_f32(x, g_ref[...].astype(jnp.float32),
                              b_ref[...].astype(jnp.float32)).astype(o_ref.dtype)


def _ln_linear_kernel(x_ref, g_ref, b_ref, w_ref, bias_ref, o_ref, *,
                      activation, compute_dtype):
    # fused LayerNorm + Linear (one output-column tile per grid step)
    h = _layernorm_f32(x_ref[...].astype(jnp.float32),
                       g_ref[...].astype(jnp.float32),
                       b_ref[...].astype(jnp.float32))
    y = jnp.dot(h.astype(compute_dtype), w_ref[...].astype(compute_dtype),
                preferred_element_type=jnp.float32) + bias_ref[...].astype(jnp.float32)
    if activation == "quickgelu":
        y = y * jax.nn.sigmoid(1.702 * y)
    o_ref[...] = y.astype(o_ref.dtype)


def _mlp_chunk_kernel(x_ref, g_ref, b_ref, fcw_ref, fcb_ref, cpw_ref, cpb_ref,
                      o_ref, acc_ref, *, compute_dtype):
    # fused x + c_proj(QuickGELU(c_fc(ln_2(x)))), hidden dim tiled over grid
    # axis 1 ("arbitrary") with an f32 VMEM accumulator.  fc_w / cp_w are
    # streamed per hidden chunk instead of being fully resident.
    j = pl.program_id(1)

    @pl.when(j == 0)
    def _():
        acc_ref[...] = jnp.zeros_like(acc_ref)

    x = x_ref[...].astype(jnp.float32)
    h = _layernorm_f32(x, g_ref[...].astype(jnp.float32),
                       b_ref[...].astype(jnp.float32))
    u = jnp.dot(h.astype(compute_dtype), fcw_ref[...].astype(compute_dtype),
                preferred_element_type=jnp.float32) + fcb_ref[...].astype(jnp.float32)
    u = u * jax.nn.sigmoid(1.702 * u)                       # QuickGELU
    acc_ref[...] += jnp.dot(u.astype(compute_dtype),
                            cpw_ref[...].astype(compute_dtype),
                            preferred_element_type=jnp.float32)

    @pl.when(j == pl.num_programs(1) - 1)
    def _():
        o_ref[...] = (x + acc_ref[...] +
                      cpb_ref[...].astype(jnp.float32)).astype(o_ref.dtype)


def _mha_attn_kernel(q_ref, k_ref, v_ref, res_ref, pw_ref, pb_ref, o_ref,
                     acc_ref, *, heads_per_step, scale, compute_dtype):
    # Standard nn.MultiheadAttention.  Grid = (batch, q-tiles, head-pairs);
    # per step: 1-2 heads' attention, pair-concat, projection slab contraction
    # (K = heads_per_step*d), accumulated into f32 VMEM scratch.
    hp = pl.program_id(2)

    @pl.when(hp == 0)
    def _():
        acc_ref[...] = jnp.zeros_like(acc_ref)

    outs = []
    for e in range(heads_per_step):
        q = (q_ref[0, e].astype(jnp.float32) * scale).astype(compute_dtype)
        k = k_ref[0, e].astype(compute_dtype)
        v = v_ref[0, e].astype(compute_dtype)
        s = lax.dot_general(q, k, (((1,), (1,)), ((), ())),
                            preferred_element_type=jnp.float32)
        p = _softmax_rows(s).astype(compute_dtype)
        outs.append(jnp.dot(p, v, preferred_element_type=jnp.float32))
    o_pair = outs[0] if heads_per_step == 1 else jnp.concatenate(outs, axis=-1)
    acc_ref[...] += jnp.dot(o_pair.astype(compute_dtype),
                            pw_ref[0].astype(compute_dtype),
                            preferred_element_type=jnp.float32)

    @pl.when(hp == pl.num_programs(2) - 1)
    def _():
        o_ref[0] = (res_ref[0].astype(jnp.float32) + acc_ref[...] +
                    pb_ref[...].astype(jnp.float32)).astype(o_ref.dtype)


def _surgery_attn_kernel(q_ref, k_ref, v_ref, vq_ref, res_new_ref, res_ori_ref,
                         pw_ref, pb_ref, o_new_ref, o_ori_ref,
                         acc_new_ref, acc_ori_ref, *,
                         heads_per_step, scale, compute_dtype):
    # CLIP-Surgery Attention (settings=''): original q.kT path and v.vT path,
    # v loaded once per head, shared streamed projection slab, dual f32
    # accumulators, dual fused residual adds on the final head-pair step.
    hp = pl.program_id(2)

    @pl.when(hp == 0)
    def _():
        acc_new_ref[...] = jnp.zeros_like(acc_new_ref)
        acc_ori_ref[...] = jnp.zeros_like(acc_ori_ref)

    new_outs, ori_outs = [], []
    for e in range(heads_per_step):
        q = (q_ref[0, e].astype(jnp.float32) * scale).astype(compute_dtype)
        k = k_ref[0, e].astype(compute_dtype)
        v = v_ref[0, e].astype(compute_dtype)                 # keys/values
        vq = (vq_ref[0, e].astype(jnp.float32) * scale).astype(compute_dtype)

        s_ori = lax.dot_general(q, k, (((1,), (1,)), ((), ())),
                                preferred_element_type=jnp.float32)
        p_ori = _softmax_rows(s_ori).astype(compute_dtype)
        ori_outs.append(jnp.dot(p_ori, v, preferred_element_type=jnp.float32))

        s_new = lax.dot_general(vq, v, (((1,), (1,)), ((), ())),
                                preferred_element_type=jnp.float32)
        p_new = _softmax_rows(s_new).astype(compute_dtype)
        new_outs.append(jnp.dot(p_new, v, preferred_element_type=jnp.float32))

    if heads_per_step == 1:
        o_new_pair, o_ori_pair = new_outs[0], ori_outs[0]
    else:
        o_new_pair = jnp.concatenate(new_outs, axis=-1)
        o_ori_pair = jnp.concatenate(ori_outs, axis=-1)
    pw = pw_ref[0].astype(compute_dtype)
    acc_new_ref[...] += jnp.dot(o_new_pair.astype(compute_dtype), pw,
                                preferred_element_type=jnp.float32)
    acc_ori_ref[...] += jnp.dot(o_ori_pair.astype(compute_dtype), pw,
                                preferred_element_type=jnp.float32)

    @pl.when(hp == pl.num_programs(2) - 1)
    def _():
        pb = pb_ref[...].astype(jnp.float32)
        o_new_ref[0] = (res_new_ref[0].astype(jnp.float32) + acc_new_ref[...] +
                        pb).astype(o_new_ref.dtype)
        o_ori_ref[0] = (res_ori_ref[0].astype(jnp.float32) + acc_ori_ref[...] +
                        pb).astype(o_ori_ref.dtype)


# ----------------------------------------------------------------------------
# Wrappers (tiling, grids, specs)
# ----------------------------------------------------------------------------
def _row_tiling(m):
    if m <= ROW_TILE:
        return m, m, 1                      # single full block (always legal)
    m_pad = -(-m // ROW_TILE) * ROW_TILE
    return ROW_TILE, m_pad, m_pad // ROW_TILE


def _pad_rows(x, m_pad):
    m = x.shape[0]
    return x if m_pad == m else jnp.pad(x, ((0, m_pad - m), (0, 0)))


def _pick_col_tile(n, max_cols=MAX_COL_TILE):
    if n <= max_cols:
        return n
    for c in (1024, 768, 512, 384, 256, 128):
        if c <= max_cols and n % c == 0:
            return c
    return n


def _pick_q_tile(n, max_rows=MAX_Q_TILE):
    if n <= max_rows:
        return n
    for t in (512, 448, 384, 320, 256, 192, 128):
        if t <= max_rows and n % t == 0:
            return t
    return n   # ragged sequence length: whole sequence per step


def pallas_matmul(x2d, w, compute_dtype, out_dtype=None):
    m, k = x2d.shape
    n = w.shape[1]
    if out_dtype is None:
        out_dtype = x2d.dtype
    tm, m_pad, gm = _row_tiling(m)
    isz = jnp.dtype(compute_dtype).itemsize
    out = pl.pallas_call(
        functools.partial(_matmul_kernel, compute_dtype=compute_dtype),
        out_shape=jax.ShapeDtypeStruct((m_pad, n), out_dtype),
        grid=(gm,),
        in_specs=[pl.BlockSpec((tm, k), lambda i: (i, 0)),
                  pl.BlockSpec((k, n), lambda i: (0, 0))],
        out_specs=pl.BlockSpec((tm, n), lambda i: (i, 0)),
        compiler_params=_compiler_params(("parallel",)),
        cost_estimate=pl.CostEstimate(
            flops=2 * m_pad * k * n, transcendentals=0,
            bytes_accessed=isz * (m_pad * k + k * n + m_pad * n)),
    )(_pad_rows(x2d, m_pad), w)
    return out[:m] if m_pad != m else out


def pallas_add_pos_ln(x_bnc, pos, gamma, beta):
    b, n, c = x_bnc.shape
    return pl.pallas_call(
        _add_pos_ln_kernel,
        out_shape=jax.ShapeDtypeStruct((b, n, c), x_bnc.dtype),
        grid=(b,),
        in_specs=[pl.BlockSpec((1, n, c), lambda i: (i, 0, 0)),
                  pl.BlockSpec((n, c), lambda i: (0, 0)),
                  pl.BlockSpec((1, c), lambda i: (0, 0)),
                  pl.BlockSpec((1, c), lambda i: (0, 0))],
        out_specs=pl.BlockSpec((1, n, c), lambda i: (i, 0, 0)),
        compiler_params=_compiler_params(("parallel",)),
    )(x_bnc, pos, gamma.reshape(1, c), beta.reshape(1, c))


def pallas_ln_linear(x2d, gamma, beta, w, bias=None, activation=None,
                     compute_dtype=jnp.float32):
    m, k = x2d.shape
    n = w.shape[1]
    if bias is None:
        bias = jnp.zeros((n,), jnp.float32)
    tm, m_pad, gm = _row_tiling(m)
    cn = _pick_col_tile(n)
    gn = n // cn
    a_isz = x2d.dtype.itemsize
    out = pl.pallas_call(
        functools.partial(_ln_linear_kernel, activation=activation,
                          compute_dtype=compute_dtype),
        out_shape=jax.ShapeDtypeStruct((m_pad, n), x2d.dtype),
        grid=(gm, gn),
        in_specs=[pl.BlockSpec((tm, k), lambda i, j: (i, 0)),
                  pl.BlockSpec((1, k), lambda i, j: (0, 0)),
                  pl.BlockSpec((1, k), lambda i, j: (0, 0)),
                  pl.BlockSpec((k, cn), lambda i, j: (0, j)),
                  pl.BlockSpec((1, cn), lambda i, j: (0, j))],
        out_specs=pl.BlockSpec((tm, cn), lambda i, j: (i, j)),
        compiler_params=_compiler_params(("parallel", "parallel")),
        cost_estimate=pl.CostEstimate(
            flops=2 * m_pad * k * n,
            transcendentals=(m_pad * n if activation == "quickgelu" else 0),
            bytes_accessed=a_isz * (m_pad * k + m_pad * n)
                           + w.dtype.itemsize * k * n),
    )(_pad_rows(x2d, m_pad), gamma.reshape(1, k), beta.reshape(1, k),
      w, bias.reshape(1, n))
    return out[:m] if m_pad != m else out


def pallas_mlp(x2d, ln_g, ln_b, fc_w, fc_b, cp_w, cp_b, compute_dtype):
    m, c = x2d.shape
    h4 = fc_w.shape[1]
    tm, m_pad, gm = _row_tiling(m)
    ch = _pick_col_tile(h4)
    gh = h4 // ch
    a_isz = x2d.dtype.itemsize
    out = pl.pallas_call(
        functools.partial(_mlp_chunk_kernel, compute_dtype=compute_dtype),
        out_shape=jax.ShapeDtypeStruct((m_pad, c), x2d.dtype),
        grid=(gm, gh),
        in_specs=[pl.BlockSpec((tm, c), lambda i, j: (i, 0)),
                  pl.BlockSpec((1, c), lambda i, j: (0, 0)),
                  pl.BlockSpec((1, c), lambda i, j: (0, 0)),
                  pl.BlockSpec((c, ch), lambda i, j: (0, j)),
                  pl.BlockSpec((1, ch), lambda i, j: (0, j)),
                  pl.BlockSpec((ch, c), lambda i, j: (j, 0)),
                  pl.BlockSpec((1, c), lambda i, j: (0, 0))],
        out_specs=pl.BlockSpec((tm, c), lambda i, j: (i, 0)),
        scratch_shapes=[pltpu.VMEM((tm, c), jnp.float32)],
        compiler_params=_compiler_params(("parallel", "arbitrary")),
        cost_estimate=pl.CostEstimate(
            flops=4 * m_pad * c * h4, transcendentals=m_pad * h4,
            bytes_accessed=a_isz * (2 * m_pad * c)
                           + fc_w.dtype.itemsize * (2 * c * h4)),
    )(_pad_rows(x2d, m_pad), ln_g.reshape(1, c), ln_b.reshape(1, c),
      fc_w, fc_b.reshape(1, h4), cp_w, cp_b.reshape(1, c))
    return out[:m] if m_pad != m else out


def _qkv_heads(qkv2d, b, n, heads):
    # [B*N, 3C] -> [3B, H, N, d]; one XLA relayout per block so every head slab
    # arrives lane-aligned inside the attention kernels (no 64-lane slicing).
    c = qkv2d.shape[1] // 3
    d = c // heads
    return (qkv2d.reshape(b, n, 3, heads, d)
            .transpose(2, 0, 3, 1, 4)
            .reshape(3 * b, heads, n, d))


def pallas_mha_attn(qkvh, res_bnc, proj_w, proj_b, *, heads, compute_dtype):
    b3, h, n, d = qkvh.shape
    b = b3 // 3
    c = h * d
    hps = 2 if h % 2 == 0 else 1            # head pair -> K = 2d projection
    gh = h // hps
    tq = _pick_q_tile(n)
    gq = n // tq
    scale = d ** -0.5
    pw = proj_w.reshape(gh, hps * d, c)     # free reshape, streamed per pair
    a_isz = res_bnc.dtype.itemsize

    q_spec = pl.BlockSpec((1, hps, tq, d), lambda bi, qi, hp: (bi, hp, qi, 0))
    k_spec = pl.BlockSpec((1, hps, n, d), lambda bi, qi, hp: (b + bi, hp, 0, 0))
    v_spec = pl.BlockSpec((1, hps, n, d), lambda bi, qi, hp: (2 * b + bi, hp, 0, 0))
    res_spec = pl.BlockSpec((1, tq, c), lambda bi, qi, hp: (bi, qi, 0))
    pw_spec = pl.BlockSpec((1, hps * d, c), lambda bi, qi, hp: (hp, 0, 0))
    pb_spec = pl.BlockSpec((1, c), lambda bi, qi, hp: (0, 0))

    return pl.pallas_call(
        functools.partial(_mha_attn_kernel, heads_per_step=hps, scale=scale,
                          compute_dtype=compute_dtype),
        out_shape=jax.ShapeDtypeStruct((b, n, c), res_bnc.dtype),
        grid=(b, gq, gh),
        in_specs=[q_spec, k_spec, v_spec, res_spec, pw_spec, pb_spec],
        out_specs=pl.BlockSpec((1, tq, c), lambda bi, qi, hp: (bi, qi, 0)),
        scratch_shapes=[pltpu.VMEM((tq, c), jnp.float32)],
        compiler_params=_compiler_params(("parallel", "parallel", "arbitrary")),
        cost_estimate=pl.CostEstimate(
            flops=b * (4 * h * n * n * d + 2 * n * c * c),
            transcendentals=b * h * n * n,
            bytes_accessed=a_isz * (5 * b * n * c)
                           + proj_w.dtype.itemsize * c * c),
    )(qkvh, qkvh, qkvh, res_bnc, pw, proj_b.reshape(1, c))


def pallas_surgery_attn(qkvh, res_new, res_ori, proj_w, proj_b, *,
                        heads, compute_dtype):
    b3, h, n, d = qkvh.shape
    b = b3 // 3
    c = h * d
    hps = 2 if h % 2 == 0 else 1
    gh = h // hps
    tq = _pick_q_tile(n)
    gq = n // tq
    scale = d ** -0.5
    pw = proj_w.reshape(gh, hps * d, c)
    a_isz = res_new.dtype.itemsize

    q_spec = pl.BlockSpec((1, hps, tq, d), lambda bi, qi, hp: (bi, hp, qi, 0))
    k_spec = pl.BlockSpec((1, hps, n, d), lambda bi, qi, hp: (b + bi, hp, 0, 0))
    v_spec = pl.BlockSpec((1, hps, n, d), lambda bi, qi, hp: (2 * b + bi, hp, 0, 0))
    vq_spec = pl.BlockSpec((1, hps, tq, d), lambda bi, qi, hp: (2 * b + bi, hp, qi, 0))
    res_spec = pl.BlockSpec((1, tq, c), lambda bi, qi, hp: (bi, qi, 0))
    out_spec = pl.BlockSpec((1, tq, c), lambda bi, qi, hp: (bi, qi, 0))
    pw_spec = pl.BlockSpec((1, hps * d, c), lambda bi, qi, hp: (hp, 0, 0))
    pb_spec = pl.BlockSpec((1, c), lambda bi, qi, hp: (0, 0))

    out_sds = jax.ShapeDtypeStruct((b, n, c), res_new.dtype)
    return pl.pallas_call(
        functools.partial(_surgery_attn_kernel, heads_per_step=hps, scale=scale,
                          compute_dtype=compute_dtype),
        out_shape=(out_sds, out_sds),
        grid=(b, gq, gh),
        in_specs=[q_spec, k_spec, v_spec, vq_spec, res_spec, res_spec,
                  pw_spec, pb_spec],
        out_specs=(out_spec, out_spec),
        scratch_shapes=[pltpu.VMEM((tq, c), jnp.float32),
                        pltpu.VMEM((tq, c), jnp.float32)],
        compiler_params=_compiler_params(("parallel", "parallel", "arbitrary")),
        cost_estimate=pl.CostEstimate(
            flops=b * (8 * h * n * n * d + 4 * n * c * c),
            transcendentals=2 * b * h * n * n,
            bytes_accessed=a_isz * (7 * b * n * c)
                           + proj_w.dtype.itemsize * c * c),
    )(qkvh, qkvh, qkvh, qkvh, res_new, res_ori, pw, proj_b.reshape(1, c))


# ----------------------------------------------------------------------------
# Transformer blocks (3 pallas_calls each)
# ----------------------------------------------------------------------------
def _mha_block(x_bnc, blk, heads, compute_dtype):
    b, n, c = x_bnc.shape
    qkv = pallas_ln_linear(x_bnc.reshape(b * n, c), blk["ln1_g"], blk["ln1_b"],
                           blk["qkv_w"], blk["qkv_b"],
                           compute_dtype=compute_dtype)
    qkvh = _qkv_heads(qkv, b, n, heads)
    x1 = pallas_mha_attn(qkvh, x_bnc, blk["proj_w"], blk["proj_b"],
                         heads=heads, compute_dtype=compute_dtype)
    return pallas_mlp(x1.reshape(b * n, c), blk["ln2_g"], blk["ln2_b"],
                      blk["fc_w"], blk["fc_b"], blk["cproj_w"], blk["cproj_b"],
                      compute_dtype).reshape(b, n, c)


def _surgery_block(state, blk, heads, compute_dtype):
    if isinstance(state, tuple):
        x, x_ori = state
        ln_in, res_new, res_ori = x_ori, x, x_ori
    else:
        x = state
        ln_in, res_new, res_ori = x, x, x
    b, n, c = ln_in.shape
    qkv = pallas_ln_linear(ln_in.reshape(b * n, c), blk["ln1_g"], blk["ln1_b"],
                           blk["qkv_w"], blk["qkv_b"],
                           compute_dtype=compute_dtype)
    qkvh = _qkv_heads(qkv, b, n, heads)
    x_new, x_ori_new = pallas_surgery_attn(qkvh, res_new, res_ori,
                                           blk["proj_w"], blk["proj_b"],
                                           heads=heads,
                                           compute_dtype=compute_dtype)
    x_ori_out = pallas_mlp(x_ori_new.reshape(b * n, c), blk["ln2_g"],
                           blk["ln2_b"], blk["fc_w"], blk["fc_b"],
                           blk["cproj_w"], blk["cproj_b"],
                           compute_dtype).reshape(b, n, c)
    return (x_new, x_ori_out)


# ----------------------------------------------------------------------------
# Full encoder forward
# ----------------------------------------------------------------------------
def clip_surgery_vision_forward(params, x_nchw, *, patch_size, heads,
                                spatial_size, num_surgery,
                                compute_dtype=jnp.bfloat16):
    # compute_dtype controls both the MXU dtype and the inter-kernel activation
    # dtype (f32 accumulation + f32 LN/softmax stats either way).  bf16 is the
    # production default; pass jnp.float32 for bit-faithful numerics.
    b, cin, hin, win = x_nchw.shape
    hs, ws = hin // patch_size, win // patch_size
    c = params["class_embedding"].shape[0]

    # conv1 (kernel == stride patchify, bias=False) as a row-tiled matmul
    patches = x_nchw.reshape(b, cin, hs, patch_size, ws, patch_size)
    patches = patches.transpose(0, 2, 4, 1, 3, 5).reshape(
        b * hs * ws, cin * patch_size * patch_size)
    x = pallas_matmul(patches, params["conv1_w"], compute_dtype,
                      out_dtype=compute_dtype)
    x = x.reshape(b, hs * ws, c)

    # class token + positional embedding (resize matches
    # F.interpolate(mode='bilinear', align_corners=False): antialias=False)
    cls = jnp.broadcast_to(
        params["class_embedding"].astype(x.dtype).reshape(1, 1, c), (b, 1, c))
    x = jnp.concatenate([cls, x], axis=1)                 # [B, N, C]
    n = x.shape[1]

    pos = params["positional_embedding"].astype(jnp.float32)
    cls_pos = pos[:1]
    spatial_pos = pos[1:].reshape(spatial_size, spatial_size, c)
    if (hs, ws) != (spatial_size, spatial_size):
        spatial_pos = jax.image.resize(spatial_pos, (hs, ws, c),
                                       method="bilinear", antialias=False)
    pos = jnp.concatenate([cls_pos, spatial_pos.reshape(hs * ws, c)], axis=0)

    # fused (x + pos) -> ln_pre
    x = pallas_add_pos_ln(x, pos, params["ln_pre_g"], params["ln_pre_b"])

    # transformer, batch-first [B, N, C] (equivalent to PyTorch's seq-first)
    n_layers = len(params["blocks"])
    state = x
    for i, blk in enumerate(params["blocks"]):
        if i >= n_layers - num_surgery:
            state = _surgery_block(state, blk, heads, compute_dtype)
        else:
            state = _mha_block(state, blk, heads, compute_dtype)
    x, x_ori = state

    # x[0,:,:] = x_ori[0,:,:] (CLS token, seq-first) == x[:,0] = x_ori[:,0]
    x = x.at[:, 0, :].set(x_ori[:, 0, :])

    # fused ln_post + proj, both streams batched into one call
    out_dim = params["proj"].shape[1]
    rows = jnp.concatenate([x.reshape(b * n, c), x_ori.reshape(b * n, c)], axis=0)
    out = pallas_ln_linear(rows, params["ln_post_g"], params["ln_post_b"],
                           params["proj"], None, compute_dtype=compute_dtype)
    xp = out[:b * n].reshape(b, n, out_dim)
    xop = out[b * n:].reshape(b, n, out_dim)

    global_embedding = xp[:, 0]
    visual_embedding = xp[:, 1:]
    x_ori_out = xop[:, 1:]
    return global_embedding, visual_embedding, x_ori_out


# ----------------------------------------------------------------------------
# Deterministic synthetic parameters (weights stored pre-transposed in the
# matmul [in, out] layout; a real CLIP checkpoint is transposed once at load)
# ----------------------------------------------------------------------------
def init_params(key, *, width, layers, heads, output_dim, patch_size,
                spatial_size):
    del heads  # shapes only depend on width
    keys = iter(jax.random.split(key, 8 + 8 * layers))
    nk = lambda: next(keys)
    scale = width ** -0.5
    c = width
    p = {
        "conv1_w": 0.02 * jax.random.normal(nk(), (3 * patch_size * patch_size, c)),
        "class_embedding": scale * jax.random.normal(nk(), (c,)),
        "positional_embedding": scale * jax.random.normal(
            nk(), (spatial_size ** 2 + 1, c)),
        "ln_pre_g": jnp.ones((c,)), "ln_pre_b": jnp.zeros((c,)),
        "ln_post_g": jnp.ones((c,)), "ln_post_b": jnp.zeros((c,)),
        "proj": scale * jax.random.normal(nk(), (c, output_dim)),
    }
    blocks = []
    for _ in range(layers):
        blocks.append(dict(
            ln1_g=jnp.ones((c,)), ln1_b=jnp.zeros((c,)),
            ln2_g=jnp.ones((c,)), ln2_b=jnp.zeros((c,)),
            qkv_w=0.02 * jax.random.normal(nk(), (c, 3 * c)),
            qkv_b=0.02 * jax.random.normal(nk(), (3 * c,)),
            proj_w=0.02 * jax.random.normal(nk(), (c, c)),
            proj_b=0.02 * jax.random.normal(nk(), (c,)),
            fc_w=0.02 * jax.random.normal(nk(), (c, 4 * c)),
            fc_b=0.02 * jax.random.normal(nk(), (4 * c,)),
            cproj_w=0.02 * jax.random.normal(nk(), (4 * c, c)),
            cproj_b=0.02 * jax.random.normal(nk(), (c,)),
        ))
    p["blocks"] = blocks
    return p


# ----------------------------------------------------------------------------
if __name__ == "__main__":
    # Small, shape-consistent config: 32x32 images, 16x16 patches -> 2x2 grid,
    # 5 tokens; width=32, 4 heads, 8 layers (last 6 are "surgery" blocks, as
    # init_weights installs), output_dim=16.
    batch = 2
    input_resolution = 32
    patch_size = 16
    width = 32
    layers = 8
    heads = 4
    output_dim = 16
    spatial_size = input_resolution // patch_size
    num_surgery = min(6, layers)

    key = jax.random.PRNGKey(0)
    pkey, xkey = jax.random.split(key)
    params = init_params(pkey, width=width, layers=layers, heads=heads,
                         output_dim=output_dim, patch_size=patch_size,
                         spatial_size=spatial_size)
    x = jax.random.normal(
        xkey, (batch, 3, input_resolution, input_resolution), jnp.float32)

    fwd = jax.jit(clip_surgery_vision_forward,
                  static_argnames=("patch_size", "heads", "spatial_size",
                                   "num_surgery", "compute_dtype"))
    # Production default is compute_dtype=bf16 (bf16 MXU + bf16 activations,
    # f32 accumulation / LN / softmax stats); the tiny demo runs f32 to remain
    # numerically identical to the PyTorch module.
    g, vis, x_ori = fwd(params, x, patch_size=patch_size, heads=heads,
                        spatial_size=spatial_size, num_surgery=num_surgery,
                        compute_dtype=jnp.float32)
    jax.block_until_ready((g, vis, x_ori))

    n_spatial = spatial_size * spatial_size
    assert g.shape == (batch, output_dim)
    assert vis.shape == (batch, n_spatial, output_dim)
    assert x_ori.shape == (batch, n_spatial, output_dim)
    print("KERNEL_OK")
</pallas_src>

<mosaic_0001>
module attributes {stable_mosaic.version = 11 : i64} {
  func.func @_matmul_kernel(%arg0: i32, %arg1: memref<8x768xf32, #tpu.memory_space<vmem>>, %arg2: memref<768x32xf32, #tpu.memory_space<vmem>>, %arg3: memref<8x32xf32, #tpu.memory_space<vmem>>) attributes {dimension_semantics = [#tpu.dimension_semantics<parallel>], iteration_bounds = array<i64: 1>, scalar_prefetch = 0 : i64, scratch_operands = 0 : i64, tpu.core_type = #tpu.core_type<tc>, window_params = [{transform_indices = @transform_0, window_bounds = array<i64: 8, 768>}, {pipeline_mode = #tpu.pipeline_mode<synchronous>, transform_indices = @transform_1, window_bounds = array<i64: 768, 32>}, {transform_indices = @transform_2, window_bounds = array<i64: 8, 32>}]} {
    %c0 = arith.constant 0 : index
    %c0_0 = arith.constant 0 : index
    %0 = vector.load %arg1[%c0, %c0_0] : memref<8x768xf32, #tpu.memory_space<vmem>>, vector<8x768xf32>
    %c0_1 = arith.constant 0 : index
    %c0_2 = arith.constant 0 : index
    %1 = vector.load %arg2[%c0_1, %c0_2] : memref<768x32xf32, #tpu.memory_space<vmem>>, vector<768x32xf32>
    %cst = arith.constant dense<0.000000e+00> : vector<8x32xf32>
    %2 = tpu.matmul %0, %1, %cst {dimension_numbers = #tpu.dot_dimension_numbers<[1], [0], [0], [1], [0, 0, 1, 1], [], []>} : vector<8x768xf32>, vector<768x32xf32>, vector<8x32xf32> -> vector<8x32xf32>
    %c0_3 = arith.constant 0 : index
    %c0_4 = arith.constant 0 : index
    %3 = vector.load %arg3[%c0_3, %c0_4] : memref<8x32xf32, #tpu.memory_space<vmem>>, vector<8x32xf32>
    tpu.vector_store %arg3[%c0_3, %c0_4], %2 {strides = array<i32>} : memref<8x32xf32, #tpu.memory_space<vmem>>, vector<8x32xf32>,
    return
  }
  func.func @transform_0(%arg0: i32) -> (i32, i32) {
    %c0_i32 = arith.constant 0 : i32
    %c0_i32_0 = arith.constant 0 : i32
    return %arg0, %c0_i32 : i32, i32
  }
  func.func @transform_1(%arg0: i32) -> (i32, i32) {
    %c0_i32 = arith.constant 0 : i32
    %c0_i32_0 = arith.constant 0 : i32
    %c0_i32_1 = arith.constant 0 : i32
    return %c0_i32, %c0_i32_0 : i32, i32
  }
  func.func @transform_2(%arg0: i32) -> (i32, i32) {
    %c0_i32 = arith.constant 0 : i32
    %c0_i32_0 = arith.constant 0 : i32
    return %arg0, %c0_i32 : i32, i32
  }
}

module attributes {stable_mosaic.version = 11 : i64} {
  func.func @_add_pos_ln_kernel(%arg0: i32, %arg1: memref<1x5x32xf32, #tpu.memory_space<vmem>>, %arg2: memref<5x32xf32, #tpu.memory_space<vmem>>, %arg3: memref<1x32xf32, #tpu.memory_space<vmem>>, %arg4: memref<1x32xf32, #tpu.memory_space<vmem>>, %arg5: memref<1x5x32xf32, #tpu.memory_space<vmem>>) attributes {dimension_semantics = [#tpu.dimension_semantics<parallel>], iteration_bounds = array<i64: 2>, scalar_prefetch = 0 : i64, scratch_operands = 0 : i64, tpu.core_type = #tpu.core_type<tc>, window_params = [{transform_indices = @transform_0, window_bounds = array<i64: 1, 5, 32>}, {pipeline_mode = #tpu.pipeline_mode<synchronous>, transform_indices = @transform_1, window_bounds = array<i64: 5, 32>}, {pipeline_mode = #tpu.pipeline_mode<synchronous>, transform_indices = @transform_2, window_bounds = array<i64: 1, 32>}, {pipeline_mode = #tpu.pipeline_mode<synchronous>, transform_indices = @transform_3, window_bounds = array<i64: 1, 32>}, {transform_indices = @transform_4, window_bounds = array<i64: 1, 5, 32>}]} {
    %c0 = arith.constant 0 : index
    %c0_0 = arith.constant 0 : index
    %c0_1 = arith.constant 0 : index
    %0 = vector.load %arg1[%c0, %c0_0, %c0_1] : memref<1x5x32xf32, #tpu.memory_space<vmem>>, vector<1x5x32xf32>
    %1 = vector.shape_cast %0 : vector<1x5x32xf32> to vector<5x32xf32>
    %c0_2 = arith.constant 0 : index
    %c0_3 = arith.constant 0 : index
    %2 = vector.load %arg2[%c0_2, %c0_3] : memref<5x32xf32, #tpu.memory_space<vmem>>, vector<5x32xf32>
    %3 = arith.addf %1, %2 : vector<5x32xf32>
    %c0_4 = arith.constant 0 : index
    %c0_5 = arith.constant 0 : index
    %4 = vector.load %arg3[%c0_4, %c0_5] : memref<1x32xf32, #tpu.memory_space<vmem>>, vector<1x32xf32>
    %c0_6 = arith.constant 0 : index
    %c0_7 = arith.constant 0 : index
    %5 = vector.load %arg4[%c0_6, %c0_7] : memref<1x32xf32, #tpu.memory_space<vmem>>, vector<1x32xf32>
    %cst = arith.constant dense<0.000000e+00> : vector<5xf32>
    %6 = vector.multi_reduction <add>, %3, %cst [1] : vector<5x32xf32> to vector<5xf32>
    %7 = vector.shape_cast %6 : vector<5xf32> to vector<5x1xf32>
    %cst_8 = arith.constant 3.200000e+01 : f32
    %8 = vector.broadcast %cst_8 : f32 to vector<5x1xf32>
    %9 = arith.divf %7, %8 : vector<5x1xf32>
    %10 = vector.broadcast %9 : vector<5x1xf32> to vector<5x32xf32>
    %11 = arith.subf %3, %10 : vector<5x32xf32>
    %12 = arith.mulf %11, %11 : vector<5x32xf32>
    %cst_9 = arith.constant dense<0.000000e+00> : vector<5xf32>
    %13 = vector.multi_reduction <add>, %12, %cst_9 [1] : vector<5x32xf32> to vector<5xf32>
    %14 = vector.shape_cast %13 : vector<5xf32> to vector<5x1xf32>
    %cst_10 = arith.constant 3.200000e+01 : f32
    %15 = vector.broadcast %cst_10 : f32 to vector<5x1xf32>
    %16 = arith.divf %14, %15 : vector<5x1xf32>
    %17 = vector.broadcast %9 : vector<5x1xf32> to vector<5x32xf32>
    %18 = arith.subf %3, %17 : vector<5x32xf32>
    %cst_11 = arith.constant 9.99999974E-6 : f32
    %19 = vector.broadcast %cst_11 : f32 to vector<5x1xf32>
    %20 = arith.addf %16, %19 : vector<5x1xf32>
    %21 = math.rsqrt %20 : vector<5x1xf32>
    %22 = vector.broadcast %21 : vector<5x1xf32> to vector<5x32xf32>
    %23 = arith.mulf %18, %22 : vector<5x32xf32>
    %24 = vector.broadcast %4 : vector<1x32xf32> to vector<5x32xf32>
    %25 = arith.mulf %23, %24 : vector<5x32xf32>
    %26 = vector.broadcast %5 : vector<1x32xf32> to vector<5x32xf32>
    %27 = arith.addf %25, %26 : vector<5x32xf32>
    %c0_12 = arith.constant 0 : index
    %c0_13 = arith.constant 0 : index
    %c0_14 = arith.constant 0 : index
    %28 = vector.load %arg5[%c0_12, %c0_13, %c0_14] : memref<1x5x32xf32, #tpu.memory_space<vmem>>, vector<1x5x32xf32>
    %29 = vector.shape_cast %28 : vector<1x5x32xf32> to vector<5x32xf32>
    %30 = vector.shape_cast %27 : vector<5x32xf32> to vector<1x5x32xf32>
    tpu.vector_store %arg5[%c0_12, %c0_13, %c0_14], %30 {strides = array<i32>} : memref<1x5x32xf32, #tpu.memory_space<vmem>>, vector<1x5x32xf32>,
    return
  }
  func.func @transform_0(%arg0: i32) -> (i32, i32, i32) {
    %c0_i32 = arith.constant 0 : i32
    %c0_i32_0 = arith.constant 0 : i32
    %c0_i32_1 = arith.constant 0 : i32
    return %arg0, %c0_i32, %c0_i32_0 : i32, i32, i32
  }
  func.func @transform_1(%arg0: i32) -> (i32, i32) {
    %c0_i32 = arith.constant 0 : i32
    %c0_i32_0 = arith.constant 0 : i32
    %c0_i32_1 = arith.constant 0 : i32
    return %c0_i32, %c0_i32_0 : i32, i32
  }
  func.func @transform_2(%arg0: i32) -> (i32, i32) {
    %c0_i32 = arith.constant 0 : i32
    %c0_i32_0 = arith.constant 0 : i32
    %c0_i32_1 = arith.constant 0 : i32
    return %c0_i32, %c0_i32_0 : i32, i32
  }
  func.func @transform_3(%arg0: i32) -> (i32, i32) {
    %c0_i32 = arith.constant 0 : i32
    %c0_i32_0 = arith.constant 0 : i32
    %c0_i32_1 = arith.constant 0 : i32
    return %c0_i32, %c0_i32_0 : i32, i32
  }
  func.func @transform_4(%arg0: i32) -> (i32, i32, i32) {
    %c0_i32 = arith.constant 0 : i32
    %c0_i32_0 = arith.constant 0 : i32
    %c0_i32_1 = arith.constant 0 : i32
    return %arg0, %c0_i32, %c0_i32_0 : i32, i32, i32
  }
}

module attributes {stable_mosaic.version = 11 : i64} {
  func.func @_ln_linear_kernel(%arg0: i32, %arg1: i32, %arg2: memref<10x32xf32, #tpu.memory_space<vmem>>, %arg3: memref<1x32xf32, #tpu.memory_space<vmem>>, %arg4: memref<1x32xf32, #tpu.memory_space<vmem>>, %arg5: memref<32x96xf32, #tpu.memory_space<vmem>>, %arg6: memref<1x96xf32, #tpu.memory_space<vmem>>, %arg7: memref<10x96xf32, #tpu.memory_space<vmem>>) attributes {dimension_semantics = [#tpu.dimension_semantics<parallel>, #tpu.dimension_semantics<parallel>], iteration_bounds = array<i64: 1, 1>, scalar_prefetch = 0 : i64, scratch_operands = 0 : i64, tpu.core_type = #tpu.core_type<tc>, window_params = [{transform_indices = @transform_0, window_bounds = array<i64: 10, 32>}, {pipeline_mode = #tpu.pipeline_mode<synchronous>, transform_indices = @transform_1, window_bounds = array<i64: 1, 32>}, {pipeline_mode = #tpu.pipeline_mode<synchronous>, transform_indices = @transform_2, window_bounds = array<i64: 1, 32>}, {transform_indices = @transform_3, window_bounds = array<i64: 32, 96>}, {transform_indices = @transform_4, window_bounds = array<i64: 1, 96>}, {transform_indices = @transform_5, window_bounds = array<i64: 10, 96>}]} {
    %c0 = arith.constant 0 : index
    %c0_0 = arith.constant 0 : index
    %0 = vector.load %arg2[%c0, %c0_0] : memref<10x32xf32, #tpu.memory_space<vmem>>, vector<10x32xf32>
    %c0_1 = arith.constant 0 : index
    %c0_2 = arith.constant 0 : index
    %1 = vector.load %arg3[%c0_1, %c0_2] : memref<1x32xf32, #tpu.memory_space<vmem>>, vector<1x32xf32>
    %c0_3 = arith.constant 0 : index
    %c0_4 = arith.constant 0 : index
    %2 = vector.load %arg4[%c0_3, %c0_4] : memref<1x32xf32, #tpu.memory_space<vmem>>, vector<1x32xf32>
    %cst = arith.constant dense<0.000000e+00> : vector<10xf32>
    %3 = vector.multi_reduction <add>, %0, %cst [1] : vector<10x32xf32> to vector<10xf32>
    %4 = vector.shape_cast %3 : vector<10xf32> to vector<10x1xf32>
    %cst_5 = arith.constant 3.200000e+01 : f32
    %5 = vector.broadcast %cst_5 : f32 to vector<10x1xf32>
    %6 = arith.divf %4, %5 : vector<10x1xf32>
    %7 = vector.broadcast %6 : vector<10x1xf32> to vector<10x32xf32>
    %8 = arith.subf %0, %7 : vector<10x32xf32>
    %9 = arith.mulf %8, %8 : vector<10x32xf32>
    %cst_6 = arith.constant dense<0.000000e+00> : vector<10xf32>
    %10 = vector.multi_reduction <add>, %9, %cst_6 [1] : vector<10x32xf32> to vector<10xf32>
    %11 = vector.shape_cast %10 : vector<10xf32> to vector<10x1xf32>
    %cst_7 = arith.constant 3.200000e+01 : f32
    %12 = vector.broadcast %cst_7 : f32 to vector<10x1xf32>
    %13 = arith.divf %11, %12 : vector<10x1xf32>
    %14 = vector.broadcast %6 : vector<10x1xf32> to vector<10x32xf32>
    %15 = arith.subf %0, %14 : vector<10x32xf32>
    %cst_8 = arith.constant 9.99999974E-6 : f32
    %16 = vector.broadcast %cst_8 : f32 to vector<10x1xf32>
    %17 = arith.addf %13, %16 : vector<10x1xf32>
    %18 = math.rsqrt %17 : vector<10x1xf32>
    %19 = vector.broadcast %18 : vector<10x1xf32> to vector<10x32xf32>
    %20 = arith.mulf %15, %19 : vector<10x32xf32>
    %21 = vector.broadcast %1 : vector<1x32xf32> to vector<10x32xf32>
    %22 = arith.mulf %20, %21 : vector<10x32xf32>
    %23 = vector.broadcast %2 : vector<1x32xf32> to vector<10x32xf32>
    %24 = arith.addf %22, %23 : vector<10x32xf32>
    %c0_9 = arith.constant 0 : index
    %c0_10 = arith.constant 0 : index
    %25 = vector.load %arg5[%c0_9, %c0_10] : memref<32x96xf32, #tpu.memory_space<vmem>>, vector<32x96xf32>
    %cst_11 = arith.constant dense<0.000000e+00> : vector<10x96xf32>
    %26 = tpu.matmul %24, %25, %cst_11 {dimension_numbers = #tpu.dot_dimension_numbers<[1], [0], [0], [1], [0, 0, 1, 1], [], []>} : vector<10x32xf32>, vector<32x96xf32>, vector<10x96xf32> -> vector<10x96xf32>
    %c0_12 = arith.constant 0 : index
    %c0_13 = arith.constant 0 : index
    %27 = vector.load %arg6[%c0_12, %c0_13] : memref<1x96xf32, #tpu.memory_space<vmem>>, vector<1x96xf32>
    %28 = vector.broadcast %27 : vector<1x96xf32> to vector<10x96xf32>
    %29 = arith.addf %26, %28 : vector<10x96xf32>
    %c0_14 = arith.constant 0 : index
    %c0_15 = arith.constant 0 : index
    %30 = vector.load %arg7[%c0_14, %c0_15] : memref<10x96xf32, #tpu.memory_space<vmem>>, vector<10x96xf32>
    tpu.vector_store %arg7[%c0_14, %c0_15], %29 {strides = array<i32>} : memref<10x96xf32, #tpu.memory_space<vmem>>, vector<10x96xf32>,
    return
  }
  func.func @transform_0(%arg0: i32, %arg1: i32) -> (i32, i32) {
    %c0_i32 = arith.constant 0 : i32
    %c0_i32_0 = arith.constant 0 : i32
    return %arg0, %c0_i32 : i32, i32
  }
  func.func @transform_1(%arg0: i32, %arg1: i32) -> (i32, i32) {
    %c0_i32 = arith.constant 0 : i32
    %c0_i32_0 = arith.constant 0 : i32
    %c0_i32_1 = arith.constant 0 : i32
    return %c0_i32, %c0_i32_0 : i32, i32
  }
  func.func @transform_2(%arg0: i32, %arg1: i32) -> (i32, i32) {
    %c0_i32 = arith.constant 0 : i32
    %c0_i32_0 = arith.constant 0 : i32
    %c0_i32_1 = arith.constant 0 : i32
    return %c0_i32, %c0_i32_0 : i32, i32
  }
  func.func @transform_3(%arg0: i32, %arg1: i32) -> (i32, i32) {
    %c0_i32 = arith.constant 0 : i32
    %c0_i32_0 = arith.constant 0 : i32
    return %c0_i32, %arg1 : i32, i32
  }
  func.func @transform_4(%arg0: i32, %arg1: i32) -> (i32, i32) {
    %c0_i32 = arith.constant 0 : i32
    %c0_i32_0 = arith.constant 0 : i32
    return %c0_i32, %arg1 : i32, i32
  }
  func.func @transform_5(%arg0: i32, %arg1: i32) -> (i32, i32) {
    %c0_i32 = arith.constant 0 : i32
    return %arg0, %arg1 : i32, i32
  }
}

module attributes {stable_mosaic.version = 11 : i64} {
  func.func @_mha_attn_kernel(%arg0: i32, %arg1: i32, %arg2: i32, %arg3: memref<1x2x5x8xf32, #tpu.memory_space<vmem>>, %arg4: memref<1x2x5x8xf32, #tpu.memory_space<vmem>>, %arg5: memref<1x2x5x8xf32, #tpu.memory_space<vmem>>, %arg6: memref<1x5x32xf32, #tpu.memory_space<vmem>>, %arg7: memref<1x16x32xf32, #tpu.memory_space<vmem>>, %arg8: memref<1x32xf32, #tpu.memory_space<vmem>>, %arg9: memref<1x5x32xf32, #tpu.memory_space<vmem>>, %arg10: memref<5x32xf32, #tpu.memory_space<vmem>>) attributes {dimension_semantics = [#tpu.dimension_semantics<parallel>, #tpu.dimension_semantics<parallel>, #tpu.dimension_semantics<arbitrary>], iteration_bounds = array<i64: 2, 1, 2>, scalar_prefetch = 0 : i64, scratch_operands = 1 : i64, tpu.core_type = #tpu.core_type<tc>, window_params = [{transform_indices = @transform_0, window_bounds = array<i64: 1, 2, 5, 8>}, {transform_indices = @transform_1, window_bounds = array<i64: 1, 2, 5, 8>}, {transform_indices = @transform_2, window_bounds = array<i64: 1, 2, 5, 8>}, {transform_indices = @transform_3, window_bounds = array<i64: 1, 5, 32>}, {transform_indices = @transform_4, window_bounds = array<i64: 1, 16, 32>}, {pipeline_mode = #tpu.pipeline_mode<synchronous>, transform_indices = @transform_5, window_bounds = array<i64: 1, 32>}, {transform_indices = @transform_6, window_bounds = array<i64: 1, 5, 32>}]} {
    %c0_i32 = arith.constant 0 : i32
    %0 = arith.cmpi eq, %arg2, %c0_i32 : i32
    %1 = arith.extui %0 : i1 to i32
    %c0_i32_0 = arith.constant 0 : i32
    %2 = arith.cmpi ne, %1, %c0_i32_0 : i32
    scf.if %2 {
      %cst_41 = arith.constant 0.000000e+00 : f32
      %53 = vector.broadcast %cst_41 : f32 to vector<5x32xf32>
      %c0_42 = arith.constant 0 : index
      %c0_43 = arith.constant 0 : index
      %54 = vector.load %arg10[%c0_42, %c0_43] : memref<5x32xf32, #tpu.memory_space<vmem>>, vector<5x32xf32>
      tpu.vector_store %arg10[%c0_42, %c0_43], %53 {strides = array<i32>} : memref<5x32xf32, #tpu.memory_space<vmem>>, vector<5x32xf32>,
    } else {
    }
    %c0 = arith.constant 0 : index
    %c0_1 = arith.constant 0 : index
    %c0_2 = arith.constant 0 : index
    %c0_3 = arith.constant 0 : index
    %3 = vector.load %arg3[%c0, %c0_1, %c0_2, %c0_3] : memref<1x2x5x8xf32, #tpu.memory_space<vmem>>, vector<1x1x5x8xf32>
    %4 = vector.shape_cast %3 : vector<1x1x5x8xf32> to vector<5x8xf32>
    %cst = arith.constant 0.353553385 : f32
    %5 = vector.broadcast %cst : f32 to vector<5x8xf32>
    %6 = arith.mulf %4, %5 : vector<5x8xf32>
    %c0_4 = arith.constant 0 : index
    %c0_5 = arith.constant 0 : index
    %c0_6 = arith.constant 0 : index
    %c0_7 = arith.constant 0 : index
    %7 = vector.load %arg4[%c0_4, %c0_5, %c0_6, %c0_7] : memref<1x2x5x8xf32, #tpu.memory_space<vmem>>, vector<1x1x5x8xf32>
    %8 = vector.shape_cast %7 : vector<1x1x5x8xf32> to vector<5x8xf32>
    %c0_8 = arith.constant 0 : index
    %c0_9 = arith.constant 0 : index
    %c0_10 = arith.constant 0 : index
    %c0_11 = arith.constant 0 : index
    %9 = vector.load %arg5[%c0_8, %c0_9, %c0_10, %c0_11] : memref<1x2x5x8xf32, #tpu.memory_space<vmem>>, vector<1x1x5x8xf32>
    %10 = vector.shape_cast %9 : vector<1x1x5x8xf32> to vector<5x8xf32>
    %cst_12 = arith.constant dense<0.000000e+00> : vector<5x5xf32>
    %11 = tpu.matmul %6, %8, %cst_12 {dimension_numbers = #tpu.dot_dimension_numbers<[1], [1], [0], [0], [0, 0, 1, 0], [], []>} : vector<5x8xf32>, vector<5x8xf32>, vector<5x5xf32> -> vector<5x5xf32>
    %cst_13 = arith.constant dense<0xFF800000> : vector<5xf32>
    %12 = vector.multi_reduction <maximumf>, %11, %cst_13 [1] : vector<5x5xf32> to vector<5xf32>
    %13 = vector.shape_cast %12 : vector<5xf32> to vector<5x1xf32>
    %14 = vector.broadcast %13 : vector<5x1xf32> to vector<5x5xf32>
    %15 = arith.subf %11, %14 : vector<5x5xf32>
    %16 = math.exp %15 : vector<5x5xf32>
    %cst_14 = arith.constant dense<0.000000e+00> : vector<5xf32>
    %17 = vector.multi_reduction <add>, %16, %cst_14 [1] : vector<5x5xf32> to vector<5xf32>
    %18 = vector.shape_cast %17 : vector<5xf32> to vector<5x1xf32>
    %19 = tpu.reciprocal %18 {approx = true} : vector<5x1xf32> -> vector<5x1xf32>
    %20 = vector.broadcast %19 : vector<5x1xf32> to vector<5x5xf32>
    %21 = arith.mulf %16, %20 : vector<5x5xf32>
    %cst_15 = arith.constant dense<0.000000e+00> : vector<5x8xf32>
    %22 = tpu.matmul %21, %10, %cst_15 {dimension_numbers = #tpu.dot_dimension_numbers<[1], [0], [0], [1], [0, 0, 1, 1], [], []>} : vector<5x5xf32>, vector<5x8xf32>, vector<5x8xf32> -> vector<5x8xf32>
    %c0_16 = arith.constant 0 : index
    %c1 = arith.constant 1 : index
    %c0_17 = arith.constant 0 : index
    %c0_18 = arith.constant 0 : index
    %23 = vector.load %arg3[%c0_16, %c1, %c0_17, %c0_18] : memref<1x2x5x8xf32, #tpu.memory_space<vmem>>, vector<1x1x5x8xf32>
    %24 = vector.shape_cast %23 : vector<1x1x5x8xf32> to vector<5x8xf32>
    %cst_19 = arith.constant 0.353553385 : f32
    %25 = vector.broadcast %cst_19 : f32 to vector<5x8xf32>
    %26 = arith.mulf %24, %25 : vector<5x8xf32>
    %c0_20 = arith.constant 0 : index
    %c1_21 = arith.constant 1 : index
    %c0_22 = arith.constant 0 : index
    %c0_23 = arith.constant 0 : index
    %27 = vector.load %arg4[%c0_20, %c1_21, %c0_22, %c0_23] : memref<1x2x5x8xf32, #tpu.memory_space<vmem>>, vector<1x1x5x8xf32>
    %28 = vector.shape_cast %27 : vector<1x1x5x8xf32> to vector<5x8xf32>
    %c0_24 = arith.constant 0 : index
    %c1_25 = arith.constant 1 : index
    %c0_26 = arith.constant 0 : index
    %c0_27 = arith.constant 0 : index
    %29 = vector.load %arg5[%c0_24, %c1_25, %c0_26, %c0_27] : memref<1x2x5x8xf32, #tpu.memory_space<vmem>>, vector<1x1x5x8xf32>
    %30 = vector.shape_cast %29 : vector<1x1x5x8xf32> to vector<5x8xf32>
    %cst_28 = arith.constant dense<0.000000e+00> : vector<5x5xf32>
    %31 = tpu.matmul %26, %28, %cst_28 {dimension_numbers = #tpu.dot_dimension_numbers<[1], [1], [0], [0], [0, 0, 1, 0], [], []>} : vector<5x8xf32>, vector<5x8xf32>, vector<5x5xf32> -> vector<5x5xf32>
    %cst_29 = arith.constant dense<0xFF800000> : vector<5xf32>
    %32 = vector.multi_reduction <maximumf>, %31, %cst_29 [1] : vector<5x5xf32> to vector<5xf32>
    %33 = vector.shape_cast %32 : vector<5xf32> to vector<5x1xf32>
    %34 = vector.broadcast %33 : vector<5x1xf32> to vector<5x5xf32>
    %35 = arith.subf %31, %34 : vector<5x5xf32>
    %36 = math.exp %35 : vector<5x5xf32>
    %cst_30 = arith.constant dense<0.000000e+00> : vector<5xf32>
    %37 = vector.multi_reduction <add>, %36, %cst_30 [1] : vector<5x5xf32> to vector<5xf32>
    %38 = vector.shape_cast %37 : vector<5xf32> to vector<5x1xf32>
    %39 = tpu.reciprocal %38 {approx = true} : vector<5x1xf32> -> vector<5x1xf32>
    %40 = vector.broadcast %39 : vector<5x1xf32> to vector<5x5xf32>
    %41 = arith.mulf %36, %40 : vector<5x5xf32>
    %cst_31 = arith.constant dense<0.000000e+00> : vector<5x8xf32>
    %42 = tpu.matmul %41, %30, %cst_31 {dimension_numbers = #tpu.dot_dimension_numbers<[1], [0], [0], [1], [0, 0, 1, 1], [], []>} : vector<5x5xf32>, vector<5x8xf32>, vector<5x8xf32> -> vector<5x8xf32>
    %43 = tpu.concatenate %22, %42 in 1 : vector<5x8xf32>, vector<5x8xf32> -> vector<5x16xf32>
    %c0_32 = arith.constant 0 : index
    %c0_33 = arith.constant 0 : index
    %44 = vector.load %arg10[%c0_32, %c0_33] : memref<5x32xf32, #tpu.memory_space<vmem>>, vector<5x32xf32>
    %c0_34 = arith.constant 0 : index
    %c0_35 = arith.constant 0 : index
    %c0_36 = arith.constant 0 : index
    %45 = vector.load %arg7[%c0_34, %c0_35, %c0_36] : memref<1x16x32xf32, #tpu.memory_space<vmem>>, vector<1x16x32xf32>
    %46 = vector.shape_cast %45 : vector<1x16x32xf32> to vector<16x32xf32>
    %cst_37 = arith.constant dense<0.000000e+00> : vector<5x32xf32>
    %47 = tpu.matmul %43, %46, %cst_37 {dimension_numbers = #tpu.dot_dimension_numbers<[1], [0], [0], [1], [0, 0, 1, 1], [], []>} : vector<5x16xf32>, vector<16x32xf32>, vector<5x32xf32> -> vector<5x32xf32>
    %48 = arith.addf %44, %47 : vector<5x32xf32>
    %c0_38 = arith.constant 0 : index
    %c0_39 = arith.constant 0 : index
    %49 = vector.load %arg10[%c0_38, %c0_39] : memref<5x32xf32, #tpu.memory_space<vmem>>, vector<5x32xf32>
    tpu.vector_store %arg10[%c0_38, %c0_39], %48 {strides = array<i32>} : memref<5x32xf32, #tpu.memory_space<vmem>>, vector<5x32xf32>,
    %c1_i32 = arith.constant 1 : i32
    %50 = arith.cmpi eq, %arg2, %c1_i32 : i32
    %51 = arith.extui %50 : i1 to i32
    %c0_i32_40 = arith.constant 0 : i32
    %52 = arith.cmpi ne, %51, %c0_i32_40 : i32
    scf.if %52 {
      %c0_41 = arith.constant 0 : index
      %c0_42 = arith.constant 0 : index
      %c0_43 = arith.constant 0 : index
      %53 = vector.load %arg6[%c0_41, %c0_42, %c0_43] : memref<1x5x32xf32, #tpu.memory_space<vmem>>, vector<1x5x32xf32>
      %54 = vector.shape_cast %53 : vector<1x5x32xf32> to vector<5x32xf32>
      %c0_44 = arith.constant 0 : index
      %c0_45 = arith.constant 0 : index
      %55 = vector.load %arg10[%c0_44, %c0_45] : memref<5x32xf32, #tpu.memory_space<vmem>>, vector<5x32xf32>
      %56 = arith.addf %54, %55 : vector<5x32xf32>
      %c0_46 = arith.constant 0 : index
      %c0_47 = arith.constant 0 : index
      %57 = vector.load %arg8[%c0_46, %c0_47] : memref<1x32xf32, #tpu.memory_space<vmem>>, vector<1x32xf32>
      %58 = vector.broadcast %57 : vector<1x32xf32> to vector<5x32xf32>
      %59 = arith.addf %56, %58 : vector<5x32xf32>
      %c0_48 = arith.constant 0 : index
      %c0_49 = arith.constant 0 : index
      %c0_50 = arith.constant 0 : index
      %60 = vector.load %arg9[%c0_48, %c0_49, %c0_50] : memref<1x5x32xf32, #tpu.memory_space<vmem>>, vector<1x5x32xf32>
      %61 = vector.shape_cast %60 : vector<1x5x32xf32> to vector<5x32xf32>
      %62 = vector.shape_cast %59 : vector<5x32xf32> to vector<1x5x32xf32>
      tpu.vector_store %arg9[%c0_48, %c0_49, %c0_50], %62 {strides = array<i32>} : memref<1x5x32xf32, #tpu.memory_space<vmem>>, vector<1x5x32xf32>,
    } else {
    }
    return
  }
  func.func @transform_0(%arg0: i32, %arg1: i32, %arg2: i32) -> (i32, i32, i32, i32) {
    %c0_i32 = arith.constant 0 : i32
    %c0_i32_0 = arith.constant 0 : i32
    return %arg0, %arg2, %arg1, %c0_i32 : i32, i32, i32, i32
  }
  func.func @transform_1(%arg0: i32, %arg1: i32, %arg2: i32) -> (i32, i32, i32, i32) {
    %c2_i32 = arith.constant 2 : i32
    %0 = arith.addi %c2_i32, %arg0 : i32
    %c0_i32 = arith.constant 0 : i32
    %c0_i32_0 = arith.constant 0 : i32
    %c0_i32_1 = arith.constant 0 : i32
    return %0, %arg2, %c0_i32, %c0_i32_0 : i32, i32, i32, i32
  }
  func.func @transform_2(%arg0: i32, %arg1: i32, %arg2: i32) -> (i32, i32, i32, i32) {
    %c4_i32 = arith.constant 4 : i32
    %0 = arith.addi %c4_i32, %arg0 : i32
    %c0_i32 = arith.constant 0 : i32
    %c0_i32_0 = arith.constant 0 : i32
    %c0_i32_1 = arith.constant 0 : i32
    return %0, %arg2, %c0_i32, %c0_i32_0 : i32, i32, i32, i32
  }
  func.func @transform_3(%arg0: i32, %arg1: i32, %arg2: i32) -> (i32, i32, i32) {
    %c0_i32 = arith.constant 0 : i32
    %c0_i32_0 = arith.constant 0 : i32
    return %arg0, %arg1, %c0_i32 : i32, i32, i32
  }
  func.func @transform_4(%arg0: i32, %arg1: i32, %arg2: i32) -> (i32, i32, i32) {
    %c0_i32 = arith.constant 0 : i32
    %c0_i32_0 = arith.constant 0 : i32
    %c0_i32_1 = arith.constant 0 : i32
    return %arg2, %c0_i32, %c0_i32_0 : i32, i32, i32
  }
  func.func @transform_5(%arg0: i32, %arg1: i32, %arg2: i32) -> (i32, i32) {
    %c0_i32 = arith.constant 0 : i32
    %c0_i32_0 = arith.constant 0 : i32
    %c0_i32_1 = arith.constant 0 : i32
    return %c0_i32, %c0_i32_0 : i32, i32
  }
  func.func @transform_6(%arg0: i32, %arg1: i32, %arg2: i32) -> (i32, i32, i32) {
    %c0_i32 = arith.constant 0 : i32
    %c0_i32_0 = arith.constant 0 : i32
    return %arg0, %arg1, %c0_i32 : i32, i32, i32
  }
}

module attributes {stable_mosaic.version = 11 : i64} {
  func.func @_mlp_chunk_kernel(%arg0: i32, %arg1: i32, %arg2: memref<10x32xf32, #tpu.memory_space<vmem>>, %arg3: memref<1x32xf32, #tpu.memory_space<vmem>>, %arg4: memref<1x32xf32, #tpu.memory_space<vmem>>, %arg5: memref<32x128xf32, #tpu.memory_space<vmem>>, %arg6: memref<1x128xf32, #tpu.memory_space<vmem>>, %arg7: memref<128x32xf32, #tpu.memory_space<vmem>>, %arg8: memref<1x32xf32, #tpu.memory_space<vmem>>, %arg9: memref<10x32xf32, #tpu.memory_space<vmem>>, %arg10: memref<10x32xf32, #tpu.memory_space<vmem>>) attributes {dimension_semantics = [#tpu.dimension_semantics<parallel>, #tpu.dimension_semantics<arbitrary>], iteration_bounds = array<i64: 1, 1>, scalar_prefetch = 0 : i64, scratch_operands = 1 : i64, tpu.core_type = #tpu.core_type<tc>, window_params = [{transform_indices = @transform_0, window_bounds = array<i64: 10, 32>}, {pipeline_mode = #tpu.pipeline_mode<synchronous>, transform_indices = @transform_1, window_bounds = array<i64: 1, 32>}, {pipeline_mode = #tpu.pipeline_mode<synchronous>, transform_indices = @transform_2, window_bounds = array<i64: 1, 32>}, {transform_indices = @transform_3, window_bounds = array<i64: 32, 128>}, {transform_indices = @transform_4, window_bounds = array<i64: 1, 128>}, {transform_indices = @transform_5, window_bounds = array<i64: 128, 32>}, {pipeline_mode = #tpu.pipeline_mode<synchronous>, transform_indices = @transform_6, window_bounds = array<i64: 1, 32>}, {transform_indices = @transform_7, window_bounds = array<i64: 10, 32>}]} {
    %c0_i32 = arith.constant 0 : i32
    %0 = arith.cmpi eq, %arg1, %c0_i32 : i32
    %1 = arith.extui %0 : i1 to i32
    %c0_i32_0 = arith.constant 0 : i32
    %2 = arith.cmpi ne, %1, %c0_i32_0 : i32
    scf.if %2 {
      %cst_26 = arith.constant 0.000000e+00 : f32
      %49 = vector.broadcast %cst_26 : f32 to vector<10x32xf32>
      %c0_27 = arith.constant 0 : index
      %c0_28 = arith.constant 0 : index
      %50 = vector.load %arg10[%c0_27, %c0_28] : memref<10x32xf32, #tpu.memory_space<vmem>>, vector<10x32xf32>
      tpu.vector_store %arg10[%c0_27, %c0_28], %49 {strides = array<i32>} : memref<10x32xf32, #tpu.memory_space<vmem>>, vector<10x32xf32>,
    } else {
    }
    %c0 = arith.constant 0 : index
    %c0_1 = arith.constant 0 : index
    %3 = vector.load %arg2[%c0, %c0_1] : memref<10x32xf32, #tpu.memory_space<vmem>>, vector<10x32xf32>
    %c0_2 = arith.constant 0 : index
    %c0_3 = arith.constant 0 : index
    %4 = vector.load %arg3[%c0_2, %c0_3] : memref<1x32xf32, #tpu.memory_space<vmem>>, vector<1x32xf32>
    %c0_4 = arith.constant 0 : index
    %c0_5 = arith.constant 0 : index
    %5 = vector.load %arg4[%c0_4, %c0_5] : memref<1x32xf32, #tpu.memory_space<vmem>>, vector<1x32xf32>
    %cst = arith.constant dense<0.000000e+00> : vector<10xf32>
    %6 = vector.multi_reduction <add>, %3, %cst [1] : vector<10x32xf32> to vector<10xf32>
    %7 = vector.shape_cast %6 : vector<10xf32> to vector<10x1xf32>
    %cst_6 = arith.constant 3.200000e+01 : f32
    %8 = vector.broadcast %cst_6 : f32 to vector<10x1xf32>
    %9 = arith.divf %7, %8 : vector<10x1xf32>
    %10 = vector.broadcast %9 : vector<10x1xf32> to vector<10x32xf32>
    %11 = arith.subf %3, %10 : vector<10x32xf32>
    %12 = arith.mulf %11, %11 : vector<10x32xf32>
    %cst_7 = arith.constant dense<0.000000e+00> : vector<10xf32>
    %13 = vector.multi_reduction <add>, %12, %cst_7 [1] : vector<10x32xf32> to vector<10xf32>
    %14 = vector.shape_cast %13 : vector<10xf32> to vector<10x1xf32>
    %cst_8 = arith.constant 3.200000e+01 : f32
    %15 = vector.broadcast %cst_8 : f32 to vector<10x1xf32>
    %16 = arith.divf %14, %15 : vector<10x1xf32>
    %17 = vector.broadcast %9 : vector<10x1xf32> to vector<10x32xf32>
    %18 = arith.subf %3, %17 : vector<10x32xf32>
    %cst_9 = arith.constant 9.99999974E-6 : f32
    %19 = vector.broadcast %cst_9 : f32 to vector<10x1xf32>
    %20 = arith.addf %16, %19 : vector<10x1xf32>
    %21 = math.rsqrt %20 : vector<10x1xf32>
    %22 = vector.broadcast %21 : vector<10x1xf32> to vector<10x32xf32>
    %23 = arith.mulf %18, %22 : vector<10x32xf32>
    %24 = vector.broadcast %4 : vector<1x32xf32> to vector<10x32xf32>
    %25 = arith.mulf %23, %24 : vector<10x32xf32>
    %26 = vector.broadcast %5 : vector<1x32xf32> to vector<10x32xf32>
    %27 = arith.addf %25, %26 : vector<10x32xf32>
    %c0_10 = arith.constant 0 : index
    %c0_11 = arith.constant 0 : index
    %28 = vector.load %arg5[%c0_10, %c0_11] : memref<32x128xf32, #tpu.memory_space<vmem>>, vector<32x128xf32>
    %cst_12 = arith.constant dense<0.000000e+00> : vector<10x128xf32>
    %29 = tpu.matmul %27, %28, %cst_12 {dimension_numbers = #tpu.dot_dimension_numbers<[1], [0], [0], [1], [0, 0, 1, 1], [], []>} : vector<10x32xf32>, vector<32x128xf32>, vector<10x128xf32> -> vector<10x128xf32>
    %c0_13 = arith.constant 0 : index
    %c0_14 = arith.constant 0 : index
    %30 = vector.load %arg6[%c0_13, %c0_14] : memref<1x128xf32, #tpu.memory_space<vmem>>, vector<1x128xf32>
    %31 = vector.broadcast %30 : vector<1x128xf32> to vector<10x128xf32>
    %32 = arith.addf %29, %31 : vector<10x128xf32>
    %cst_15 = arith.constant 1.702000e+00 : f32
    %33 = vector.broadcast %cst_15 : f32 to vector<10x128xf32>
    %34 = arith.mulf %33, %32 : vector<10x128xf32>
    %35 = arith.negf %34 : vector<10x128xf32>
    %36 = math.exp %35 : vector<10x128xf32>
    %cst_16 = arith.constant 1.000000e+00 : f32
    %37 = vector.broadcast %cst_16 : f32 to vector<10x128xf32>
    %38 = arith.addf %37, %36 : vector<10x128xf32>
    %39 = arith.divf %37, %38 : vector<10x128xf32>
    %40 = arith.mulf %32, %39 : vector<10x128xf32>
    %c0_17 = arith.constant 0 : index
    %c0_18 = arith.constant 0 : index
    %41 = vector.load %arg10[%c0_17, %c0_18] : memref<10x32xf32, #tpu.memory_space<vmem>>, vector<10x32xf32>
    %c0_19 = arith.constant 0 : index
    %c0_20 = arith.constant 0 : index
    %42 = vector.load %arg7[%c0_19, %c0_20] : memref<128x32xf32, #tpu.memory_space<vmem>>, vector<128x32xf32>
    %cst_21 = arith.constant dense<0.000000e+00> : vector<10x32xf32>
    %43 = tpu.matmul %40, %42, %cst_21 {dimension_numbers = #tpu.dot_dimension_numbers<[1], [0], [0], [1], [0, 0, 1, 1], [], []>} : vector<10x128xf32>, vector<128x32xf32>, vector<10x32xf32> -> vector<10x32xf32>
    %44 = arith.addf %41, %43 : vector<10x32xf32>
    %c0_22 = arith.constant 0 : index
    %c0_23 = arith.constant 0 : index
    %45 = vector.load %arg10[%c0_22, %c0_23] : memref<10x32xf32, #tpu.memory_space<vmem>>, vector<10x32xf32>
    tpu.vector_store %arg10[%c0_22, %c0_23], %44 {strides = array<i32>} : memref<10x32xf32, #tpu.memory_space<vmem>>, vector<10x32xf32>,
    %c0_i32_24 = arith.constant 0 : i32
    %46 = arith.cmpi eq, %arg1, %c0_i32_24 : i32
    %47 = arith.extui %46 : i1 to i32
    %c0_i32_25 = arith.constant 0 : i32
    %48 = arith.cmpi ne, %47, %c0_i32_25 : i32
    scf.if %48 {
      %c0_26 = arith.constant 0 : index
      %c0_27 = arith.constant 0 : index
      %49 = vector.load %arg10[%c0_26, %c0_27] : memref<10x32xf32, #tpu.memory_space<vmem>>, vector<10x32xf32>
      %50 = arith.addf %3, %49 : vector<10x32xf32>
      %c0_28 = arith.constant 0 : index
      %c0_29 = arith.constant 0 : index
      %51 = vector.load %arg8[%c0_28, %c0_29] : memref<1x32xf32, #tpu.memory_space<vmem>>, vector<1x32xf32>
      %52 = vector.broadcast %51 : vector<1x32xf32> to vector<10x32xf32>
      %53 = arith.addf %50, %52 : vector<10x32xf32>
      %c0_30 = arith.constant 0 : index
      %c0_31 = arith.constant 0 : index
      %54 = vector.load %arg9[%c0_30, %c0_31] : memref<10x32xf32, #tpu.memory_space<vmem>>, vector<10x32xf32>
      tpu.vector_store %arg9[%c0_30, %c0_31], %53 {strides = array<i32>} : memref<10x32xf32, #tpu.memory_space<vmem>>, vector<10x32xf32>,
    } else {
    }
    return
  }
  func.func @transform_0(%arg0: i32, %arg1: i32) -> (i32, i32) {
    %c0_i32 = arith.constant 0 : i32
    %c0_i32_0 = arith.constant 0 : i32
    return %arg0, %c0_i32 : i32, i32
  }
  func.func @transform_1(%arg0: i32, %arg1: i32) -> (i32, i32) {
    %c0_i32 = arith.constant 0 : i32
    %c0_i32_0 = arith.constant 0 : i32
    %c0_i32_1 = arith.constant 0 : i32
    return %c0_i32, %c0_i32_0 : i32, i32
  }
  func.func @transform_2(%arg0: i32, %arg1: i32) -> (i32, i32) {
    %c0_i32 = arith.constant 0 : i32
    %c0_i32_0 = arith.constant 0 : i32
    %c0_i32_1 = arith.constant 0 : i32
    return %c0_i32, %c0_i32_0 : i32, i32
  }
  func.func @transform_3(%arg0: i32, %arg1: i32) -> (i32, i32) {
    %c0_i32 = arith.constant 0 : i32
    %c0_i32_0 = arith.constant 0 : i32
    return %c0_i32, %arg1 : i32, i32
  }
  func.func @transform_4(%arg0: i32, %arg1: i32) -> (i32, i32) {
    %c0_i32 = arith.constant 0 : i32
    %c0_i32_0 = arith.constant 0 : i32
    return %c0_i32, %arg1 : i32, i32
  }
  func.func @transform_5(%arg0: i32, %arg1: i32) -> (i32, i32) {
    %c0_i32 = arith.constant 0 : i32
    %c0_i32_0 = arith.constant 0 : i32
    return %arg1, %c0_i32 : i32, i32
  }
  func.func @transform_6(%arg0: i32, %arg1: i32) -> (i32, i32) {
    %c0_i32 = arith.constant 0 : i32
    %c0_i32_0 = arith.constant 0 : i32
    %c0_i32_1 = arith.constant 0 : i32
    return %c0_i32, %c0_i32_0 : i32, i32
  }
  func.func @transform_7(%arg0: i32, %arg1: i32) -> (i32, i32) {
    %c0_i32 = arith.constant 0 : i32
    %c0_i32_0 = arith.constant 0 : i32
    return %arg0, %c0_i32 : i32, i32
  }
}

module attributes {stable_mosaic.version = 11 : i64} {
  func.func @_surgery_attn_kernel(%arg0: i32, %arg1: i32, %arg2: i32, %arg3: memref<1x2x5x8xf32, #tpu.memory_space<vmem>>, %arg4: memref<1x2x5x8xf32, #tpu.memory_space<vmem>>, %arg5: memref<1x2x5x8xf32, #tpu.memory_space<vmem>>, %arg6: memref<1x2x5x8xf32, #tpu.memory_space<vmem>>, %arg7: memref<1x5x32xf32, #tpu.memory_space<vmem>>, %arg8: memref<1x5x32xf32, #tpu.memory_space<vmem>>, %arg9: memref<1x16x32xf32, #tpu.memory_space<vmem>>, %arg10: memref<1x32xf32, #tpu.memory_space<vmem>>, %arg11: memref<1x5x32xf32, #tpu.memory_space<vmem>>, %arg12: memref<1x5x32xf32, #tpu.memory_space<vmem>>, %arg13: memref<5x32xf32, #tpu.memory_space<vmem>>, %arg14: memref<5x32xf32, #tpu.memory_space<vmem>>) attributes {dimension_semantics = [#tpu.dimension_semantics<parallel>, #tpu.dimension_semantics<parallel>, #tpu.dimension_semantics<arbitrary>], iteration_bounds = array<i64: 2, 1, 2>, scalar_prefetch = 0 : i64, scratch_operands = 2 : i64, tpu.core_type = #tpu.core_type<tc>, window_params = [{transform_indices = @transform_0, window_bounds = array<i64: 1, 2, 5, 8>}, {transform_indices = @transform_1, window_bounds = array<i64: 1, 2, 5, 8>}, {transform_indices = @transform_2, window_bounds = array<i64: 1, 2, 5, 8>}, {transform_indices = @transform_3, window_bounds = array<i64: 1, 2, 5, 8>}, {transform_indices = @transform_4, window_bounds = array<i64: 1, 5, 32>}, {transform_indices = @transform_5, window_bounds = array<i64: 1, 5, 32>}, {transform_indices = @transform_6, window_bounds = array<i64: 1, 16, 32>}, {pipeline_mode = #tpu.pipeline_mode<synchronous>, transform_indices = @transform_7, window_bounds = array<i64: 1, 32>}, {transform_indices = @transform_8, window_bounds = array<i64: 1, 5, 32>}, {transform_indices = @transform_9, window_bounds = array<i64: 1, 5, 32>}]} {
    %c0_i32 = arith.constant 0 : i32
    %0 = arith.cmpi eq, %arg2, %c0_i32 : i32
    %1 = arith.extui %0 : i1 to i32
    %c0_i32_0 = arith.constant 0 : i32
    %2 = arith.cmpi ne, %1, %c0_i32_0 : i32
    scf.if %2 {
      %cst_64 = arith.constant 0.000000e+00 : f32
      %90 = vector.broadcast %cst_64 : f32 to vector<5x32xf32>
      %c0_65 = arith.constant 0 : index
      %c0_66 = arith.constant 0 : index
      %91 = vector.load %arg13[%c0_65, %c0_66] : memref<5x32xf32, #tpu.memory_space<vmem>>, vector<5x32xf32>
      tpu.vector_store %arg13[%c0_65, %c0_66], %90 {strides = array<i32>} : memref<5x32xf32, #tpu.memory_space<vmem>>, vector<5x32xf32>,
      %cst_67 = arith.constant 0.000000e+00 : f32
      %92 = vector.broadcast %cst_67 : f32 to vector<5x32xf32>
      %c0_68 = arith.constant 0 : index
      %c0_69 = arith.constant 0 : index
      %93 = vector.load %arg14[%c0_68, %c0_69] : memref<5x32xf32, #tpu.memory_space<vmem>>, vector<5x32xf32>
      tpu.vector_store %arg14[%c0_68, %c0_69], %92 {strides = array<i32>} : memref<5x32xf32, #tpu.memory_space<vmem>>, vector<5x32xf32>,
    } else {
    }
    %c0 = arith.constant 0 : index
    %c0_1 = arith.constant 0 : index
    %c0_2 = arith.constant 0 : index
    %c0_3 = arith.constant 0 : index
    %3 = vector.load %arg3[%c0, %c0_1, %c0_2, %c0_3] : memref<1x2x5x8xf32, #tpu.memory_space<vmem>>, vector<1x1x5x8xf32>
    %4 = vector.shape_cast %3 : vector<1x1x5x8xf32> to vector<5x8xf32>
    %cst = arith.constant 0.353553385 : f32
    %5 = vector.broadcast %cst : f32 to vector<5x8xf32>
    %6 = arith.mulf %4, %5 : vector<5x8xf32>
    %c0_4 = arith.constant 0 : index
    %c0_5 = arith.constant 0 : index
    %c0_6 = arith.constant 0 : index
    %c0_7 = arith.constant 0 : index
    %7 = vector.load %arg4[%c0_4, %c0_5, %c0_6, %c0_7] : memref<1x2x5x8xf32, #tpu.memory_space<vmem>>, vector<1x1x5x8xf32>
    %8 = vector.shape_cast %7 : vector<1x1x5x8xf32> to vector<5x8xf32>
    %c0_8 = arith.constant 0 : index
    %c0_9 = arith.constant 0 : index
    %c0_10 = arith.constant 0 : index
    %c0_11 = arith.constant 0 : index
    %9 = vector.load %arg5[%c0_8, %c0_9, %c0_10, %c0_11] : memref<1x2x5x8xf32, #tpu.memory_space<vmem>>, vector<1x1x5x8xf32>
    %10 = vector.shape_cast %9 : vector<1x1x5x8xf32> to vector<5x8xf32>
    %c0_12 = arith.constant 0 : index
    %c0_13 = arith.constant 0 : index
    %c0_14 = arith.constant 0 : index
    %c0_15 = arith.constant 0 : index
    %11 = vector.load %arg6[%c0_12, %c0_13, %c0_14, %c0_15] : memref<1x2x5x8xf32, #tpu.memory_space<vmem>>, vector<1x1x5x8xf32>
    %12 = vector.shape_cast %11 : vector<1x1x5x8xf32> to vector<5x8xf32>
    %cst_16 = arith.constant 0.353553385 : f32
    %13 = vector.broadcast %cst_16 : f32 to vector<5x8xf32>
    %14 = arith.mulf %12, %13 : vector<5x8xf32>
    %cst_17 = arith.constant dense<0.000000e+00> : vector<5x5xf32>
    %15 = tpu.matmul %6, %8, %cst_17 {dimension_numbers = #tpu.dot_dimension_numbers<[1], [1], [0], [0], [0, 0, 1, 0], [], []>} : vector<5x8xf32>, vector<5x8xf32>, vector<5x5xf32> -> vector<5x5xf32>
    %cst_18 = arith.constant dense<0xFF800000> : vector<5xf32>
    %16 = vector.multi_reduction <maximumf>, %15, %cst_18 [1] : vector<5x5xf32> to vector<5xf32>
    %17 = vector.shape_cast %16 : vector<5xf32> to vector<5x1xf32>
    %18 = vector.broadcast %17 : vector<5x1xf32> to vector<5x5xf32>
    %19 = arith.subf %15, %18 : vector<5x5xf32>
    %20 = math.exp %19 : vector<5x5xf32>
    %cst_19 = arith.constant dense<0.000000e+00> : vector<5xf32>
    %21 = vector.multi_reduction <add>, %20, %cst_19 [1] : vector<5x5xf32> to vector<5xf32>
    %22 = vector.shape_cast %21 : vector<5xf32> to vector<5x1xf32>
    %23 = tpu.reciprocal %22 {approx = true} : vector<5x1xf32> -> vector<5x1xf32>
    %24 = vector.broadcast %23 : vector<5x1xf32> to vector<5x5xf32>
    %25 = arith.mulf %20, %24 : vector<5x5xf32>
    %cst_20 = arith.constant dense<0.000000e+00> : vector<5x8xf32>
    %26 = tpu.matmul %25, %10, %cst_20 {dimension_numbers = #tpu.dot_dimension_numbers<[1], [0], [0], [1], [0, 0, 1, 1], [], []>} : vector<5x5xf32>, vector<5x8xf32>, vector<5x8xf32> -> vector<5x8xf32>
    %cst_21 = arith.constant dense<0.000000e+00> : vector<5x5xf32>
    %27 = tpu.matmul %14, %10, %cst_21 {dimension_numbers = #tpu.dot_dimension_numbers<[1], [1], [0], [0], [0, 0, 1, 0], [], []>} : vector<5x8xf32>, vector<5x8xf32>, vector<5x5xf32> -> vector<5x5xf32>
    %cst_22 = arith.constant dense<0xFF800000> : vector<5xf32>
    %28 = vector.multi_reduction <maximumf>, %27, %cst_22 [1] : vector<5x5xf32> to vector<5xf32>
    %29 = vector.shape_cast %28 : vector<5xf32> to vector<5x1xf32>
    %30 = vector.broadcast %29 : vector<5x1xf32> to vector<5x5xf32>
    %31 = arith.subf %27, %30 : vector<5x5xf32>
    %32 = math.exp %31 : vector<5x5xf32>
    %cst_23 = arith.constant dense<0.000000e+00> : vector<5xf32>
    %33 = vector.multi_reduction <add>, %32, %cst_23 [1] : vector<5x5xf32> to vector<5xf32>
    %34 = vector.shape_cast %33 : vector<5xf32> to vector<5x1xf32>
    %35 = tpu.reciprocal %34 {approx = true} : vector<5x1xf32> -> vector<5x1xf32>
    %36 = vector.broadcast %35 : vector<5x1xf32> to vector<5x5xf32>
    %37 = arith.mulf %32, %36 : vector<5x5xf32>
    %cst_24 = arith.constant dense<0.000000e+00> : vector<5x8xf32>
    %38 = tpu.matmul %37, %10, %cst_24 {dimension_numbers = #tpu.dot_dimension_numbers<[1], [0], [0], [1], [0, 0, 1, 1], [], []>} : vector<5x5xf32>, vector<5x8xf32>, vector<5x8xf32> -> vector<5x8xf32>
    %c0_25 = arith.constant 0 : index
    %c1 = arith.constant 1 : index
    %c0_26 = arith.constant 0 : index
    %c0_27 = arith.constant 0 : index
    %39 = vector.load %arg3[%c0_25, %c1, %c0_26, %c0_27] : memref<1x2x5x8xf32, #tpu.memory_space<vmem>>, vector<1x1x5x8xf32>
    %40 = vector.shape_cast %39 : vector<1x1x5x8xf32> to vector<5x8xf32>
    %cst_28 = arith.constant 0.353553385 : f32
    %41 = vector.broadcast %cst_28 : f32 to vector<5x8xf32>
    %42 = arith.mulf %40, %41 : vector<5x8xf32>
    %c0_29 = arith.constant 0 : index
    %c1_30 = arith.constant 1 : index
    %c0_31 = arith.constant 0 : index
    %c0_32 = arith.constant 0 : index
    %43 = vector.load %arg4[%c0_29, %c1_30, %c0_31, %c0_32] : memref<1x2x5x8xf32, #tpu.memory_space<vmem>>, vector<1x1x5x8xf32>
    %44 = vector.shape_cast %43 : vector<1x1x5x8xf32> to vector<5x8xf32>
    %c0_33 = arith.constant 0 : index
    %c1_34 = arith.constant 1 : index
    %c0_35 = arith.constant 0 : index
    %c0_36 = arith.constant 0 : index
    %45 = vector.load %arg5[%c0_33, %c1_34, %c0_35, %c0_36] : memref<1x2x5x8xf32, #tpu.memory_space<vmem>>, vector<1x1x5x8xf32>
    %46 = vector.shape_cast %45 : vector<1x1x5x8xf32> to vector<5x8xf32>
    %c0_37 = arith.constant 0 : index
    %c1_38 = arith.constant 1 : index
    %c0_39 = arith.constant 0 : index
    %c0_40 = arith.constant 0 : index
    %47 = vector.load %arg6[%c0_37, %c1_38, %c0_39, %c0_40] : memref<1x2x5x8xf32, #tpu.memory_space<vmem>>, vector<1x1x5x8xf32>
    %48 = vector.shape_cast %47 : vector<1x1x5x8xf32> to vector<5x8xf32>
    %cst_41 = arith.constant 0.353553385 : f32
    %49 = vector.broadcast %cst_41 : f32 to vector<5x8xf32>
    %50 = arith.mulf %48, %49 : vector<5x8xf32>
    %cst_42 = arith.constant dense<0.000000e+00> : vector<5x5xf32>
    %51 = tpu.matmul %42, %44, %cst_42 {dimension_numbers = #tpu.dot_dimension_numbers<[1], [1], [0], [0], [0, 0, 1, 0], [], []>} : vector<5x8xf32>, vector<5x8xf32>, vector<5x5xf32> -> vector<5x5xf32>
    %cst_43 = arith.constant dense<0xFF800000> : vector<5xf32>
    %52 = vector.multi_reduction <maximumf>, %51, %cst_43 [1] : vector<5x5xf32> to vector<5xf32>
    %53 = vector.shape_cast %52 : vector<5xf32> to vector<5x1xf32>
    %54 = vector.broadcast %53 : vector<5x1xf32> to vector<5x5xf32>
    %55 = arith.subf %51, %54 : vector<5x5xf32>
    %56 = math.exp %55 : vector<5x5xf32>
    %cst_44 = arith.constant dense<0.000000e+00> : vector<5xf32>
    %57 = vector.multi_reduction <add>, %56, %cst_44 [1] : vector<5x5xf32> to vector<5xf32>
    %58 = vector.shape_cast %57 : vector<5xf32> to vector<5x1xf32>
    %59 = tpu.reciprocal %58 {approx = true} : vector<5x1xf32> -> vector<5x1xf32>
    %60 = vector.broadcast %59 : vector<5x1xf32> to vector<5x5xf32>
    %61 = arith.mulf %56, %60 : vector<5x5xf32>
    %cst_45 = arith.constant dense<0.000000e+00> : vector<5x8xf32>
    %62 = tpu.matmul %61, %46, %cst_45 {dimension_numbers = #tpu.dot_dimension_numbers<[1], [0], [0], [1], [0, 0, 1, 1], [], []>} : vector<5x5xf32>, vector<5x8xf32>, vector<5x8xf32> -> vector<5x8xf32>
    %cst_46 = arith.constant dense<0.000000e+00> : vector<5x5xf32>
    %63 = tpu.matmul %50, %46, %cst_46 {dimension_numbers = #tpu.dot_dimension_numbers<[1], [1], [0], [0], [0, 0, 1, 0], [], []>} : vector<5x8xf32>, vector<5x8xf32>, vector<5x5xf32> -> vector<5x5xf32>
    %cst_47 = arith.constant dense<0xFF800000> : vector<5xf32>
    %64 = vector.multi_reduction <maximumf>, %63, %cst_47 [1] : vector<5x5xf32> to vector<5xf32>
    %65 = vector.shape_cast %64 : vector<5xf32> to vector<5x1xf32>
    %66 = vector.broadcast %65 : vector<5x1xf32> to vector<5x5xf32>
    %67 = arith.subf %63, %66 : vector<5x5xf32>
    %68 = math.exp %67 : vector<5x5xf32>
    %cst_48 = arith.constant dense<0.000000e+00> : vector<5xf32>
    %69 = vector.multi_reduction <add>, %68, %cst_48 [1] : vector<5x5xf32> to vector<5xf32>
    %70 = vector.shape_cast %69 : vector<5xf32> to vector<5x1xf32>
    %71 = tpu.reciprocal %70 {approx = true} : vector<5x1xf32> -> vector<5x1xf32>
    %72 = vector.broadcast %71 : vector<5x1xf32> to vector<5x5xf32>
    %73 = arith.mulf %68, %72 : vector<5x5xf32>
    %cst_49 = arith.constant dense<0.000000e+00> : vector<5x8xf32>
    %74 = tpu.matmul %73, %46, %cst_49 {dimension_numbers = #tpu.dot_dimension_numbers<[1], [0], [0], [1], [0, 0, 1, 1], [], []>} : vector<5x5xf32>, vector<5x8xf32>, vector<5x8xf32> -> vector<5x8xf32>
    %75 = tpu.concatenate %38, %74 in 1 : vector<5x8xf32>, vector<5x8xf32> -> vector<5x16xf32>
    %76 = tpu.concatenate %26, %62 in 1 : vector<5x8xf32>, vector<5x8xf32> -> vector<5x16xf32>
    %c0_50 = arith.constant 0 : index
    %c0_51 = arith.constant 0 : index
    %c0_52 = arith.constant 0 : index
    %77 = vector.load %arg9[%c0_50, %c0_51, %c0_52] : memref<1x16x32xf32, #tpu.memory_space<vmem>>, vector<1x16x32xf32>
    %78 = vector.shape_cast %77 : vector<1x16x32xf32> to vector<16x32xf32>
    %c0_53 = arith.constant 0 : index
    %c0_54 = arith.constant 0 : index
    %79 = vector.load %arg13[%c0_53, %c0_54] : memref<5x32xf32, #tpu.memory_space<vmem>>, vector<5x32xf32>
    %cst_55 = arith.constant dense<0.000000e+00> : vector<5x32xf32>
    %80 = tpu.matmul %75, %78, %cst_55 {dimension_numbers = #tpu.dot_dimension_numbers<[1], [0], [0], [1], [0, 0, 1, 1], [], []>} : vector<5x16xf32>, vector<16x32xf32>, vector<5x32xf32> -> vector<5x32xf32>
    %81 = arith.addf %79, %80 : vector<5x32xf32>
    %c0_56 = arith.constant 0 : index
    %c0_57 = arith.constant 0 : index
    %82 = vector.load %arg13[%c0_56, %c0_57] : memref<5x32xf32, #tpu.memory_space<vmem>>, vector<5x32xf32>
    tpu.vector_store %arg13[%c0_56, %c0_57], %81 {strides = array<i32>} : memref<5x32xf32, #tpu.memory_space<vmem>>, vector<5x32xf32>,
    %c0_58 = arith.constant 0 : index
    %c0_59 = arith.constant 0 : index
    %83 = vector.load %arg14[%c0_58, %c0_59] : memref<5x32xf32, #tpu.memory_space<vmem>>, vector<5x32xf32>
    %cst_60 = arith.constant dense<0.000000e+00> : vector<5x32xf32>
    %84 = tpu.matmul %76, %78, %cst_60 {dimension_numbers = #tpu.dot_dimension_numbers<[1], [0], [0], [1], [0, 0, 1, 1], [], []>} : vector<5x16xf32>, vector<16x32xf32>, vector<5x32xf32> -> vector<5x32xf32>
    %85 = arith.addf %83, %84 : vector<5x32xf32>
    %c0_61 = arith.constant 0 : index
    %c0_62 = arith.constant 0 : index
    %86 = vector.load %arg14[%c0_61, %c0_62] : memref<5x32xf32, #tpu.memory_space<vmem>>, vector<5x32xf32>
    tpu.vector_store %arg14[%c0_61, %c0_62], %85 {strides = array<i32>} : memref<5x32xf32, #tpu.memory_space<vmem>>, vector<5x32xf32>,
    %c1_i32 = arith.constant 1 : i32
    %87 = arith.cmpi eq, %arg2, %c1_i32 : i32
    %88 = arith.extui %87 : i1 to i32
    %c0_i32_63 = arith.constant 0 : i32
    %89 = arith.cmpi ne, %88, %c0_i32_63 : i32
    scf.if %89 {
      %c0_64 = arith.constant 0 : index
      %c0_65 = arith.constant 0 : index
      %90 = vector.load %arg10[%c0_64, %c0_65] : memref<1x32xf32, #tpu.memory_space<vmem>>, vector<1x32xf32>
      %c0_66 = arith.constant 0 : index
      %c0_67 = arith.constant 0 : index
      %c0_68 = arith.constant 0 : index
      %91 = vector.load %arg7[%c0_66, %c0_67, %c0_68] : memref<1x5x32xf32, #tpu.memory_space<vmem>>, vector<1x5x32xf32>
      %92 = vector.shape_cast %91 : vector<1x5x32xf32> to vector<5x32xf32>
      %c0_69 = arith.constant 0 : index
      %c0_70 = arith.constant 0 : index
      %93 = vector.load %arg13[%c0_69, %c0_70] : memref<5x32xf32, #tpu.memory_space<vmem>>, vector<5x32xf32>
      %94 = arith.addf %92, %93 : vector<5x32xf32>
      %95 = vector.broadcast %90 : vector<1x32xf32> to vector<5x32xf32>
      %96 = arith.addf %94, %95 : vector<5x32xf32>
      %c0_71 = arith.constant 0 : index
      %c0_72 = arith.constant 0 : index
      %c0_73 = arith.constant 0 : index
      %97 = vector.load %arg11[%c0_71, %c0_72, %c0_73] : memref<1x5x32xf32, #tpu.memory_space<vmem>>, vector<1x5x32xf32>
      %98 = vector.shape_cast %97 : vector<1x5x32xf32> to vector<5x32xf32>
      %99 = vector.shape_cast %96 : vector<5x32xf32> to vector<1x5x32xf32>
      tpu.vector_store %arg11[%c0_71, %c0_72, %c0_73], %99 {strides = array<i32>} : memref<1x5x32xf32, #tpu.memory_space<vmem>>, vector<1x5x32xf32>,
      %c0_74 = arith.constant 0 : index
      %c0_75 = arith.constant 0 : index
      %c0_76 = arith.constant 0 : index
      %100 = vector.load %arg8[%c0_74, %c0_75, %c0_76] : memref<1x5x32xf32, #tpu.memory_space<vmem>>, vector<1x5x32xf32>
      %101 = vector.shape_cast %100 : vector<1x5x32xf32> to vector<5x32xf32>
      %c0_77 = arith.constant 0 : index
      %c0_78 = arith.constant 0 : index
      %102 = vector.load %arg14[%c0_77, %c0_78] : memref<5x32xf32, #tpu.memory_space<vmem>>, vector<5x32xf32>
      %103 = arith.addf %101, %102 : vector<5x32xf32>
      %104 = vector.broadcast %90 : vector<1x32xf32> to vector<5x32xf32>
      %105 = arith.addf %103, %104 : vector<5x32xf32>
      %c0_79 = arith.constant 0 : index
      %c0_80 = arith.constant 0 : index
      %c0_81 = arith.constant 0 : index
      %106 = vector.load %arg12[%c0_79, %c0_80, %c0_81] : memref<1x5x32xf32, #tpu.memory_space<vmem>>, vector<1x5x32xf32>
      %107 = vector.shape_cast %106 : vector<1x5x32xf32> to vector<5x32xf32>
      %108 = vector.shape_cast %105 : vector<5x32xf32> to vector<1x5x32xf32>
      tpu.vector_store %arg12[%c0_79, %c0_80, %c0_81], %108 {strides = array<i32>} : memref<1x5x32xf32, #tpu.memory_space<vmem>>, vector<1x5x32xf32>,
    } else {
    }
    return
  }
  func.func @transform_0(%arg0: i32, %arg1: i32, %arg2: i32) -> (i32, i32, i32, i32) {
    %c0_i32 = arith.constant 0 : i32
    %c0_i32_0 = arith.constant 0 : i32
    return %arg0, %arg2, %arg1, %c0_i32 : i32, i32, i32, i32
  }
  func.func @transform_1(%arg0: i32, %arg1: i32, %arg2: i32) -> (i32, i32, i32, i32) {
    %c2_i32 = arith.constant 2 : i32
    %0 = arith.addi %c2_i32, %arg0 : i32
    %c0_i32 = arith.constant 0 : i32
    %c0_i32_0 = arith.constant 0 : i32
    %c0_i32_1 = arith.constant 0 : i32
    return %0, %arg2, %c0_i32, %c0_i32_0 : i32, i32, i32, i32
  }
  func.func @transform_2(%arg0: i32, %arg1: i32, %arg2: i32) -> (i32, i32, i32, i32) {
    %c4_i32 = arith.constant 4 : i32
    %0 = arith.addi %c4_i32, %arg0 : i32
    %c0_i32 = arith.constant 0 : i32
    %c0_i32_0 = arith.constant 0 : i32
    %c0_i32_1 = arith.constant 0 : i32
    return %0, %arg2, %c0_i32, %c0_i32_0 : i32, i32, i32, i32
  }
  func.func @transform_3(%arg0: i32, %arg1: i32, %arg2: i32) -> (i32, i32, i32, i32) {
    %c4_i32 = arith.constant 4 : i32
    %0 = arith.addi %c4_i32, %arg0 : i32
    %c0_i32 = arith.constant 0 : i32
    %c0_i32_0 = arith.constant 0 : i32
    return %0, %arg2, %arg1, %c0_i32 : i32, i32, i32, i32
  }
  func.func @transform_4(%arg0: i32, %arg1: i32, %arg2: i32) -> (i32, i32, i32) {
    %c0_i32 = arith.constant 0 : i32
    %c0_i32_0 = arith.constant 0 : i32
    return %arg0, %arg1, %c0_i32 : i32, i32, i32
  }
  func.func @transform_5(%arg0: i32, %arg1: i32, %arg2: i32) -> (i32, i32, i32) {
    %c0_i32 = arith.constant 0 : i32
    %c0_i32_0 = arith.constant 0 : i32
    return %arg0, %arg1, %c0_i32 : i32, i32, i32
  }
  func.func @transform_6(%arg0: i32, %arg1: i32, %arg2: i32) -> (i32, i32, i32) {
    %c0_i32 = arith.constant 0 : i32
    %c0_i32_0 = arith.constant 0 : i32
    %c0_i32_1 = arith.constant 0 : i32
    return %arg2, %c0_i32, %c0_i32_0 : i32, i32, i32
  }
  func.func @transform_7(%arg0: i32, %arg1: i32, %arg2: i32) -> (i32, i32) {
    %c0_i32 = arith.constant 0 : i32
    %c0_i32_0 = arith.constant 0 : i32
    %c0_i32_1 = arith.constant 0 : i32
    return %c0_i32, %c0_i32_0 : i32, i32
  }
  func.func @transform_8(%arg0: i32, %arg1: i32, %arg2: i32) -> (i32, i32, i32) {
    %c0_i32 = arith.constant 0 : i32
    %c0_i32_0 = arith.constant 0 : i32
    return %arg0, %arg1, %c0_i32 : i32, i32, i32
  }
  func.func @transform_9(%arg0: i32, %arg1: i32, %arg2: i32) -> (i32, i32, i32) {
    %c0_i32 = arith.constant 0 : i32
    %c0_i32_0 = arith.constant 0 : i32
    return %arg0, %arg1, %c0_i32 : i32, i32, i32
  }
}

module attributes {stable_mosaic.version = 11 : i64} {
  func.func @_ln_linear_kernel(%arg0: i32, %arg1: i32, %arg2: memref<20x32xf32, #tpu.memory_space<vmem>>, %arg3: memref<1x32xf32, #tpu.memory_space<vmem>>, %arg4: memref<1x32xf32, #tpu.memory_space<vmem>>, %arg5: memref<32x16xf32, #tpu.memory_space<vmem>>, %arg6: memref<1x16xf32, #tpu.memory_space<vmem>>, %arg7: memref<20x16xf32, #tpu.memory_space<vmem>>) attributes {dimension_semantics = [#tpu.dimension_semantics<parallel>, #tpu.dimension_semantics<parallel>], iteration_bounds = array<i64: 1, 1>, scalar_prefetch = 0 : i64, scratch_operands = 0 : i64, tpu.core_type = #tpu.core_type<tc>, window_params = [{transform_indices = @transform_0, window_bounds = array<i64: 20, 32>}, {pipeline_mode = #tpu.pipeline_mode<synchronous>, transform_indices = @transform_1, window_bounds = array<i64: 1, 32>}, {pipeline_mode = #tpu.pipeline_mode<synchronous>, transform_indices = @transform_2, window_bounds = array<i64: 1, 32>}, {transform_indices = @transform_3, window_bounds = array<i64: 32, 16>}, {transform_indices = @transform_4, window_bounds = array<i64: 1, 16>}, {transform_indices = @transform_5, window_bounds = array<i64: 20, 16>}]} {
    %c0 = arith.constant 0 : index
    %c0_0 = arith.constant 0 : index
    %0 = vector.load %arg2[%c0, %c0_0] : memref<20x32xf32, #tpu.memory_space<vmem>>, vector<20x32xf32>
    %c0_1 = arith.constant 0 : index
    %c0_2 = arith.constant 0 : index
    %1 = vector.load %arg3[%c0_1, %c0_2] : memref<1x32xf32, #tpu.memory_space<vmem>>, vector<1x32xf32>
    %c0_3 = arith.constant 0 : index
    %c0_4 = arith.constant 0 : index
    %2 = vector.load %arg4[%c0_3, %c0_4] : memref<1x32xf32, #tpu.memory_space<vmem>>, vector<1x32xf32>
    %cst = arith.constant dense<0.000000e+00> : vector<20xf32>
    %3 = vector.multi_reduction <add>, %0, %cst [1] : vector<20x32xf32> to vector<20xf32>
    %4 = vector.shape_cast %3 : vector<20xf32> to vector<20x1xf32>
    %cst_5 = arith.constant 3.200000e+01 : f32
    %5 = vector.broadcast %cst_5 : f32 to vector<20x1xf32>
    %6 = arith.divf %4, %5 : vector<20x1xf32>
    %7 = vector.broadcast %6 : vector<20x1xf32> to vector<20x32xf32>
    %8 = arith.subf %0, %7 : vector<20x32xf32>
    %9 = arith.mulf %8, %8 : vector<20x32xf32>
    %cst_6 = arith.constant dense<0.000000e+00> : vector<20xf32>
    %10 = vector.multi_reduction <add>, %9, %cst_6 [1] : vector<20x32xf32> to vector<20xf32>
    %11 = vector.shape_cast %10 : vector<20xf32> to vector<20x1xf32>
    %cst_7 = arith.constant 3.200000e+01 : f32
    %12 = vector.broadcast %cst_7 : f32 to vector<20x1xf32>
    %13 = arith.divf %11, %12 : vector<20x1xf32>
    %14 = vector.broadcast %6 : vector<20x1xf32> to vector<20x32xf32>
    %15 = arith.subf %0, %14 : vector<20x32xf32>
    %cst_8 = arith.constant 9.99999974E-6 : f32
    %16 = vector.broadcast %cst_8 : f32 to vector<20x1xf32>
    %17 = arith.addf %13, %16 : vector<20x1xf32>
    %18 = math.rsqrt %17 : vector<20x1xf32>
    %19 = vector.broadcast %18 : vector<20x1xf32> to vector<20x32xf32>
    %20 = arith.mulf %15, %19 : vector<20x32xf32>
    %21 = vector.broadcast %1 : vector<1x32xf32> to vector<20x32xf32>
    %22 = arith.mulf %20, %21 : vector<20x32xf32>
    %23 = vector.broadcast %2 : vector<1x32xf32> to vector<20x32xf32>
    %24 = arith.addf %22, %23 : vector<20x32xf32>
    %c0_9 = arith.constant 0 : index
    %c0_10 = arith.constant 0 : index
    %25 = vector.load %arg5[%c0_9, %c0_10] : memref<32x16xf32, #tpu.memory_space<vmem>>, vector<32x16xf32>
    %cst_11 = arith.constant dense<0.000000e+00> : vector<20x16xf32>
    %26 = tpu.matmul %24, %25, %cst_11 {dimension_numbers = #tpu.dot_dimension_numbers<[1], [0], [0], [1], [0, 0, 1, 1], [], []>} : vector<20x32xf32>, vector<32x16xf32>, vector<20x16xf32> -> vector<20x16xf32>
    %c0_12 = arith.constant 0 : index
    %c0_13 = arith.constant 0 : index
    %27 = vector.load %arg6[%c0_12, %c0_13] : memref<1x16xf32, #tpu.memory_space<vmem>>, vector<1x16xf32>
    %28 = vector.broadcast %27 : vector<1x16xf32> to vector<20x16xf32>
    %29 = arith.addf %26, %28 : vector<20x16xf32>
    %c0_14 = arith.constant 0 : index
    %c0_15 = arith.constant 0 : index
    %30 = vector.load %arg7[%c0_14, %c0_15] : memref<20x16xf32, #tpu.memory_space<vmem>>, vector<20x16xf32>
    tpu.vector_store %arg7[%c0_14, %c0_15], %29 {strides = array<i32>} : memref<20x16xf32, #tpu.memory_space<vmem>>, vector<20x16xf32>,
    return
  }
  func.func @transform_0(%arg0: i32, %arg1: i32) -> (i32, i32) {
    %c0_i32 = arith.constant 0 : i32
    %c0_i32_0 = arith.constant 0 : i32
    return %arg0, %c0_i32 : i32, i32
  }
  func.func @transform_1(%arg0: i32, %arg1: i32) -> (i32, i32) {
    %c0_i32 = arith.constant 0 : i32
    %c0_i32_0 = arith.constant 0 : i32
    %c0_i32_1 = arith.constant 0 : i32
    return %c0_i32, %c0_i32_0 : i32, i32
  }
  func.func @transform_2(%arg0: i32, %arg1: i32) -> (i32, i32) {
    %c0_i32 = arith.constant 0 : i32
    %c0_i32_0 = arith.constant 0 : i32
    %c0_i32_1 = arith.constant 0 : i32
    return %c0_i32, %c0_i32_0 : i32, i32
  }
  func.func @transform_3(%arg0: i32, %arg1: i32) -> (i32, i32) {
    %c0_i32 = arith.constant 0 : i32
    %c0_i32_0 = arith.constant 0 : i32
    return %c0_i32, %arg1 : i32, i32
  }
  func.func @transform_4(%arg0: i32, %arg1: i32) -> (i32, i32) {
    %c0_i32 = arith.constant 0 : i32
    %c0_i32_0 = arith.constant 0 : i32
    return %c0_i32, %arg1 : i32, i32
  }
  func.func @transform_5(%arg0: i32, %arg1: i32) -> (i32, i32) {
    %c0_i32 = arith.constant 0 : i32
    return %arg0, %arg1 : i32, i32
  }
}

</mosaic_0001>

<bundles_post_ra>
// kernel: clip_surgery_vision_forward.28
= control target key start
LH: loop header
LB: loop body
LE: loop exit
PB: predicated region body
PF: predicated region fallthrough
CT: control target
= control target key end

     0   :  { %9 = vsyncpa [#allocation3], 0  ;;  %s978_s0 = inlined_call_operand.hbm [shape: f32[2,5,32], index: 0, kind: input, shape index: {}]   ;;  %s979_s1 = inlined_call_operand.hbm [shape: f32[5,32], index: 1, kind: input, shape index: {}]   ;;  %s980_s2 = inlined_call_operand.hbm [shape: f32[1,32], index: 2, kind: input, shape index: {}]   ;;  %s981_s3 = inlined_call_operand.hbm [shape: f32[1,32], index: 3, kind: input, shape index: {}]   ;;  %s982_s4 = inlined_call_operand.hbm [shape: f32[2,5,32], index: 4, kind: output, shape index: {}]  }
   0x1   :  { %11 = vsyncpa [#allocation3 + $0x1], 0 }
   0x2   :  { %12 = vsyncpa [#allocation6], 0 }
   0x3   :  { %13 = vsyncpa [#allocation9], 0 }
   0x4   :  { %14 = vsyncpa [#allocation4], 0 }
   0x5   :  { %16 = vsyncpa [#allocation4 + $0x1], 0  ;;  %s718_s15 = smov 0   ;;  %s720_s16 = smov 0  }
   0x6   :  { %s722_s17 = smov 0   ;;  %s724_s18 = smov 0  }
   0x7 LB: > { %s739_s19 = sadd.s32 4294967295, %s686_s18   ;;  %s399_s20 = sadd.s32 4294967294, %s686_s18   ;;  %s686_s18 = sphi %s724_s18, %s1005_s18   ;;  %s682_s17 = sphi %s722_s17, %s1004_s17   ;;  %s678_s16 = sphi %s720_s16, %s1003_s16   ;;  %s674_s15 = sphi %s718_s15, %s1002_s15  }
   0x8   : > { %p42_p0 = scmp.ne.s32.totalorder %s678_s16, %s674_s15  ;;  %p983_p1 = scmp.eq.s32.totalorder %s739_s19, 0 }
   0x9   : > { %p135_p3 = scmp.eq.s32.totalorder %s399_s20, 1  ;;  %p400_p5 = scmp.ge.s32.totalorder %s686_s18, 1 }
   0xa   : > { %p748_p4 = por %p983_p1, %p42_p0  ;;  %p142_p7 = scmp.lt.s32.totalorder %s686_s18, 3 }
   0xb   : > { %p753_p6 = por %p135_p3, %p42_p0  ;;  %s688_s24 = smov [#allocation5]  }
   0xc   : > { %s986_s21 = scalar_select %p748_p4, 1, 0 }
   0xd   : > { %s987_s22 = scalar_select %p753_p6, 1, 0 }
   0xe   : > { %p758_p8 = pnand %p400_p5, %p142_p7  ;;  %s155_s25 = sshll.u32 %s688_s24, 4  ;;  %s156_s25 = int_to_ptr.vmem [resolvable:$true] %s155_s25 }
   0xf   : > { %s689_s26 = smov [#allocation7]   ;;  %s690_s29 = smov [#allocation8]  }
  0x10   : > { %s988_s23 = scalar_select %p758_p8, 1, 0 }
  0x11   : > { %p435_p10 = pneg %p758_p8  ;;  %s166_s27 = sshll.u32 %s689_s26, 4  ;;  %s771_s27 = int_to_ptr.vmem [resolvable:$true] %s166_s27 }
  0x12   : > { %s177_s30 = sshll.u32 %s690_s29, 4  ;;  %s498_s7 = scalar_lea.hbm %s979_s1, 128  ;;  %s773_s30 = int_to_ptr.vmem [resolvable:$true] %s177_s30 }
  0x13   : > { %p767_p11 = pnand %p435_p10, %p983_p1  ;;  %p499_p12 = scmp.ne.s32.totalorder %s979_s1, %s498_s7 }
  0x14   : > { %p505_p5 = scmp.lt.u32.totalorder %s498_s7, %s979_s1 }
  0x15   : > { %p783_p13 = pneg %p767_p11 }
  0x17   : > { %p501_p0 = pnand %p783_p13, %p499_p12 }
  0x19   : > { %p502_p3 = pneg %p501_p0 }
  0x1b   : > { %p507_p7 = pnand %p505_p5, %p502_p3 }
  0x1d   : > { %510 = shalt.err (!%p507_p7)
}
  0x1e   : > { %s511_s13 = scalar_lea.vmem %s156_s25, 128  ;;  %p519_p2 = scmp.lt.s32.totalorder %s156_s25, %s156_s25 }
  0x1f   : > { %p512_p10 = scmp.ne.s32.totalorder %s156_s25, %s511_s13  ;;  %p520_p6 = scmp.lt.s32.totalorder %s511_s13, %s511_s13 }
  0x21   : > { %p514_p9 = pnand %p512_p10, %p783_p13  ;;  %p521_p4 = por %p520_p6, %p519_p2 }
  0x23   : > { %p515_p1 = pneg %p514_p9 }
  0x25   : > { %p522_p8 = pnand %p521_p4, %p515_p1 }
  0x27   : > { %525 = shalt.err (!%p522_p8)
}
  0x28   : > { %438 = dma.hbm_to_vmem [thread:$0]  (!%p767_p11), %s979_s1, 128, %s156_s25, [#allocation6]  }
  0x29   : > { %s526_s29 = scalar_lea.hbm %s980_s2, 16 }
  0x2a   : > { %p527_p9 = scmp.ne.s32.totalorder %s980_s2, %s526_s29  ;;  %p533_p1 = scmp.lt.u32.totalorder %s526_s29, %s980_s2 }
  0x2c   : > { %p529_p12 = pnand %p527_p9, %p783_p13 }
  0x2e   : > { %p530_p2 = pneg %p529_p12 }
  0x30   : > { %p535_p4 = pnand %p533_p1, %p530_p2 }
  0x32   : > { %538 = shalt.err (!%p535_p4)
}
  0x33   : > { %s539_s25 = scalar_lea.vmem %s771_s27, 16  ;;  %s546_s9 = scalar_lea.vmem %s771_s27, 32 }
  0x34   : > { %p540_p6 = scmp.ne.s32.totalorder %s771_s27, %s539_s25  ;;  %p547_p3 = scmp.lt.s32.totalorder %s771_s27, %s771_s27 }
  0x35   : > { %p548_p5 = scmp.lt.s32.totalorder %s546_s9, %s539_s25 }
  0x36   : > { %p542_p8 = pnand %p540_p6, %p783_p13 }
  0x37   : > { %p549_p7 = por %p548_p5, %p547_p3 }
  0x38   : > { %p543_p0 = pneg %p542_p8 }
  0x3a   : > { %p550_p10 = pnand %p549_p7, %p543_p0 }
  0x3c   : > { %553 = shalt.err (!%p550_p10)
}
  0x3d   : > { %441 = dma.hbm_to_vmem [thread:$0]  (!%p767_p11), %s980_s2, 16, %s771_s27, [#allocation6]  }
  0x3e   : > { %s554_s20 = scalar_lea.hbm %s981_s3, 16 }
  0x3f   : > { %p555_p9 = scmp.ne.s32.totalorder %s981_s3, %s554_s20  ;;  %p561_p1 = scmp.lt.u32.totalorder %s554_s20, %s981_s3 }
  0x41   : > { %p557_p12 = pnand %p555_p9, %p783_p13 }
  0x43   : > { %p558_p2 = pneg %p557_p12 }
  0x45   : > { %p563_p4 = pnand %p561_p1, %p558_p2 }
  0x47   : > { %566 = shalt.err (!%p563_p4)
}
  0x48   : > { %s567_s27 = scalar_lea.vmem %s773_s30, 16  ;;  %s574_s6 = scalar_lea.vmem %s773_s30, 32 }
  0x49   : > { %p568_p6 = scmp.ne.s32.totalorder %s773_s30, %s567_s27  ;;  %p575_p3 = scmp.lt.s32.totalorder %s773_s30, %s773_s30 }
  0x4a   : > { %p576_p5 = scmp.lt.s32.totalorder %s574_s6, %s567_s27 }
  0x4b   : > { %p570_p8 = pnand %p568_p6, %p783_p13 }
  0x4c   : > { %p577_p7 = por %p576_p5, %p575_p3 }
  0x4d   : > { %p571_p0 = pneg %p570_p8 }
  0x4f   : > { %p578_p10 = pnand %p577_p7, %p571_p0 }
  0x51   : > { %581 = shalt.err (!%p578_p10)
}
  0x52   : > { %444 = dma.hbm_to_vmem [thread:$0]  (!%p767_p11), %s981_s3, 16, %s773_s30, [#allocation9]  }
  0x53   : > { %s848_s10 = sadd.s32 1, %s686_s18   ;;  %s29_s25 = sadd.s32 1, %s682_s17 }
  0x54   : > { %s26_s28 = ssub.s32 %s686_s18, %s848_s10  ;;  %p36_p9 = scmp.ne.s32.totalorder %s682_s17, %s678_s16 }
  0x55   : > { %p27_p13 = scmp.eq.s32.totalorder %s26_s28, 0  ;;  %p37_p12 = scmp.eq.s32.totalorder %s686_s18, 0 }
  0x56   : > { %p456_p2 = scmp.lt.s32.totalorder %s686_s18, 2  ;;  %p991_p4 = scmp.eq.s32.totalorder %s739_s19, 1 }
  0x57   : > { %s858_s9 = scalar_select %p27_p13, %s682_s17, %s29_s25  }
  0x58   : > { %p38_p1 = por %p37_p12, %p36_p9  ;;  %p862_p6 = por %p991_p4, %p36_p9 }
  0x59   : > { %s188_s12 = sand.u32 1, %s682_s17   ;;  %s406_s13 = sshll.u32 %s686_s18, 7 }
  0x5a   : > { %s405_s30 = sshll.u32 %s188_s12, 3  ;;  %s871_s24 = scalar_lea.hbm %s978_s0, %s406_s13 }
  0x5b   : > { %s192_s26 = scalar_lea.vmem [#allocation2], %s405_s30  ;;  %p873_p11 = pnand %p456_p2, %p38_p1 }
  0x5c   : > { %s199_s29 = sshll.u32 %s192_s26, 4  ;;  %s189_s27 = scalar_lea.sflag [#allocation3], %s188_s12  ;;  %s877_s29 = int_to_ptr.vmem [resolvable:$true] %s199_s29 }
  0x5d   : > { %s582_s6 = scalar_lea.hbm %s871_s24, 128  ;;  %p584_p0 = pneg %p873_p11 }
  0x5e   : > { %p583_p8 = scmp.ne.s32.totalorder %s871_s24, %s582_s6  ;;  %s587_s28 = scalar_lea.hbm %s978_s0, 256 }
  0x5f   : > { %p588_p7 = scmp.lt.u32.totalorder %s871_s24, %s978_s0  ;;  %p589_p10 = scmp.lt.u32.totalorder %s587_s28, %s582_s6 }
  0x60   : > { %p585_p3 = pnand %p584_p0, %p583_p8  ;;  %p591_p9 = scmp.lt.u32.totalorder %s582_s6, %s871_s24 }
  0x61   : > { %p590_p13 = por %p589_p10, %p588_p7 }
  0x62   : > { %p586_p5 = pneg %p585_p3 }
  0x63   : > { %p592_p12 = por %p591_p9, %p590_p13 }
  0x65   : > { %p593_p2 = pnand %p592_p12, %p586_p5 }
  0x67   : > { %596 = shalt.err (!%p593_p2)
}
  0x68   : > { %s597_s12 = scalar_lea.vmem %s877_s29, 128  ;;  %s691_s30 = smov [#allocation2]  }
  0x69   : > { %p598_p1 = scmp.ne.s32.totalorder %s877_s29, %s597_s12  ;;  %s602_s14 = sshll.u32 %s691_s30, 4  ;;  %s603_s14 = int_to_ptr.vmem [resolvable:$false] %s602_s14 }
  0x6a   : > { %s604_s20 = scalar_lea.vmem %s603_s14, 256  ;;  %p605_p3 = scmp.lt.s32.totalorder %s877_s29, %s603_s14 }
  0x6b   : > { %p600_p4 = pnand %p598_p1, %p584_p0  ;;  %p606_p7 = scmp.lt.s32.totalorder %s604_s20, %s597_s12 }
  0x6d   : > { %p601_p8 = pneg %p600_p4  ;;  %p607_p10 = por %p606_p7, %p605_p3 }
  0x6f   : > { %p608_p13 = pnand %p607_p10, %p601_p8 }
  0x71   : > { %611 = shalt.err (!%p608_p13)
}
  0x72   : > { %448 = dma.hbm_to_vmem [thread:$0]  (!%p873_p11), %s871_s24, 128, %s877_s29, %s189_s27  }
  0x73   : > { %p994_p5 = scmp.ne.s32.totalorder %s988_s23, 0 }
  0x74   : > { %s907_s26 = sand.u32 (!%p994_p5), 1, %s678_s16   ;;  %p995_p0 = scmp.ne.s32.totalorder (!%p994_p5), %s986_s21, 0 }
  0x75   : > { %208 = sbr.rel (%p994_p5) target bundleno = 462 (0x1ce), region = 36  ;;  %s408_s6 = sshll.u32 (!%p994_p5), %s907_s26, 3 }
  0x76   : > { %s211_s7 = scalar_lea.sflag (!%p994_p5), [#allocation3], %s907_s26  ;;  %s214_s8 = scalar_lea.vmem (!%p994_p5), [#allocation2], %s408_s6 }
  0x7c   : > { %657 = dma.done.wait (%p995_p0), %s211_s7, 128  }
  0x7d   : > { %659 = vsyncadd (%p995_p0), %s211_s7, 4294967168  ;;  %p996_p11 = scmp.eq.s32.totalorder %s739_s19, 0 }
  0x7f   : > { %661 = dma.done.wait (%p996_p11), [#allocation6], 144   ;;  %p997_p9 = pmov %p996_p11 }
  0x81   : > { %663 = vsyncadd (%p997_p9), [#allocation6], 4294967152  ;;  %p998_p12 = pmov %p997_p9 }
  0x82   : > { %p999_p2 = pmov %p997_p9 }
  0x83   : > { %665 = dma.done.wait (%p998_p12), [#allocation9], 16  }
  0x84   : > { %667 = vsyncadd (%p999_p2), [#allocation9], 4294967280  ;;  %v251_v0 = vld [vmem:[%s214_s8] sm:$0x1f]  ;;  %v252_v1 = vld [vmem:[#allocation5] sm:$0x1f] }
  0x85   : > { %vm256_vm0 = vcmask 258048   ;;  %v253_v2 = vadd.f32 %v252_v1, %v251_v0  ;;  %v413_v13 = vld [vmem:[#allocation7] ss:$0 sm:$0xff]  ;;  %v414_v15 = vld [vmem:[#allocation8] ss:$0 sm:$0xff]  ;;  %s416_s21 = sshll.u32 %s739_s19, 7 }
  0x86   : > { %s250_s23 = scalar_lea.vmem [#allocation10], %s408_s6  ;;  %s933_s27 = scalar_lea.hbm %s982_s4, %s416_s21 }
  0x87   : > { %v257_v3 = vsel %vm256_vm0, %v253_v2, 0.0  ;;  %s300_s24 = sshll.u32 %s250_s23, 4  ;;  %s287_s28 = scalar_lea.sflag [#allocation4], %s907_s26  ;;  %s935_s24 = int_to_ptr.vmem [resolvable:$true] %s300_s24 }
  0x88   : > { %258 = vadd.xlane.f32.xlu0 %v257_v3  ;;  %s612_s25 = scalar_lea.vmem %s935_s24, 128  ;;  %s692_s19 = smov [#allocation10]  }
  0x89   : > { %p613_p1 = scmp.ne.s32.totalorder %s935_s24, %s612_s25  ;;  %s616_s13 = sshll.u32 %s692_s19, 4  ;;  %s617_s13 = int_to_ptr.vmem [resolvable:$false] %s616_s13 }
  0x8a   : > { %s618_s12 = scalar_lea.vmem %s617_s13, 256  ;;  %p619_p3 = scmp.lt.s32.totalorder %s935_s24, %s617_s13 }
  0x8b   : > { %p614_p4 = pnand %p613_p1, %p862_p6  ;;  %p620_p7 = scmp.lt.s32.totalorder %s618_s12, %s612_s25 }
  0x8d   : > { %p615_p8 = pneg %p614_p4  ;;  %p621_p10 = por %p620_p7, %p619_p3 }
  0x8f   : > { %p622_p13 = pnand %p621_p10, %p615_p8 }
 0x115   : > { %v259_v4 = vpop.xlane.xlu0 %258 }
 0x116   : > { %v261_v5 = vmul.f32 0.03125, %v259_v4 }
 0x118   : > { %v262_v6 = vsub.f32 %v253_v2, %v261_v5 }
 0x11a   : > { %v263_v7 = vmul.f32 %v262_v6, %v262_v6 }
 0x11c   : > { %v264_v8 = vsel %vm256_vm0, %v263_v7, 0.0 }
 0x11d   : > { %265 = vadd.xlane.f32.xlu0 %v264_v8 }
 0x1aa   : > { %v266_v9 = vpop.xlane.xlu0 %265 }
 0x1ab   : > { %v267_v10 = vmul.f32 0.03125, %v266_v9 }
 0x1ad   : > { %v268_v11 = vadd.f32 1e-05, %v267_v10 }
 0x1af   : > { %496 = vrsqrt.f32 %v268_v11 }
 0x1b9   : > { %v497_v12 = vpop.eup %496 }
 0x1ba   : > { %v270_v14 = vmul.f32 %v497_v12, %v262_v6 }
 0x1bc   : > { %v277_v16 = vmul.f32 %v413_v13, %v270_v14 }
 0x1be   : > { %v284_v17 = vadd.f32 %v414_v15, %v277_v16 }
 0x1c0   : > { %285 = vst.msk [vmem:[%s250_s23] sm:$0x1f] %vm256_vm0, %v284_v17 }
 0x1c1   : > { %625 = shalt.err (!%p622_p13)
}
 0x1c2   : > { %s626_s30 = scalar_lea.hbm %s933_s27, 128  ;;  %s630_s26 = scalar_lea.hbm %s982_s4, 256 }
 0x1c3   : > { %p627_p5 = scmp.ne.s32.totalorder %s933_s27, %s626_s30  ;;  %p631_p9 = scmp.lt.u32.totalorder %s933_s27, %s982_s4 }
 0x1c4   : > { %p632_p12 = scmp.lt.u32.totalorder %s630_s26, %s626_s30  ;;  %p634_p1 = scmp.lt.u32.totalorder %s626_s30, %s933_s27 }
 0x1c5   : > { %p628_p0 = pnand %p627_p5, %p862_p6 }
 0x1c6   : > { %p633_p2 = por %p632_p12, %p631_p9 }
 0x1c7   : > { %p629_p11 = pneg %p628_p0 }
 0x1c8   : > { %p635_p4 = por %p634_p1, %p633_p2 }
 0x1ca   : > { %p636_p8 = pnand %p635_p4, %p629_p11 }
 0x1cc   : > { %639 = shalt.err (!%p636_p8)
}
 0x1cd   : > { %433 = dma.vmem_to_hbm [thread:$0]  (%p862_p6), %s935_s24, 128, %s933_s27, %s287_s28  }
 0x1ce PF: > { %s312_s8 = sand.u32 1, %s674_s15   ;;  %p1000_p3 = scmp.ne.s32.totalorder %s987_s22, 0 }
 0x1cf   : > { %p1001_p7 = scmp.ge.s32.totalorder %s686_s18, 2  ;;  %s313_s21 = scalar_lea.sflag [#allocation4], %s312_s8 }
 0x1d1   : > { %p450_p10 = pnand %p1001_p7, %p1000_p3 }
 0x1d3   : > { %669 = dma.done.wait (!%p450_p10), %s313_s21, 128  }
 0x1d4   : > { %671 = vsyncadd (!%p450_p10), %s313_s21, 4294967168  ;;  %p19_p13 = scmp.ge.s32.totalorder %s848_s10, 4   ;;  %s1002_s15 = smov %s678_s16 }
 0x1d5   : > { %s1003_s16 = smov %s682_s17  ;;  %s1004_s17 = smov %s858_s9 }
 0x1d6   : > { %s1005_s18 = smov %s848_s10  ;;  %21 = sbr.rel (!%p19_p13) target bundleno = 7 (0x7), region = 93 }
 0x1dd   :  { %318 = vsyncpa [#allocation3], 1 }
 0x1de   :  { %320 = vsyncpa [#allocation3 + $0x1], 1 }
 0x1df   :  { %321 = vsyncpa [#allocation6], 1 }
 0x1e0   :  { %322 = vsyncpa [#allocation9], 1 }
 0x1e1   :  { %323 = vsyncpa [#allocation4], 1 }
 0x1e2   :  { %325 = vsyncpa [#allocation4 + $0x1], 1 }

// kernel: clip_surgery_vision_forward.29
= control target key start
LH: loop header
LB: loop body
LE: loop exit
PB: predicated region body
PF: predicated region fallthrough
CT: control target
= control target key end

     0   :  { %10 = vsyncpa [#allocation3], 0  ;;  %s552_s0 = inlined_call_operand.hbm [shape: f32[10,32], index: 0, kind: input, shape index: {}]   ;;  %s553_s1 = inlined_call_operand.hbm [shape: f32[1,32], index: 1, kind: input, shape index: {}]   ;;  %s554_s2 = inlined_call_operand.hbm [shape: f32[1,32], index: 2, kind: input, shape index: {}]   ;;  %s555_s3 = inlined_call_operand.hbm [shape: f32[32,96], index: 3, kind: input, shape index: {}]   ;;  %s556_s4 = inlined_call_operand.hbm [shape: f32[1,96], index: 4, kind: input, shape index: {}]   ;;  %s557_s5 = inlined_call_operand.hbm [shape: f32[10,96], index: 5, kind: output, shape index: {}]  }
   0x1   :  { %11 = vsyncpa [#allocation6], 0 }
   0x2   :  { %12 = vsyncpa [#allocation9], 0 }
   0x3   :  { %13 = vsyncpa [#allocation4], 0  ;;  %s429_s18 = smov [#allocation5]   ;;  %s289_s22 = scalar_lea.hbm %s553_s1, 16 }
   0x4   :  { %s32_s19 = sshll.u32 %s429_s18, 4  ;;  %p290_p0 = scmp.ne.s32.totalorder %s553_s1, %s289_s22  ;;  %s33_s19 = int_to_ptr.vmem [resolvable:$true] %s32_s19 }
   0x5   :  { %p293_p1 = scmp.lt.u32.totalorder %s289_s22, %s553_s1 }
   0x7   :  { %p295_p2 = pnand %p293_p1, %p290_p0 }
   0x9   :  { %298 = shalt.err (!%p295_p2)
}
   0xa   :  { %s299_s27 = scalar_lea.vmem %s33_s19, 16  ;;  %s303_s28 = scalar_lea.vmem %s33_s19, 32 }
   0xb   :  { %p300_p3 = scmp.ne.s32.totalorder %s33_s19, %s299_s27  ;;  %p304_p4 = scmp.lt.s32.totalorder %s33_s19, %s33_s19 }
   0xc   :  { %p305_p5 = scmp.lt.s32.totalorder %s303_s28, %s299_s27 }
   0xe   :  { %p306_p6 = por %p305_p5, %p304_p4 }
  0x10   :  { %p307_p7 = pnand %p306_p6, %p300_p3 }
  0x12   :  { %310 = shalt.err (!%p307_p7)
}
  0x13   :  { %35 = dma.hbm_to_vmem [thread:$0]  %s553_s1, 16, %s33_s19, [#allocation6]  }
  0x14   :  { %s430_s6 = smov [#allocation8]   ;;  %s431_s8 = smov [#allocation2]  }
  0x15   :  { %s51_s7 = sshll.u32 %s430_s6, 4  ;;  %s19_s9 = sshll.u32 %s431_s8, 4  ;;  %s52_s7 = int_to_ptr.vmem [resolvable:$true] %s51_s7  ;;  %s20_s9 = int_to_ptr.vmem [resolvable:$true] %s19_s9 }
  0x16   :  { %s311_s12 = scalar_lea.hbm %s555_s3, 512 }
  0x17   :  { %p312_p8 = scmp.ne.s32.totalorder %s555_s3, %s311_s12  ;;  %p315_p9 = scmp.lt.u32.totalorder %s311_s12, %s555_s3 }
  0x19   :  { %p317_p10 = pnand %p315_p9, %p312_p8 }
  0x1b   :  { %320 = shalt.err (!%p317_p10)
}
  0x1c   :  { %s321_s1 = scalar_lea.vmem %s52_s7, 512  ;;  %p326_p12 = scmp.lt.s32.totalorder %s52_s7, %s52_s7 }
  0x1d   :  { %p322_p11 = scmp.ne.s32.totalorder %s52_s7, %s321_s1  ;;  %p327_p13 = scmp.lt.s32.totalorder %s321_s1, %s321_s1 }
  0x1f   :  { %p328_p0 = por %p327_p13, %p326_p12 }
  0x21   :  { %p329_p1 = pnand %p328_p0, %p322_p11 }
  0x23   :  { %332 = shalt.err (!%p329_p1)
}
  0x24   :  { %s432_s17 = smov 128   ;;  %s433_s18 = smov 8  }
  0x25   :  { %57 = dma.hbm_to_vmem [thread:$0]  %s555_s3, 512, %s52_s7, [#allocation9], %s432_s17, %s432_s17, %s433_s18  }
  0x26   :  { %s333_s23 = scalar_lea.hbm %s552_s0, 256 }
  0x27   :  { %p334_p2 = scmp.ne.s32.totalorder %s552_s0, %s333_s23  ;;  %p337_p3 = scmp.lt.u32.totalorder %s333_s23, %s552_s0 }
  0x29   :  { %p339_p4 = pnand %p337_p3, %p334_p2 }
  0x2b   :  { %342 = shalt.err (!%p339_p4)
}
  0x2c   :  { %s343_s28 = scalar_lea.vmem %s20_s9, 256  ;;  %p348_p6 = scmp.lt.s32.totalorder %s20_s9, %s20_s9 }
  0x2d   :  { %p344_p5 = scmp.ne.s32.totalorder %s20_s9, %s343_s28  ;;  %p349_p7 = scmp.lt.s32.totalorder %s343_s28, %s343_s28 }
  0x2f   :  { %p350_p8 = por %p349_p7, %p348_p6 }
  0x31   :  { %p351_p9 = pnand %p350_p8, %p344_p5 }
  0x33   :  { %354 = shalt.err (!%p351_p9)
}
  0x34   :  { %25 = dma.hbm_to_vmem [thread:$0]  %s552_s0, 256, %s20_s9, [#allocation3], %s432_s17, %s432_s17, %s433_s18  }
  0x35   :  { %s434_s30 = smov [#allocation7]   ;;  %s435_s7 = smov [#allocation10]  }
  0x36   :  { %s42_s6 = sshll.u32 %s434_s30, 4  ;;  %s64_s8 = sshll.u32 %s435_s7, 4  ;;  %s43_s6 = int_to_ptr.vmem [resolvable:$true] %s42_s6  ;;  %s65_s8 = int_to_ptr.vmem [resolvable:$true] %s64_s8 }
  0x37   :  { %s355_s12 = scalar_lea.hbm %s554_s2, 16 }
  0x38   :  { %p356_p10 = scmp.ne.s32.totalorder %s554_s2, %s355_s12  ;;  %p359_p11 = scmp.lt.u32.totalorder %s355_s12, %s554_s2 }
  0x3a   :  { %p361_p12 = pnand %p359_p11, %p356_p10 }
  0x3c   :  { %364 = shalt.err (!%p361_p12)
}
  0x3d   :  { %s365_s0 = scalar_lea.vmem %s43_s6, 16  ;;  %s369_s9 = scalar_lea.vmem %s43_s6, 32 }
  0x3e   :  { %p366_p13 = scmp.ne.s32.totalorder %s43_s6, %s365_s0  ;;  %p370_p0 = scmp.lt.s32.totalorder %s43_s6, %s43_s6 }
  0x3f   :  { %p371_p1 = scmp.lt.s32.totalorder %s369_s9, %s365_s0 }
  0x41   :  { %p372_p2 = por %p371_p1, %p370_p0 }
  0x43   :  { %p373_p3 = pnand %p372_p2, %p366_p13 }
  0x45   :  { %376 = shalt.err (!%p373_p3)
}
  0x46   :  { %45 = dma.hbm_to_vmem [thread:$0]  %s554_s2, 16, %s43_s6, [#allocation6]  }
  0x47   :  { %s377_s22 = scalar_lea.hbm %s556_s4, 16 }
  0x48   :  { %p378_p4 = scmp.ne.s32.totalorder %s556_s4, %s377_s22  ;;  %p381_p5 = scmp.lt.u32.totalorder %s377_s22, %s556_s4 }
  0x4a   :  { %p383_p6 = pnand %p381_p5, %p378_p4 }
  0x4c   :  { %386 = shalt.err (!%p383_p6)
}
  0x4d   :  { %s387_s27 = scalar_lea.vmem %s65_s8, 16  ;;  %s391_s28 = scalar_lea.vmem %s65_s8, 32 }
  0x4e   :  { %p388_p7 = scmp.ne.s32.totalorder %s65_s8, %s387_s27  ;;  %p392_p8 = scmp.lt.s32.totalorder %s65_s8, %s65_s8 }
  0x4f   :  { %p393_p9 = scmp.lt.s32.totalorder %s391_s28, %s387_s27 }
  0x51   :  { %p394_p10 = por %p393_p9, %p392_p8 }
  0x53   :  { %p395_p11 = pnand %p394_p10, %p388_p7 }
  0x55   :  { %398 = shalt.err (!%p395_p11)
}
  0x56   :  { %67 = dma.hbm_to_vmem [thread:$0]  %s556_s4, 16, %s65_s8, [#allocation9]  }
  0x57   :  { %421 = dma.done.wait [#allocation3], 256  }
  0x58   :  { %422 = vsyncadd [#allocation3], 4294967040 }
  0x59   :  { %423 = dma.done.wait [#allocation6], 32  }
  0x5a   :  { %424 = vsyncadd [#allocation6], 4294967264 }
  0x5b   :  { %425 = dma.done.wait [#allocation9], 528  }
  0x5c   :  { %426 = vsyncadd [#allocation9], 4294966768  ;;  %vm87_vm0 = vcmask 261120   ;;  %v83_v0 = vld [vmem:[#allocation2] sm:$0xff]  ;;  %v84_v1 = vld [vmem:[#allocation2 + $0x8] sm:$0x3] }
  0x5d   :  { %vm91_vm1 = vcmask 254976   ;;  %v88_v2 = vsel %vm87_vm0, %v83_v0, 0.0  ;;  %v132_v14 = vld [vmem:[#allocation8] sm:$0xff]  ;;  %v133_v15 = vld [vmem:[#allocation8 + $0x8] sm:$0xff]  ;;  %v134_v16 = vld [vmem:[#allocation8 + $0x10] sm:$0xff]  ;;  %s436_s4 = smov [#allocation11]  }
  0x5e   :  { %89 = vadd.xlane.f32.xlu0 %v88_v2  ;;  %v92_v3 = vsel %vm91_vm1, %v84_v1, 0.0  ;;  %v269_v17 = vpack.c.bf16 %v133_v15, %v132_v14  ;;  %v135_v18 = vld [vmem:[#allocation8 + $0x18] sm:$0xff]  ;;  %v249_v36 = vld [vmem:[#allocation10] ss:$0 sm:$0xff]  ;;  %s233_s29 = sshll.u32 %s436_s4, 4  ;;  %vm226_vm2 = vcmask 779264   ;;  %s234_s29 = int_to_ptr.vmem [resolvable:$true] %s233_s29 }
  0x5f   :  { %v273_v19 = vpack.c.bf16 %v135_v18, %v134_v16  ;;  %v247_v27 = vld [vmem:[#allocation5] ss:$0 sm:$0xff]  ;;  %v248_v29 = vld [vmem:[#allocation7] ss:$0 sm:$0xff]  ;;  %vm224_vm3 = vcmask 785408   ;;  %s399_s30 = scalar_lea.vmem %s234_s29, 256  ;;  %p404_p13 = scmp.lt.s32.totalorder %s234_s29, %s234_s29 }
  0x60   :  { %270 = vmatprep.subr.bf16.mxu0 %v269_v17  ;;  %p400_p12 = scmp.ne.s32.totalorder %s234_s29, %s399_s30  ;;  %p405_p0 = scmp.lt.s32.totalorder %s399_s30, %s399_s30 }
  0x61   :  { %272 = vmatpush3.bf16.msra.mxu0 %v269_v17 }
  0x62   :  { %93 = vadd.xlane.f32.xlu0 %v92_v3  ;;  %274 = vmatprep.subr.bf16.mxu0 %v273_v19  ;;  %p406_p1 = por %p405_p0, %p404_p13 }
  0x64   :  { %p407_p2 = pnand %p406_p1, %p400_p12 }
  0x65   :  { %276 = vmatpush3.bf16.msra.mxu0 %v273_v19 }
  0xeb   :  { %v90_v4 = vpop.xlane.xlu0 %89 }
  0xec   :  { %v96_v5 = vmul.f32 0.03125, %v90_v4 }
  0xee   :  { %v98_v6 = vsub.f32 %v83_v0, %v96_v5 }
  0xef   :  { %v94_v7 = vpop.xlane.xlu0 %93 }
  0xf0   :  { %v97_v8 = vmul.f32 0.03125, %v94_v7  ;;  %v100_v9 = vmul.f32 %v98_v6, %v98_v6 }
  0xf2   :  { %v99_v10 = vsub.f32 %v84_v1, %v97_v8  ;;  %v102_v11 = vsel %vm87_vm0, %v100_v9, 0.0 }
  0xf3   :  { %103 = vadd.xlane.f32.xlu1 %v102_v11 }
  0xf4   :  { %v101_v12 = vmul.f32 %v99_v10, %v99_v10 }
  0xf6   :  { %v105_v13 = vsel %vm91_vm1, %v101_v12, 0.0 }
  0xf7   :  { %106 = vadd.xlane.f32.xlu1 %v105_v13 }
 0x180   :  { %v104_v20 = vpop.xlane.xlu1 %103 }
 0x181   :  { %v108_v21 = vmul.f32 0.03125, %v104_v20 }
 0x183   :  { %v110_v22 = vadd.f32 1e-05, %v108_v21 }
 0x184   :  { %v107_v23 = vpop.xlane.xlu1 %106 }
 0x185   :  { %285 = vrsqrt.f32 %v110_v22  ;;  %v109_v24 = vmul.f32 0.03125, %v107_v23 }
 0x187   :  { %v111_v25 = vadd.f32 1e-05, %v109_v24 }
 0x189   :  { %287 = vrsqrt.f32 %v111_v25 }
 0x18f   :  { %v286_v26 = vpop.eup %285 }
 0x190   :  { %v114_v28 = vmul.f32 %v286_v26, %v98_v6 }
 0x192   :  { %v122_v30 = vmul.f32 %v247_v27, %v114_v28 }
 0x193   :  { %v288_v31 = vpop.eup %287 }
 0x194   :  { %v115_v32 = vmul.f32 %v288_v31, %v99_v10  ;;  %v130_v33 = vadd.f32 %v248_v29, %v122_v30 }
 0x196   :  { %v123_v34 = vmul.f32 %v247_v27, %v115_v32  ;;  %266 = vmatprep.mubr.msk.f32.mxu0 %vm87_vm0, %v130_v33 }
 0x198   :  { %v131_v35 = vadd.f32 %v248_v29, %v123_v34 }
 0x19a   :  { %267 = vmatmul.mubr.msk.f32.vlgmr.msra.gmra.mrb[0].mxu0 %vm87_vm0, %v131_v35 }
 0x26d   :  { %v268_v37 = vpop.f32.mrb[0].mxu0 }
 0x26e   :  { %v221_v38 = vadd.f32 %v268_v37, %v249_v36  ;;  %v215_v39 = vpop.f32.mrb[1].mxu0 }
 0x26f   :  { %v216_v40 = vadd.f32 %v249_v36, %v215_v39 }
 0x270   :  { %227 = vst.msk [vmem:[#allocation11 + $0x8] sm:$0x3] %vm226_vm2, %v221_v38 }
 0x271   :  { %225 = vst.msk [vmem:[#allocation11] sm:$0xff] %vm224_vm3, %v216_v40 }
 0x272   :  { %410 = shalt.err (!%p407_p2)
}
 0x273   :  { %s411_s8 = scalar_lea.hbm %s557_s5, 256 }
 0x274   :  { %p412_p3 = scmp.ne.s32.totalorder %s557_s5, %s411_s8  ;;  %p415_p4 = scmp.lt.u32.totalorder %s411_s8, %s557_s5 }
 0x276   :  { %p417_p5 = pnand %p415_p4, %p412_p3 }
 0x278   :  { %420 = shalt.err (!%p417_p5)
}
 0x279   :  { %239 = dma.vmem_to_hbm [thread:$0]  %s234_s29, 256, %s557_s5, [#allocation4], %s432_s17, %s432_s17, %s433_s18  }
 0x27a   :  { %427 = dma.done.wait [#allocation4], 256  }
 0x27b   :  { %428 = vsyncadd [#allocation4], 4294967040 }
 0x27c   :  { %243 = vsyncpa [#allocation3], 1 }
 0x27d   :  { %244 = vsyncpa [#allocation6], 1 }
 0x27e   :  { %245 = vsyncpa [#allocation9], 1 }
 0x27f   :  { %246 = vsyncpa [#allocation4], 1 }

// kernel: clip_surgery_vision_forward.27
= control target key start
LH: loop header
LB: loop body
LE: loop exit
PB: predicated region body
PF: predicated region fallthrough
CT: control target
= control target key end

     0   :  { %7 = vsyncpa [#allocation3], 0  ;;  %s709_s0 = inlined_call_operand.hbm [shape: f32[8,768], index: 0, kind: input, shape index: {}]   ;;  %s710_s1 = inlined_call_operand.hbm [shape: f32[768,32], index: 1, kind: input, shape index: {}]   ;;  %s711_s2 = inlined_call_operand.hbm [shape: f32[8,32], index: 2, kind: output, shape index: {}]  }
   0x1   :  { %8 = vsyncpa [#allocation6], 0 }
   0x2   :  { %9 = vsyncpa [#allocation4], 0  ;;  %s646_s9 = smov [#allocation2]   ;;  %s647_s11 = smov [#allocation5]  }
   0x3   :  { %s16_s10 = sshll.u32 %s646_s9, 4  ;;  %s25_s12 = sshll.u32 %s647_s11, 4  ;;  %s17_s10 = int_to_ptr.vmem [resolvable:$true] %s16_s10  ;;  %s666_s12 = int_to_ptr.vmem [resolvable:$true] %s25_s12 }
   0x4   :  { %s574_s15 = scalar_lea.hbm %s709_s0, 768 }
   0x5   :  { %p575_p0 = scmp.ne.s32.totalorder %s709_s0, %s574_s15  ;;  %p578_p1 = scmp.lt.u32.totalorder %s574_s15, %s709_s0 }
   0x7   :  { %p580_p2 = pnand %p578_p1, %p575_p0 }
   0x9   :  { %583 = shalt.err (!%p580_p2)
}
   0xa   :  { %s584_s20 = scalar_lea.vmem %s17_s10, 768  ;;  %p589_p4 = scmp.lt.s32.totalorder %s17_s10, %s17_s10 }
   0xb   :  { %p585_p3 = scmp.ne.s32.totalorder %s17_s10, %s584_s20  ;;  %p590_p5 = scmp.lt.s32.totalorder %s584_s20, %s584_s20 }
   0xd   :  { %p591_p6 = por %p590_p5, %p589_p4 }
   0xf   :  { %p592_p7 = pnand %p591_p6, %p585_p3 }
  0x11   :  { %595 = shalt.err (!%p592_p7)
}
  0x12   :  { %19 = dma.hbm_to_vmem [thread:$0]  %s709_s0, 768, %s17_s10, [#allocation3]  }
  0x13   :  { %s596_s25 = scalar_lea.hbm %s710_s1, 12288 }
  0x14   :  { %p597_p8 = scmp.ne.s32.totalorder %s710_s1, %s596_s25  ;;  %p600_p9 = scmp.lt.u32.totalorder %s596_s25, %s710_s1 }
  0x16   :  { %p602_p10 = pnand %p600_p9, %p597_p8 }
  0x18   :  { %605 = shalt.err (!%p602_p10)
}
  0x19   :  { %s606_s30 = scalar_lea.vmem %s666_s12, 12288  ;;  %p611_p12 = scmp.lt.s32.totalorder %s666_s12, %s666_s12 }
  0x1a   :  { %p607_p11 = scmp.ne.s32.totalorder %s666_s12, %s606_s30  ;;  %p612_p13 = scmp.lt.s32.totalorder %s606_s30, %s606_s30 }
  0x1c   :  { %p613_p0 = por %p612_p13, %p611_p12 }
  0x1e   :  { %p614_p1 = pnand %p613_p0, %p607_p11 }
  0x20   :  { %617 = shalt.err (!%p614_p1)
}
  0x21   :  { %s648_s0 = smov 128   ;;  %s649_s3 = smov 8  }
  0x22   :  { %31 = dma.hbm_to_vmem [thread:$0]  %s710_s1, 12288, %s666_s12, [#allocation6], %s648_s0, %s648_s0, %s649_s3  }
  0x23   :  { %640 = dma.done.wait [#allocation3], 768  }
  0x24   :  { %641 = vsyncadd [#allocation3], 4294966528 }
  0x25   :  { %642 = dma.done.wait [#allocation6], 12288  }
  0x26   :  { %643 = vsyncadd [#allocation6], 4294955008  ;;  %v60_v0 = vld [vmem:[#allocation5 + $0x80] sm:$0xff]  ;;  %v61_v1 = vld [vmem:[#allocation5 + $0x88] sm:$0xff]  ;;  %s650_s1 = smov [#allocation7]   ;;  %vm350_vm0 = vcmask 261120  }
  0x27   :  { %v92_v2 = vld [vmem:[#allocation5 + $0x180] sm:$0xff]  ;;  %v473_v3 = vpack.c.bf16 %v61_v1, %v60_v0  ;;  %v93_v4 = vld [vmem:[#allocation5 + $0x188] sm:$0xff]  ;;  %v62_v11 = vld [vmem:[#allocation5 + $0x90] sm:$0xff]  ;;  %s358_s6 = sshll.u32 %s650_s1, 4  ;;  %s359_s6 = int_to_ptr.vmem [resolvable:$true] %s358_s6 }
  0x28   :  { %v44_v5 = vld [vmem:[#allocation5] sm:$0xff]  ;;  %v45_v6 = vld [vmem:[#allocation5 + $0x8] sm:$0xff]  ;;  %v505_v7 = vpack.c.bf16 %v93_v4, %v92_v2  ;;  %v63_v13 = vld [vmem:[#allocation5 + $0x98] sm:$0xff]  ;;  %s618_s7 = scalar_lea.vmem %s359_s6, 128  ;;  %p623_p3 = scmp.lt.s32.totalorder %s359_s6, %s359_s6 }
  0x29   :  { %v475_v8 = vpack.c.bf16 %v45_v6, %v44_v5  ;;  %v76_v9 = vld [vmem:[#allocation5 + $0x100] sm:$0xff]  ;;  %v77_v10 = vld [vmem:[#allocation5 + $0x108] sm:$0xff]  ;;  %474 = vmatprep.subr.bf16.mxu0 %v473_v3  ;;  %v94_v14 = vld [vmem:[#allocation5 + $0x190] sm:$0xff]  ;;  %v477_v16 = vpack.c.bf16 %v63_v13, %v62_v11  ;;  %p619_p2 = scmp.ne.s32.totalorder %s359_s6, %s618_s7  ;;  %p624_p4 = scmp.lt.s32.totalorder %s618_s7, %s618_s7 }
  0x2a   :  { %v507_v12 = vpack.c.bf16 %v77_v10, %v76_v9  ;;  %v95_v15 = vld [vmem:[#allocation5 + $0x198] sm:$0xff]  ;;  %506 = vmatprep.subr.bf16.mxu1 %v505_v7  ;;  %v46_v18 = vld [vmem:[#allocation5 + $0x10] sm:$0xff]  ;;  %v64_v23 = vld [vmem:[#allocation5 + $0xa0] sm:$0xff] }
  0x2b   :  { %476 = vmatpush3.bf16.msra.mxu0 %v475_v8  ;;  %v509_v17 = vpack.c.bf16 %v95_v15, %v94_v14  ;;  %v47_v19 = vld [vmem:[#allocation5 + $0x18] sm:$0xff]  ;;  %v78_v20 = vld [vmem:[#allocation5 + $0x110] sm:$0xff]  ;;  %v65_v24 = vld [vmem:[#allocation5 + $0xa8] sm:$0xff]  ;;  %p625_p5 = por %p624_p4, %p623_p3 }
  0x2c   :  { %508 = vmatpush3.bf16.msra.mxu1 %v507_v12  ;;  %v479_v21 = vpack.c.bf16 %v47_v19, %v46_v18  ;;  %v79_v22 = vld [vmem:[#allocation5 + $0x118] sm:$0xff]  ;;  %478 = vmatprep.subr.bf16.mxu0 %v477_v16  ;;  %v481_v26 = vpack.c.bf16 %v65_v24, %v64_v23  ;;  %v96_v27 = vld [vmem:[#allocation5 + $0x1a0] sm:$0xff]  ;;  %v97_v28 = vld [vmem:[#allocation5 + $0x1a8] sm:$0xff] }
  0x2d   :  { %510 = vmatprep.subr.bf16.mxu1 %v509_v17  ;;  %v511_v25 = vpack.c.bf16 %v79_v22, %v78_v20  ;;  %v48_v29 = vld [vmem:[#allocation5 + $0x20] sm:$0xff]  ;;  %v513_v30 = vpack.c.bf16 %v97_v28, %v96_v27  ;;  %v49_v31 = vld [vmem:[#allocation5 + $0x28] sm:$0xff]  ;;  %v66_v35 = vld [vmem:[#allocation5 + $0xb0] sm:$0xff]  ;;  %p626_p6 = pnand %p625_p5, %p619_p2 }
  0x2e   :  { %v80_v32 = vld [vmem:[#allocation5 + $0x120] sm:$0xff]  ;;  %v81_v33 = vld [vmem:[#allocation5 + $0x128] sm:$0xff]  ;;  %v483_v34 = vpack.c.bf16 %v49_v31, %v48_v29  ;;  %v67_v36 = vld [vmem:[#allocation5 + $0xb8] sm:$0xff] }
  0x2f   :  { %480 = vmatpush3.bf16.msra.mxu0 %v479_v21  ;;  %v98_v37 = vld [vmem:[#allocation5 + $0x1b0] sm:$0xff]  ;;  %v515_v38 = vpack.c.bf16 %v81_v33, %v80_v32  ;;  %v485_v39 = vpack.c.bf16 %v67_v36, %v66_v35  ;;  %v99_v40 = vld [vmem:[#allocation5 + $0x1b8] sm:$0xff]  ;;  %v68_v46 = vld [vmem:[#allocation5 + $0xc0] sm:$0xff] }
  0x30   :  { %512 = vmatpush3.bf16.msra.mxu1 %v511_v25  ;;  %482 = vmatprep.subr.bf16.mxu0 %v481_v26  ;;  %v50_v41 = vld [vmem:[#allocation5 + $0x30] sm:$0xff]  ;;  %v51_v42 = vld [vmem:[#allocation5 + $0x38] sm:$0xff]  ;;  %v517_v43 = vpack.c.bf16 %v99_v40, %v98_v37  ;;  %v69_v47 = vld [vmem:[#allocation5 + $0xc8] sm:$0xff] }
  0x31   :  { %514 = vmatprep.subr.bf16.mxu1 %v513_v30  ;;  %v82_v44 = vld [vmem:[#allocation5 + $0x130] sm:$0xff]  ;;  %v83_v45 = vld [vmem:[#allocation5 + $0x138] sm:$0xff]  ;;  %v100_v48 = vld [vmem:[#allocation5 + $0x1c0] sm:$0xff]  ;;  %v487_v50 = vpack.c.bf16 %v51_v42, %v50_v41  ;;  %v489_v52 = vpack.c.bf16 %v69_v47, %v68_v46 }
  0x32   :  { %v101_v49 = vld [vmem:[#allocation5 + $0x1c8] sm:$0xff]  ;;  %v519_v51 = vpack.c.bf16 %v83_v45, %v82_v44  ;;  %v52_v53 = vld [vmem:[#allocation5 + $0x40] sm:$0xff]  ;;  %v70_v58 = vld [vmem:[#allocation5 + $0xd0] sm:$0xff] }
  0x33   :  { %484 = vmatpush3.bf16.msra.mxu0 %v483_v34  ;;  %v53_v54 = vld [vmem:[#allocation5 + $0x48] sm:$0xff]  ;;  %v84_v55 = vld [vmem:[#allocation5 + $0x140] sm:$0xff]  ;;  %v521_v56 = vpack.c.bf16 %v101_v49, %v100_v48  ;;  %v71_v59 = vld [vmem:[#allocation5 + $0xd8] sm:$0xff] }
  0x34   :  { %516 = vmatpush3.bf16.msra.mxu1 %v515_v38  ;;  %486 = vmatprep.subr.bf16.mxu0 %v485_v39  ;;  %v85_v57 = vld [vmem:[#allocation5 + $0x148] sm:$0xff]  ;;  %v102_v60 = vld [vmem:[#allocation5 + $0x1d0] sm:$0xff]  ;;  %v103_v61 = vld [vmem:[#allocation5 + $0x1d8] sm:$0xff]  ;;  %v491_v62 = vpack.c.bf16 %v53_v54, %v52_v53  ;;  %v493_v0 = vpack.c.bf16 %v71_v59, %v70_v58 }
  0x35   :  { %518 = vmatprep.subr.bf16.mxu1 %v517_v43  ;;  %v523_v63 = vpack.c.bf16 %v85_v57, %v84_v55  ;;  %v54_v1 = vld [vmem:[#allocation5 + $0x50] sm:$0xff]  ;;  %v55_v2 = vld [vmem:[#allocation5 + $0x58] sm:$0xff]  ;;  %v525_v4 = vpack.c.bf16 %v103_v61, %v102_v60  ;;  %v72_v6 = vld [vmem:[#allocation5 + $0xe0] sm:$0xff] }
  0x36   :  { %v86_v3 = vld [vmem:[#allocation5 + $0x150] sm:$0xff]  ;;  %v87_v5 = vld [vmem:[#allocation5 + $0x158] sm:$0xff]  ;;  %v73_v7 = vld [vmem:[#allocation5 + $0xe8] sm:$0xff]  ;;  %v495_v10 = vpack.c.bf16 %v55_v2, %v54_v1 }
  0x37   :  { %488 = vmatpush3.bf16.msra.mxu0 %v487_v50  ;;  %v104_v8 = vld [vmem:[#allocation5 + $0x1e0] sm:$0xff]  ;;  %v105_v9 = vld [vmem:[#allocation5 + $0x1e8] sm:$0xff]  ;;  %v527_v13 = vpack.c.bf16 %v87_v5, %v86_v3  ;;  %v497_v14 = vpack.c.bf16 %v73_v7, %v72_v6  ;;  %v39_v16 = vld [vmem:[#allocation2 + $0x8] sm:$0xff] }
  0x38   :  { %520 = vmatpush3.bf16.msra.mxu1 %v519_v51  ;;  %490 = vmatprep.subr.bf16.mxu0 %v489_v52  ;;  %v56_v11 = vld [vmem:[#allocation5 + $0x60] sm:$0xff]  ;;  %v57_v12 = vld [vmem:[#allocation5 + $0x68] sm:$0xff]  ;;  %v529_v18 = vpack.c.bf16 %v105_v9, %v104_v8  ;;  %v74_v20 = vld [vmem:[#allocation5 + $0xf0] sm:$0xff] }
  0x39   :  { %522 = vmatprep.subr.bf16.mxu1 %v521_v56  ;;  %v88_v15 = vld [vmem:[#allocation5 + $0x160] sm:$0xff]  ;;  %v41_v17 = vld [vmem:[#allocation2 + $0x18] sm:$0xff]  ;;  %v75_v21 = vld [vmem:[#allocation5 + $0xf8] sm:$0xff]  ;;  %204 = vmatprep.mubr.f32.mxu0 %v39_v16  ;;  %v499_v24 = vpack.c.bf16 %v57_v12, %v56_v11 }
  0x3a   :  { %v89_v19 = vld [vmem:[#allocation5 + $0x168] sm:$0xff]  ;;  %v106_v22 = vld [vmem:[#allocation5 + $0x1f0] sm:$0xff]  ;;  %v107_v23 = vld [vmem:[#allocation5 + $0x1f8] sm:$0xff]  ;;  %274 = vmatprep.mubr.f32.mxu1 %v41_v17  ;;  %v501_v26 = vpack.c.bf16 %v75_v21, %v74_v20 }
  0x3b   :  { %492 = vmatpush3.bf16.msra.mxu0 %v491_v62  ;;  %v531_v25 = vpack.c.bf16 %v89_v19, %v88_v15  ;;  %v58_v27 = vld [vmem:[#allocation5 + $0x70] sm:$0xff]  ;;  %v59_v28 = vld [vmem:[#allocation5 + $0x78] sm:$0xff]  ;;  %v533_v30 = vpack.c.bf16 %v107_v23, %v106_v22  ;;  %v124_v32 = vld [vmem:[#allocation5 + $0x280] sm:$0xff] }
  0x3c   :  { %524 = vmatpush3.bf16.msra.mxu1 %v523_v63  ;;  %494 = vmatprep.subr.bf16.mxu0 %v493_v0  ;;  %v90_v29 = vld [vmem:[#allocation5 + $0x170] sm:$0xff]  ;;  %v91_v31 = vld [vmem:[#allocation5 + $0x178] sm:$0xff]  ;;  %v125_v33 = vld [vmem:[#allocation5 + $0x288] sm:$0xff]  ;;  %v503_v34 = vpack.c.bf16 %v59_v28, %v58_v27 }
  0x3d   :  { %526 = vmatprep.subr.bf16.mxu1 %v525_v4  ;;  %v535_v35 = vpack.c.bf16 %v91_v31, %v90_v29  ;;  %v537_v36 = vpack.c.bf16 %v125_v33, %v124_v32  ;;  %v108_v37 = vld [vmem:[#allocation5 + $0x200] sm:$0xff]  ;;  %v109_v38 = vld [vmem:[#allocation5 + $0x208] sm:$0xff]  ;;  %v126_v39 = vld [vmem:[#allocation5 + $0x290] sm:$0xff] }
  0x3e   :  { %v127_v40 = vld [vmem:[#allocation5 + $0x298] sm:$0xff]  ;;  %v38_v41 = vld [vmem:[#allocation2] sm:$0xff]  ;;  %v539_v42 = vpack.c.bf16 %v109_v38, %v108_v37  ;;  %v40_v43 = vld [vmem:[#allocation2 + $0x10] sm:$0xff] }
  0x3f   :  { %496 = vmatpush3.bf16.msra.mxu0 %v495_v10  ;;  %v541_v44 = vpack.c.bf16 %v127_v40, %v126_v39  ;;  %v110_v45 = vld [vmem:[#allocation5 + $0x210] sm:$0xff]  ;;  %v111_v46 = vld [vmem:[#allocation5 + $0x218] sm:$0xff]  ;;  %v128_v47 = vld [vmem:[#allocation5 + $0x2a0] sm:$0xff] }
  0x40   :  { %528 = vmatpush3.bf16.msra.mxu1 %v527_v13  ;;  %498 = vmatprep.subr.bf16.mxu0 %v497_v14  ;;  %v129_v48 = vld [vmem:[#allocation5 + $0x2a8] sm:$0xff]  ;;  %v43_v49 = vld [vmem:[#allocation2 + $0x28] sm:$0xff]  ;;  %v543_v50 = vpack.c.bf16 %v111_v46, %v110_v45  ;;  %v112_v52 = vld [vmem:[#allocation5 + $0x220] sm:$0xff] }
  0x41   :  { %530 = vmatprep.subr.bf16.mxu1 %v529_v18  ;;  %v545_v51 = vpack.c.bf16 %v129_v48, %v128_v47  ;;  %v113_v53 = vld [vmem:[#allocation5 + $0x228] sm:$0xff]  ;;  %v130_v54 = vld [vmem:[#allocation5 + $0x2b0] sm:$0xff]  ;;  %v131_v55 = vld [vmem:[#allocation5 + $0x2b8] sm:$0xff] }
  0x42   :  { %v547_v56 = vpack.c.bf16 %v113_v53, %v112_v52  ;;  %v549_v57 = vpack.c.bf16 %v131_v55, %v130_v54  ;;  %v114_v58 = vld [vmem:[#allocation5 + $0x230] sm:$0xff]  ;;  %v115_v59 = vld [vmem:[#allocation5 + $0x238] sm:$0xff]  ;;  %v132_v60 = vld [vmem:[#allocation5 + $0x2c0] sm:$0xff] }
  0x43   :  { %500 = vmatpush3.bf16.msra.mxu0 %v499_v24  ;;  %v133_v61 = vld [vmem:[#allocation5 + $0x2c8] sm:$0xff]  ;;  %v551_v62 = vpack.c.bf16 %v115_v59, %v114_v58  ;;  %v116_v0 = vld [vmem:[#allocation5 + $0x240] sm:$0xff]  ;;  %v134_v2 = vld [vmem:[#allocation5 + $0x2d0] sm:$0xff] }
  0x44   :  { %532 = vmatpush3.bf16.msra.mxu1 %v531_v25  ;;  %502 = vmatprep.subr.bf16.mxu0 %v501_v26  ;;  %v553_v63 = vpack.c.bf16 %v133_v61, %v132_v60  ;;  %v117_v1 = vld [vmem:[#allocation5 + $0x248] sm:$0xff]  ;;  %v135_v3 = vld [vmem:[#allocation5 + $0x2d8] sm:$0xff]  ;;  %v118_v6 = vld [vmem:[#allocation5 + $0x250] sm:$0xff] }
  0x45   :  { %534 = vmatprep.subr.bf16.mxu1 %v533_v30  ;;  %v555_v4 = vpack.c.bf16 %v117_v1, %v116_v0  ;;  %v557_v5 = vpack.c.bf16 %v135_v3, %v134_v2  ;;  %v119_v7 = vld [vmem:[#allocation5 + $0x258] sm:$0xff]  ;;  %v136_v8 = vld [vmem:[#allocation5 + $0x2e0] sm:$0xff]  ;;  %v137_v9 = vld [vmem:[#allocation5 + $0x2e8] sm:$0xff] }
  0x46   :  { %v559_v10 = vpack.c.bf16 %v119_v7, %v118_v6  ;;  %v561_v11 = vpack.c.bf16 %v137_v9, %v136_v8  ;;  %v120_v12 = vld [vmem:[#allocation5 + $0x260] sm:$0xff]  ;;  %v121_v13 = vld [vmem:[#allocation5 + $0x268] sm:$0xff]  ;;  %v138_v14 = vld [vmem:[#allocation5 + $0x2f0] sm:$0xff] }
  0x47   :  { %504 = vmatpush3.bf16.msra.mxu0 %v503_v34  ;;  %v139_v15 = vld [vmem:[#allocation5 + $0x2f8] sm:$0xff]  ;;  %v563_v16 = vpack.c.bf16 %v121_v13, %v120_v12  ;;  %v122_v18 = vld [vmem:[#allocation5 + $0x270] sm:$0xff] }
  0x48   :  { %536 = vmatpush3.bf16.msra.mxu1 %v535_v35  ;;  %538 = vmatprep.subr.bf16.mxu0 %v537_v36  ;;  %v565_v17 = vpack.c.bf16 %v139_v15, %v138_v14  ;;  %v123_v19 = vld [vmem:[#allocation5 + $0x278] sm:$0xff]  ;;  %v42_v21 = vld [vmem:[#allocation2 + $0x20] sm:$0xff] }
  0x49   :  { %v567_v20 = vpack.c.bf16 %v123_v19, %v122_v18 }
  0x4a   :  { %205 = vmatmul.mubr.f32.vlgmr.msra.gmra.mrb[0].mxu0 %v38_v41 }
  0x4b   :  { %275 = vmatmul.mubr.f32.vlgmr.msra.gmra.mrb[0].mxu1 %v40_v43  ;;  %540 = vmatpush3.bf16.msra.mxu0 %v539_v42 }
  0x4c   :  { %542 = vmatprep.subr.bf16.mxu0 %v541_v44  ;;  %344 = vmatprep.mubr.f32.mxu0 %v43_v49 }
  0x4f   :  { %544 = vmatpush3.bf16.msra.mxu0 %v543_v50 }
  0x50   :  { %546 = vmatprep.subr.bf16.mxu0 %v545_v51 }
  0x53   :  { %548 = vmatpush3.bf16.msra.mxu0 %v547_v56 }
  0x54   :  { %550 = vmatprep.subr.bf16.mxu0 %v549_v57 }
  0x57   :  { %552 = vmatpush3.bf16.msra.mxu0 %v551_v62 }
  0x58   :  { %554 = vmatprep.subr.bf16.mxu0 %v553_v63 }
  0x5b   :  { %556 = vmatpush3.bf16.msra.mxu0 %v555_v4 }
  0x5c   :  { %558 = vmatprep.subr.bf16.mxu0 %v557_v5 }
  0x5f   :  { %560 = vmatpush3.bf16.msra.mxu0 %v559_v10 }
  0x60   :  { %562 = vmatprep.subr.bf16.mxu0 %v561_v11 }
  0x63   :  { %564 = vmatpush3.bf16.msra.mxu0 %v563_v16 }
  0x64   :  { %566 = vmatprep.subr.bf16.mxu0 %v565_v17 }
  0x67   :  { %568 = vmatpush3.bf16.msra.mxu0 %v567_v20 }
  0x6a   :  { %345 = vmatmul.mubr.f32.vlgmr.msra.gmra.mrb[2].mxu0 %v42_v21 }
 0x11d   :  { %v400_v22 = vpop.f32.mrb[0].mxu0 }
 0x11e   :  { %v435_v23 = vpop.f32.mrb[0].mxu1  ;;  %v401_v24 = vpop.f32.mrb[1].mxu0 }
 0x11f   :  { %v402_v25 = vadd.f32 %v401_v24, %v400_v22  ;;  %v436_v26 = vpop.f32.mrb[1].mxu1 }
 0x120   :  { %v437_v27 = vadd.f32 %v436_v26, %v435_v23 }
 0x122   :  { %v277_v28 = vadd.f32 %v437_v27, %v402_v25 }
 0x13d   :  { %v470_v29 = vpop.f32.mrb[2].mxu0 }
 0x13e   :  { %v471_v30 = vpop.f32.mrb[3].mxu0 }
 0x13f   :  { %v472_v31 = vadd.f32 %v471_v30, %v470_v29 }
 0x141   :  { %v347_v32 = vadd.f32 %v472_v31, %v277_v28 }
 0x143   :  { %351 = vst.msk [vmem:[#allocation7] sm:$0xff] %vm350_vm0, %v347_v32 }
 0x144   :  { %629 = shalt.err (!%p626_p6)
}
 0x145   :  { %s630_s10 = scalar_lea.hbm %s711_s2, 128 }
 0x146   :  { %p631_p7 = scmp.ne.s32.totalorder %s711_s2, %s630_s10  ;;  %p634_p8 = scmp.lt.u32.totalorder %s630_s10, %s711_s2 }
 0x148   :  { %p636_p9 = pnand %p634_p8, %p631_p7 }
 0x14a   :  { %639 = shalt.err (!%p636_p9)
}
 0x14b   :  { %361 = dma.vmem_to_hbm [thread:$0]  %s359_s6, 128, %s711_s2, [#allocation4]  }
 0x14c   :  { %644 = dma.done.wait [#allocation4], 128  }
 0x14d   :  { %645 = vsyncadd [#allocation4], 4294967168 }
 0x14e   :  { %365 = vsyncpa [#allocation3], 1 }
 0x14f   :  { %366 = vsyncpa [#allocation6], 1 }
 0x150   :  { %367 = vsyncpa [#allocation4], 1 }

// kernel: clip_surgery_vision_forward.30
= control target key start
LH: loop header
LB: loop body
LE: loop exit
PB: predicated region body
PF: predicated region fallthrough
CT: control target
= control target key end

     0   :  { %s2596_s0 = inlined_call_operand.hbm [shape: f32[6,4,5,8], index: 0, kind: input, shape index: {}, may-alias: {0,1,2}]   ;;  %s2597_s1 = inlined_call_operand.hbm [shape: f32[6,4,5,8], index: 1, kind: input, shape index: {}, may-alias: {0,1,2}]   ;;  %s2598_s2 = inlined_call_operand.hbm [shape: f32[6,4,5,8], index: 2, kind: input, shape index: {}, may-alias: {0,1,2}]   ;;  %s2599_s3 = inlined_call_operand.hbm [shape: f32[2,5,32], index: 3, kind: input, shape index: {}]   ;;  %s2600_s4 = inlined_call_operand.hbm [shape: f32[2,16,32], index: 4, kind: input, shape index: {}]   ;;  %s2601_s5 = inlined_call_operand.hbm [shape: f32[1,32], index: 5, kind: input, shape index: {}]   ;;  %s2602_s6 = inlined_call_operand.hbm [shape: f32[2,5,32], index: 6, kind: output, shape index: {}]  }
   0x1   :  { %2641 = sst [smem:[#allocation44_spill]] %s2596_s0 }
   0x2   :  { %2642 = sst [smem:[#allocation45_spill]] %s2597_s1 }
   0x3   :  { %2643 = sst [smem:[#allocation46_spill]] %s2598_s2 }
   0x4   :  { %2644 = sst [smem:[#allocation47_spill]] %s2599_s3 }
   0x5   :  { %2645 = sst [smem:[#allocation48_spill]] %s2600_s4 }
   0x6   :  { %2646 = sst [smem:[#allocation49_spill]] %s2601_s5 }
   0x7   :  { %2647 = sst [smem:[#allocation50_spill]] %s2602_s6 }
   0x8   :  { %11 = vsyncpa [#allocation4], 0 }
   0x9   :  { %13 = vsyncpa [#allocation4 + $0x1], 0 }
   0xa   :  { %14 = vsyncpa [#allocation7], 0 }
   0xb   :  { %16 = vsyncpa [#allocation7 + $0x1], 0 }
   0xc   :  { %17 = vsyncpa [#allocation10], 0 }
   0xd   :  { %19 = vsyncpa [#allocation10 + $0x1], 0 }
   0xe   :  { %20 = vsyncpa [#allocation13], 0 }
   0xf   :  { %21 = vsyncpa [#allocation5], 0 }
  0x10   :  { %23 = vsyncpa [#allocation5 + $0x1], 0  ;;  %s1897_s21 = smov 0   ;;  %s1899_s22 = smov 0  }
  0x11   :  { %s1901_s23 = smov 0   ;;  %s1903_s24 = smov 0  }
  0x12   :  { %s1905_s25 = smov 0   ;;  %s1907_s26 = smov 0  }
  0x13   :  { %s1909_s27 = smov 0   ;;  %s1911_s28 = smov 0  }
  0x14   :  { %s1913_s29 = smov 0   ;;  %s1915_s30 = smov 0  }
  0x15   :  { %s1917_s7 = smov 0   ;;  %s1919_s8 = smov 0  }
  0x16   :  { %s1921_s9 = smov 0   ;;  %s1923_s10 = smov 0  }
  0x17   :  { %s1925_s11 = smov 0   ;;  %s1927_s12 = smov 0  }
  0x18   :  { %s1929_s13 = smov 0   ;;  %s1931_s14 = smov 0  }
  0x19   :  { %s1933_s15 = smov 0   ;;  %s1935_s16 = smov 0  }
  0x1a LB: > { %2648 = sst [smem:[#allocation22_spill]] %s1770_s21  ;;  %s41_s17 = sadd.s32 1, %s1838_s14  ;;  %s1846_s16 = sphi %s1935_s16, %s29_s16   ;;  %s1842_s15 = sphi %s1933_s15, %s2772_s15   ;;  %s1838_s14 = sphi %s1931_s14, %s2771_s14   ;;  %s1834_s13 = sphi %s1929_s13, %s2755_s13   ;;  %s1830_s12 = sphi %s1927_s12, %s2770_s12   ;;  %s1826_s11 = sphi %s1925_s11, %s2754_s11   ;;  %s1822_s10 = sphi %s1923_s10, %s2769_s10   ;;  %s1818_s9 = sphi %s1921_s9, %s2768_s9   ;;  %s1814_s8 = sphi %s1919_s8, %s2752_s8   ;;  %s1810_s7 = sphi %s1917_s7, %s2767_s7   ;;  %s1806_s30 = sphi %s1915_s30, %s2766_s30   ;;  %s1802_s29 = sphi %s1913_s29, %s2765_s29   ;;  %s1798_s28 = sphi %s1911_s28, %s2764_s28   ;;  %s1794_s27 = sphi %s1909_s27, %s2763_s27   ;;  %s1790_s26 = sphi %s1907_s26, %s2762_s26   ;;  %s1786_s25 = sphi %s1905_s25, %s2760_s25   ;;  %s1782_s24 = sphi %s1903_s24, %s2759_s24   ;;  %s1778_s23 = sphi %s1901_s23, %s2757_s23   ;;  %s1774_s22 = sphi %s1899_s22, %s2746_s22   ;;  %s1770_s21 = sphi %s1897_s21, %s2745_s21  }
  0x1b   : > { %2649 = sst [smem:[#allocation23_spill]] %s1774_s22  ;;  %s48_s18 = sadd.s32 1, %s1842_s15 }
  0x1c   : > { %2650 = sst [smem:[#allocation24_spill]] %s1778_s23  ;;  %p42_p0 = scmp.ge.s32.totalorder %s41_s17, 2 }
  0x1d   : > { %2651 = sst [smem:[#allocation25_spill]] %s1782_s24  ;;  %p2615_p1 = scmp.eq.s32.totalorder %s1846_s16, 0 }
  0x1e   : > { %2652 = sst [smem:[#allocation26_spill]] %s1790_s26  ;;  %s82_s19 = sadd.s32 2, %s1842_s15 }
  0x1f   : > { %2653 = sst [smem:[#allocation27_spill]] %s1794_s27  ;;  %s89_s20 = sadd.s32 1, %s1814_s8 }
  0x20   : > { %2654 = sst [smem:[#allocation28_spill]] %s1798_s28  ;;  %s2774_s17 = smov (%p42_p0, %s41_s17), 0 }
  0x21   : > { %2655 = sst [smem:[#allocation29_spill]] %s1802_s29  ;;  %s2776_s18 = smov (!%p42_p0, %s48_s18), %s1842_s15 }
  0x22   : > { %2656 = sst [smem:[#allocation30_spill]] %s1814_s8  ;;  %s2007_s6 = ssub.s32 %s1838_s14, %s2774_s17 }
  0x23   : > { %2657 = sst [smem:[#allocation31_spill]] %s1818_s9  ;;  %p96_p2 = scmp.ne.s32.totalorder %s1814_s8, %s1810_s7 }
  0x24   : > { %2658 = sst [smem:[#allocation32_spill]] %s1826_s11  ;;  %p50_p3 = scmp.ge.s32.totalorder %s2776_s18, 2 }
  0x25   : > { %2659 = sst [smem:[#allocation33_spill]] %s1830_s12  ;;  %p2015_p5 = por %p96_p2, %p2615_p1 }
  0x26   : > { %2660 = sst [smem:[#allocation34_spill]] %s1834_s13  ;;  %s112_s12 = sadd.s32 4, %s1842_s15 }
  0x27   : > { %2661 = sst [smem:[#allocation35_spill]] %s1842_s15  ;;  %s2778_s18 = smov (%p50_p3, %s2776_s18), 0 }
  0x28   : > { %2662 = sst [smem:[#allocation36_spill]] %s2774_s17  ;;  %s83_s17 = sadd.s32 2, %s2778_s18 }
  0x29   : > { %2664 = sst [smem:[#allocation37_spill]] %s2778_s18  ;;  %s113_s4 = sadd.s32 4, %s2778_s18 }
  0x2a   : > { %s84_s21 = ssub.s32 %s82_s19, %s83_s17  ;;  %s114_s22 = ssub.s32 %s112_s12, %s113_s4 }
  0x2b   : > { %s86_s23 = sor.u32 %s84_s21, %s2007_s6  ;;  %s116_s2 = sor.u32 %s114_s22, %s2007_s6 }
  0x2c   : > { %p87_p7 = scmp.eq.s32.totalorder %s86_s23, 0  ;;  %p2027_p8 = scmp.eq.s32.totalorder %s116_s2, 0 }
  0x2d   : > { %p2614_p9 = scmp.lt.s32.totalorder %s1846_s16, 4  ;;  %s1147_s28 = sshll.u32 %s1838_s14, 1 }
  0x2e   : > { %s2665_s27 = scalar_select %p2027_p8, 1, 0 }
  0x2f   : > { %s2034_s29 = scalar_select %p87_p7, %s1814_s8, %s89_s20  }
  0x30   : > { %s1148_s0 = sshll.u32 %s1842_s15, 2  ;;  %s2620_s4 = sand.u32 1, %s1846_s16  }
  0x31   : > { %2666 = sst [smem:[#allocation38_spill]] %s2034_s29  ;;  %s281_s5 = sadd.s32 %s1148_s0, %s1147_s28 }
  0x32   : > { %s2037_s9 = sshll.u32 %s281_s5, 7  ;;  %s296_s21 = sand.u32 1, %s1814_s8  }
  0x33   : > { %s1150_s22 = sshll.u32 %s296_s21, 4  ;;  %s2667_s1 = sld [smem:[#allocation45_spill]] }
  0x34   : > { %s298_s19 = scalar_lea.vmem [#allocation6], %s1150_s22  ;;  %p2051_p10 = pnand %p2614_p9, %p2015_p5 }
  0x35   : > { %s308_s20 = sshll.u32 %s298_s19, 4  ;;  %s2059_s5 = scalar_lea.sflag [#allocation7], %s2620_s4  ;;  %s2055_s20 = int_to_ptr.vmem [resolvable:$true] %s308_s20 }
  0x36   : > { %p1454_p12 = pneg %p2051_p10 }
  0x39   : > { %s994_s2 = scalar_lea.hbm %s2667_s1, %s2037_s9  ;;  %s1457_s22 = scalar_lea.hbm %s2667_s1, 3072 }
  0x3a   : > { %s2045_s23 = scalar_lea.hbm %s994_s2, 1024  ;;  %s1482_s28 = scalar_lea.hbm %s994_s2, 1280 }
  0x3b   : > { %p1453_p11 = scmp.ne.s32.totalorder %s2045_s23, %s1482_s28  ;;  %p1458_p2 = scmp.lt.u32.totalorder %s2045_s23, %s2667_s1 }
  0x3c   : > { %p1459_p3 = scmp.lt.u32.totalorder %s1457_s22, %s1482_s28  ;;  %p1461_p7 = scmp.lt.u32.totalorder %s1482_s28, %s2045_s23 }
  0x3d   : > { %p1455_p13 = pnand %p1454_p12, %p1453_p11 }
  0x3e   : > { %p1460_p5 = por %p1459_p3, %p1458_p2 }
  0x3f   : > { %p1456_p0 = pneg %p1455_p13 }
  0x40   : > { %p1462_p6 = por %p1461_p7, %p1460_p5 }
  0x42   : > { %p1463_p9 = pnand %p1462_p6, %p1456_p0 }
  0x44   : > { %1466 = shalt.err (!%p1463_p9)
}
  0x45   : > { %s1467_s2 = scalar_lea.vmem %s2055_s20, 256  ;;  %s1848_s19 = smov [#allocation6]  }
  0x46   : > { %p1468_p11 = scmp.ne.s32.totalorder %s2055_s20, %s1467_s2  ;;  %s1472_s13 = sshll.u32 %s1848_s19, 4  ;;  %s1473_s13 = int_to_ptr.vmem [resolvable:$false] %s1472_s13 }
  0x47   : > { %s1474_s21 = scalar_lea.vmem %s1473_s13, 512  ;;  %p1475_p4 = scmp.lt.s32.totalorder %s2055_s20, %s1473_s13 }
  0x48   : > { %p1470_p13 = pnand %p1468_p11, %p1454_p12  ;;  %p1476_p2 = scmp.lt.s32.totalorder %s1474_s21, %s1467_s2 }
  0x4a   : > { %p1471_p1 = pneg %p1470_p13  ;;  %p1477_p3 = por %p1476_p2, %p1475_p4 }
  0x4c   : > { %p1478_p5 = pnand %p1477_p3, %p1471_p1 }
  0x4e   : > { %1481 = shalt.err (!%p1478_p5)
}
  0x4f   : > { %s2616_s28 = smov 128   ;;  %s2618_s22 = smov 8  }
  0x50   : > { %1258 = dma.hbm_to_vmem [thread:$0]  (!%p2051_p10), %s2045_s23, 256, %s2055_s20, %s2059_s5, %s2616_s28, %s2616_s28, %s2618_s22  }
  0x51   : > { %s2090_s12 = sadd.s32 4294967295, %s1846_s16   ;;  %s1142_s17 = sadd.s32 4294967294, %s1846_s16  }
  0x52   : > { %s52_s2 = ssub.s32 %s1842_s15, %s2778_s18  ;;  %p2624_p1 = scmp.eq.s32.totalorder %s2090_s12, 0 }
  0x53   : > { %s54_s19 = sor.u32 %s2007_s6, %s52_s2  ;;  %p145_p4 = scmp.eq.s32.totalorder %s52_s2, 0 }
  0x54   : > { %p2097_p6 = scmp.eq.s32.totalorder %s54_s19, 0  ;;  %p2670_p9 = scmp.ne.s32.totalorder %s1810_s7, %s1806_s30 }
  0x55   : > { %s147_s20 = sadd.s32 1, %s1790_s26  ;;  %p154_p12 = scmp.ne.s32.totalorder %s1790_s26, %s1786_s25 }
  0x56   : > { %s2669_s13 = scalar_select %p2097_p6, 1, 0 }
  0x57   : > { %p2106_p10 = por %p2670_p9, %p2624_p1  ;;  %p2673_p0 = scmp.eq.s32.totalorder %s1846_s16, 0 }
  0x58   : > { %s2114_s0 = scalar_select %p145_p4, %s1790_s26, %s147_s20  }
  0x59   : > { %s2671_s23 = scalar_select %p2106_p10, 1, 0 }
  0x5a   : > { %2672 = sst [smem:[#allocation39_spill]] %s2114_s0  ;;  %p2118_p7 = por %p154_p12, %p2673_p0 }
  0x5b   : > { %p160_p11 = scmp.ne.s32.totalorder %s1786_s25, %s1782_s24  ;;  %p233_p13 = scmp.eq.s32.totalorder %s2090_s12, 3 }
  0x5c   : > { %p239_p2 = scmp.eq.s32.totalorder %s1142_s17, 3  ;;  %s344_s20 = sand.u32 1, %s1790_s26  }
  0x5d   : > { %p2127_p3 = por %p160_p11, %p2624_p1  ;;  %p2131_p5 = por %p233_p13, %p154_p12 }
  0x5e   : > { %p2135_p4 = por %p239_p2, %p160_p11  ;;  %s1158_s28 = sshll.u32 %s344_s20, 3 }
  0x5f   : > { %s2675_s30 = scalar_select %p2127_p3, 1, 0 }
  0x60   : > { %s2677_s2 = scalar_select %p2131_p5, 1, 0 }
  0x61   : > { %2676 = sst [smem:[#allocation40_spill]] %s2675_s30  ;;  %s1159_s22 = sshll.u32 %s1842_s15, 7 }
  0x62   : > { %2678 = sst [smem:[#allocation41_spill]] %s2677_s2  ;;  %s346_s18 = scalar_lea.vmem [#allocation9], %s1158_s28 }
  0x63   : > { %s2679_s19 = scalar_select %p2135_p4, 1, 0 }
  0x64   : > { %s2681_s3 = sld [smem:[#allocation47_spill]]  ;;  %s354_s29 = sshll.u32 %s346_s18, 4  ;;  %s2154_s29 = int_to_ptr.vmem [resolvable:$true] %s354_s29 }
  0x65   : > { %2680 = sst [smem:[#allocation42_spill]] %s2679_s19  ;;  %p2682_p9 = scmp.lt.s32.totalorder %s1846_s16, 4 }
  0x66   : > { %s2684_s20 = sand.u32 1, %s1846_s16  }
  0x67   : > { %p2150_p12 = pnand %p2682_p9, %p2118_p7  ;;  %s2158_s1 = scalar_lea.sflag [#allocation10], %s2684_s20 }
  0x69   : > { %p1485_p11 = pneg %p2150_p12 }
  0x6a   : > { %s2144_s17 = scalar_lea.hbm %s2681_s3, %s1159_s22  ;;  %s1488_s22 = scalar_lea.hbm %s2681_s3, 256 }
  0x6b   : > { %s1483_s4 = scalar_lea.hbm %s2144_s17, 128  ;;  %p1489_p7 = scmp.lt.u32.totalorder %s2144_s17, %s2681_s3 }
  0x6c   : > { %p1484_p0 = scmp.ne.s32.totalorder %s2144_s17, %s1483_s4  ;;  %p1490_p9 = scmp.lt.u32.totalorder %s1488_s22, %s1483_s4 }
  0x6d   : > { %p1492_p4 = scmp.lt.u32.totalorder %s1483_s4, %s2144_s17 }
  0x6e   : > { %p1486_p13 = pnand %p1485_p11, %p1484_p0  ;;  %p1491_p1 = por %p1490_p9, %p1489_p7 }
  0x70   : > { %p1487_p2 = pneg %p1486_p13  ;;  %p1493_p5 = por %p1492_p4, %p1491_p1 }
  0x72   : > { %p1494_p3 = pnand %p1493_p5, %p1487_p2 }
  0x74   : > { %1497 = shalt.err (!%p1494_p3)
}
  0x75   : > { %s1498_s20 = scalar_lea.vmem %s2154_s29, 128  ;;  %s1851_s18 = smov [#allocation9]  }
  0x76   : > { %p1499_p0 = scmp.ne.s32.totalorder %s2154_s29, %s1498_s20  ;;  %s1503_s28 = sshll.u32 %s1851_s18, 4  ;;  %s1504_s28 = int_to_ptr.vmem [resolvable:$false] %s1503_s28 }
  0x77   : > { %s1505_s15 = scalar_lea.vmem %s1504_s28, 256  ;;  %p1506_p8 = scmp.lt.s32.totalorder %s2154_s29, %s1504_s28 }
  0x78   : > { %p1501_p13 = pnand %p1499_p0, %p1485_p11  ;;  %p1507_p7 = scmp.lt.s32.totalorder %s1505_s15, %s1498_s20 }
  0x7a   : > { %p1502_p10 = pneg %p1501_p13  ;;  %p1508_p9 = por %p1507_p7, %p1506_p8 }
  0x7c   : > { %p1509_p1 = pnand %p1508_p9, %p1502_p10 }
  0x7e   : > { %1512 = shalt.err (!%p1509_p1)
}
  0x7f   : > { %s2685_s4 = sld [smem:[#allocation31_spill]]  ;;  %p1143_p3 = scmp.ge.s32.totalorder %s1846_s16, 1 }
  0x80   : > { %1264 = dma.hbm_to_vmem [thread:$0]  (!%p2150_p12), %s2144_s17, 128, %s2154_s29, %s2158_s1  }
  0x81   : > { %p246_p5 = scmp.lt.s32.totalorder %s1846_s16, 5  ;;  %s1852_s8 = smov [#allocation12]  }
  0x82   : > { %s259_s21 = sshll.u32 %s1852_s8, 4  ;;  %p2687_p10 = scmp.eq.s32.totalorder %s2090_s12, 0  ;;  %s260_s21 = int_to_ptr.vmem [resolvable:$true] %s259_s21 }
  0x83   : > { %p2188_p4 = pnand %p1143_p3, %p246_p5  ;;  %s59_s18 = sadd.s32 1, %s1826_s11 }
  0x84   : > { %s2689_s28 = sld [smem:[#allocation49_spill]] }
  0x85   : > { %s2686_s22 = scalar_select %p2188_p4, 1, 0 }
  0x86   : > { %p1248_p8 = pneg %p2188_p4 }
  0x88   : > { %p2196_p11 = pnand %p1248_p8, %p2687_p10 }
  0x8a   : > { %s2690_s3 = smov %s2689_s28  ;;  %s1513_s15 = scalar_lea.hbm %s2689_s28, 16 }
  0x8b   : > { %p1514_p0 = scmp.ne.s32.totalorder %s2690_s3, %s1513_s15  ;;  %p1515_p13 = pneg %p2196_p11 }
  0x8c   : > { %p1520_p1 = scmp.lt.u32.totalorder %s1513_s15, %s2690_s3 }
  0x8d   : > { %p1516_p7 = pnand %p1515_p13, %p1514_p0 }
  0x8f   : > { %p1517_p9 = pneg %p1516_p7 }
  0x91   : > { %p1522_p3 = pnand %p1520_p1, %p1517_p9 }
  0x93   : > { %1525 = shalt.err (!%p1522_p3)
}
  0x94   : > { %s1526_s24 = scalar_lea.vmem %s260_s21, 16  ;;  %s1533_s29 = scalar_lea.vmem %s260_s21, 32 }
  0x95   : > { %p1527_p5 = scmp.ne.s32.totalorder %s260_s21, %s1526_s24  ;;  %p1534_p2 = scmp.lt.s32.totalorder %s260_s21, %s260_s21 }
  0x96   : > { %p1535_p12 = scmp.lt.s32.totalorder %s1533_s29, %s1526_s24 }
  0x97   : > { %p1529_p8 = pnand %p1527_p5, %p1515_p13 }
  0x98   : > { %p1536_p4 = por %p1535_p12, %p1534_p2 }
  0x99   : > { %p1530_p10 = pneg %p1529_p8 }
  0x9b   : > { %p1537_p6 = pnand %p1536_p4, %p1530_p10 }
  0x9d   : > { %1540 = shalt.err (!%p1537_p6)
}
  0x9e   : > { %1251 = dma.hbm_to_vmem [thread:$0]  (!%p2196_p11), %s2690_s3, 16, %s260_s21, [#allocation13]  }
  0x9f   : > { %p2691_p12 = scmp.ne.s32.totalorder %s2669_s13, 0  ;;  %p2693_p6 = scmp.ne.s32.totalorder %s1826_s11, %s1822_s10 }
  0xa0   : > { %p2694_p4 = scmp.eq.s32.totalorder %s1846_s16, 0  ;;  %p2695_p0 = scmp.ne.s32.totalorder %s1822_s10, %s2685_s4 }
  0xa1   : > { %s2224_s24 = scalar_select %p2691_p12, %s1826_s11, %s59_s18  }
  0xa2   : > { %p68_p2 = por %p2694_p4, %p2693_p6  ;;  %p2696_p13 = scmp.eq.s32.totalorder %s2090_s12, 0 }
  0xa3   : > { %2692 = sst [smem:[#allocation43_spill]] %s2224_s24  ;;  %s270_s20 = sand.u32 1, %s1826_s11  }
  0xa4   : > { %p2236_p7 = por %p2696_p13, %p2695_p0  ;;  %s2698_s15 = sld [smem:[#allocation44_spill]] }
  0xa5   : > { %s1146_s13 = sshll.u32 %s270_s20, 4  ;;  %p2700_p11 = scmp.lt.s32.totalorder %s1846_s16, 4 }
  0xa6   : > { %s274_s4 = scalar_lea.vmem [#allocation3], %s1146_s13  ;;  %s2255_s29 = scalar_lea.sflag [#allocation4], %s270_s20 }
  0xa7   : > { %p2249_p9 = pnand %p2700_p11, %p68_p2  ;;  %s284_s18 = sshll.u32 %s274_s4, 4  ;;  %s2253_s18 = int_to_ptr.vmem [resolvable:$true] %s284_s18 }
  0xa9   : > { %p1543_p3 = pneg %p2249_p9 }
  0xaa   : > { %s2699_s0 = smov %s2698_s15  ;;  %s2245_s8 = scalar_lea.hbm %s2698_s15, %s2037_s9 }
  0xab   : > { %s1541_s26 = scalar_lea.hbm %s2245_s8, 256  ;;  %s1546_s15 = scalar_lea.hbm %s2699_s0, 3072 }
  0xac   : > { %p1542_p1 = scmp.ne.s32.totalorder %s2245_s8, %s1541_s26  ;;  %p1547_p10 = scmp.lt.u32.totalorder %s2245_s8, %s2699_s0 }
  0xad   : > { %p1548_p12 = scmp.lt.u32.totalorder %s1546_s15, %s1541_s26  ;;  %p1550_p4 = scmp.lt.u32.totalorder %s1541_s26, %s2245_s8 }
  0xae   : > { %p1544_p5 = pnand %p1543_p3, %p1542_p1 }
  0xaf   : > { %p1549_p6 = por %p1548_p12, %p1547_p10 }
  0xb0   : > { %p1545_p8 = pneg %p1544_p5 }
  0xb1   : > { %p1551_p2 = por %p1550_p4, %p1549_p6 }
  0xb3   : > { %p1552_p0 = pnand %p1551_p2, %p1545_p8 }
  0xb5   : > { %1555 = shalt.err (!%p1552_p0)
}
  0xb6   : > { %s1556_s20 = scalar_lea.vmem %s2253_s18, 256  ;;  %s1853_s13 = smov [#allocation3]  }
  0xb7   : > { %p1557_p13 = scmp.ne.s32.totalorder %s2253_s18, %s1556_s20  ;;  %s1561_s4 = sshll.u32 %s1853_s13, 4  ;;  %s1562_s4 = int_to_ptr.vmem [resolvable:$false] %s1561_s4 }
  0xb8   : > { %s1563_s3 = scalar_lea.vmem %s1562_s4, 512  ;;  %p1564_p5 = scmp.lt.s32.totalorder %s2253_s18, %s1562_s4 }
  0xb9   : > { %p1559_p11 = pnand %p1557_p13, %p1543_p3  ;;  %p1565_p10 = scmp.lt.s32.totalorder %s1563_s3, %s1556_s20 }
  0xbb   : > { %p1560_p1 = pneg %p1559_p11  ;;  %p1566_p12 = por %p1565_p10, %p1564_p5 }
  0xbd   : > { %p1567_p6 = pnand %p1566_p12, %p1560_p1 }
  0xbf   : > { %1570 = shalt.err (!%p1567_p6)
}
  0xc0   : > { %s2702_s24 = smov 8   ;;  %s2703_s26 = smov 128  }
  0xc1   : > { %s2704_s17 = sld [smem:[#allocation29_spill]]  ;;  %s2705_s28 = sld [smem:[#allocation28_spill]] }
  0xc2   : > { %s2706_s15 = sld [smem:[#allocation27_spill]]  ;;  %p2707_p3 = scmp.ne.s32.totalorder %s2665_s27, 0 }
  0xc3   : > { %1255 = dma.hbm_to_vmem [thread:$0]  (!%p2249_p9), %s2245_s8, 256, %s2253_s18, %s2255_s29, %s2703_s26, %s2703_s26, %s2702_s24  }
  0xc4   : > { %s2708_s0 = sld [smem:[#allocation46_spill]]  ;;  %p2709_p2 = scmp.eq.s32.totalorder %s1846_s16, 0 }
  0xc5   : > { %p2710_p13 = scmp.eq.s32.totalorder %s2090_s12, 0  ;;  %p2712_p9 = scmp.lt.s32.totalorder %s1846_s16, 4 }
  0xc7   : > { %s119_s21 = sadd.s32 1, %s2704_s17  ;;  %p126_p8 = scmp.ne.s32.totalorder %s2704_s17, %s2705_s28 }
  0xc8   : > { %s2290_s20 = scalar_select %p2707_p3, %s2704_s17, %s119_s21  }
  0xc9   : > { %p132_p4 = scmp.ne.s32.totalorder %s2705_s28, %s2706_s15  ;;  %s320_s13 = sand.u32 1, %s2704_s17  }
  0xca   : > { %s1003_s11 = scalar_lea.hbm %s2708_s0, %s2037_s9  ;;  %p128_p0 = por %p126_p8, %p2709_p2 }
  0xcb   : > { %p2305_p11 = por %p132_p4, %p2710_p13  ;;  %s1154_s30 = sshll.u32 %s320_s13, 4 }
  0xcc   : > { %s2309_s8 = scalar_lea.hbm %s1003_s11, 2048  ;;  %p2313_p1 = pnand %p2712_p9, %p128_p0 }
  0xcd   : > { %s2711_s2 = scalar_select %p2305_p11, 1, 0 }
  0xce   : > { %s322_s9 = scalar_lea.vmem [#allocation8], %s1154_s30  ;;  %s1601_s29 = scalar_lea.hbm %s1003_s11, 2304 }
  0xcf   : > { %s332_s18 = sshll.u32 %s322_s9, 4  ;;  %p1572_p5 = scmp.ne.s32.totalorder %s2309_s8, %s1601_s29  ;;  %s2317_s18 = int_to_ptr.vmem [resolvable:$true] %s332_s18 }
  0xd0   : > { %p1573_p10 = pneg %p2313_p1  ;;  %s1576_s15 = scalar_lea.hbm %s2708_s0, 3072 }
  0xd1   : > { %p1577_p3 = scmp.lt.u32.totalorder %s2309_s8, %s2708_s0  ;;  %p1578_p8 = scmp.lt.u32.totalorder %s1576_s15, %s1601_s29 }
  0xd2   : > { %p1574_p12 = pnand %p1573_p10, %p1572_p5  ;;  %p1580_p2 = scmp.lt.u32.totalorder %s1601_s29, %s2309_s8 }
  0xd3   : > { %p1579_p4 = por %p1578_p8, %p1577_p3 }
  0xd4   : > { %p1575_p6 = pneg %p1574_p12 }
  0xd5   : > { %p1581_p0 = por %p1580_p2, %p1579_p4 }
  0xd7   : > { %p1582_p13 = pnand %p1581_p0, %p1575_p6 }
  0xd9   : > { %1585 = shalt.err (!%p1582_p13)
}
  0xda   : > { %s1586_s11 = scalar_lea.vmem %s2317_s18, 256  ;;  %s1854_s30 = smov [#allocation8]  }
  0xdb   : > { %p1587_p9 = scmp.ne.s32.totalorder %s2317_s18, %s1586_s11  ;;  %s1591_s4 = sshll.u32 %s1854_s30, 4  ;;  %s1592_s4 = int_to_ptr.vmem [resolvable:$false] %s1591_s4 }
  0xdc   : > { %s1593_s3 = scalar_lea.vmem %s1592_s4, 512  ;;  %p1594_p11 = scmp.lt.s32.totalorder %s2317_s18, %s1592_s4 }
  0xdd   : > { %p1589_p5 = pnand %p1587_p9, %p1573_p10  ;;  %p1595_p3 = scmp.lt.s32.totalorder %s1593_s3, %s1586_s11 }
  0xdf   : > { %p1590_p12 = pneg %p1589_p5  ;;  %p1596_p8 = por %p1595_p3, %p1594_p11 }
  0xe1   : > { %p1597_p4 = pnand %p1596_p8, %p1590_p12 }
  0xe3   : > { %1600 = shalt.err (!%p1597_p4)
}
  0xe4   : > { %s2714_s9 = sld [smem:[#allocation24_spill]]  ;;  %s2715_s29 = sld [smem:[#allocation23_spill]] }
  0xe5   : > { %s2716_s17 = sld [smem:[#allocation22_spill]]  ;;  %p2717_p11 = scmp.eq.s32.totalorder %s2007_s6, 0 }
  0xe6   : > { %1261 = dma.hbm_to_vmem [thread:$0]  (!%p2313_p1), %s2309_s8, 256, %s2317_s18, %s2059_s5, %s2703_s26, %s2703_s26, %s2702_s24  }
  0xe7   : > { %s1190_s21 = sshll.u32 %s1838_s14, 8  ;;  %p2718_p2 = scmp.eq.s32.totalorder %s1846_s16, 0 }
  0xe8   : > { %p2719_p13 = scmp.eq.s32.totalorder %s2090_s12, 0  ;;  %s2721_s3 = sld [smem:[#allocation48_spill]] }
  0xe9   : > { %p2722_p1 = scmp.lt.s32.totalorder %s1846_s16, 4 }
  0xea   : > { %s173_s27 = sadd.s32 1, %s2714_s9  ;;  %p180_p10 = scmp.ne.s32.totalorder %s2714_s9, %s2715_s29 }
  0xeb   : > { %s2351_s28 = scalar_select %p2717_p11, %s2714_s9, %s173_s27  }
  0xec   : > { %p186_p6 = scmp.ne.s32.totalorder %s2715_s29, %s2716_s17  ;;  %s363_s15 = sand.u32 1, %s2714_s9  }
  0xed   : > { %p182_p0 = por %p180_p10, %p2718_p2  ;;  %s1160_s11 = sshll.u32 %s363_s15, 4 }
  0xee   : > { %p2363_p9 = por %p186_p6, %p2719_p13  ;;  %s2370_s5 = scalar_lea.hbm %s2721_s3, %s1190_s21 }
  0xef   : > { %p2374_p5 = pnand %p2722_p1, %p182_p0  ;;  %s365_s8 = scalar_lea.vmem [#allocation11], %s1160_s11 }
  0xf0   : > { %s2720_s13 = scalar_select %p2363_p9, 1, 0 }
  0xf1   : > { %s372_s18 = sshll.u32 %s365_s8, 4  ;;  %s1602_s9 = scalar_lea.hbm %s2370_s5, 256  ;;  %s2378_s18 = int_to_ptr.vmem [resolvable:$true] %s372_s18 }
  0xf2   : > { %p1603_p12 = scmp.ne.s32.totalorder %s2370_s5, %s1602_s9  ;;  %p1604_p3 = pneg %p2374_p5 }
  0xf3   : > { %s1607_s27 = scalar_lea.hbm %s2721_s3, 512  ;;  %p1608_p11 = scmp.lt.u32.totalorder %s2370_s5, %s2721_s3 }
  0xf4   : > { %p1605_p8 = pnand %p1604_p3, %p1603_p12  ;;  %p1609_p10 = scmp.lt.u32.totalorder %s1607_s27, %s1602_s9 }
  0xf5   : > { %p1611_p2 = scmp.lt.u32.totalorder %s1602_s9, %s2370_s5 }
  0xf6   : > { %p1606_p4 = pneg %p1605_p8  ;;  %p1610_p6 = por %p1609_p10, %p1608_p11 }
  0xf8   : > { %p1612_p0 = por %p1611_p2, %p1610_p6 }
  0xfa   : > { %p1613_p13 = pnand %p1612_p0, %p1606_p4 }
  0xfc   : > { %1616 = shalt.err (!%p1613_p13)
}
  0xfd   : > { %s1617_s11 = scalar_lea.vmem %s2378_s18, 256  ;;  %s1855_s30 = smov [#allocation11]  }
  0xfe   : > { %p1618_p1 = scmp.ne.s32.totalorder %s2378_s18, %s1617_s11  ;;  %s1622_s4 = sshll.u32 %s1855_s30, 4  ;;  %s1623_s4 = int_to_ptr.vmem [resolvable:$false] %s1622_s4 }
  0xff   : > { %s1624_s8 = scalar_lea.vmem %s1623_s4, 512  ;;  %p1625_p9 = scmp.lt.s32.totalorder %s2378_s18, %s1623_s4 }
 0x100   : > { %p1620_p12 = pnand %p1618_p1, %p1604_p3  ;;  %p1626_p11 = scmp.lt.s32.totalorder %s1624_s8, %s1617_s11 }
 0x102   : > { %p1621_p8 = pneg %p1620_p12  ;;  %p1627_p10 = por %p1626_p11, %p1625_p9 }
 0x104   : > { %p1628_p6 = pnand %p1627_p10, %p1621_p8 }
 0x106   : > { %1631 = shalt.err (!%p1628_p6)
}
 0x107   : > { %1267 = dma.hbm_to_vmem [thread:$0]  (!%p2374_p5), %s2370_s5, 256, %s2378_s18, %s2158_s1, %s2703_s26, %s2703_s26, %s2702_s24  }
 0x108   : > { %p2724_p3 = scmp.ne.s32.totalorder %s2686_s22, 0 }
 0x109   : > { %s386_s9 = sand.u32 (!%p2724_p3), 1, %s1822_s10  }
 0x10a   : > { %384 = sbr.rel (%p2724_p3) target bundleno = 1969 (0x7b1), region = 44  ;;  %s2412_s29 = sshll.u32 (!%p2724_p3), %s386_s9, 4 }
 0x10b   : > { %s387_s17 = scalar_lea.sflag (!%p2724_p3), [#allocation4], %s386_s9  ;;  %s390_s27 = scalar_lea.vmem (!%p2724_p3), [#allocation3], %s2412_s29 }
 0x111   : > { %1741 = dma.done.wait (%p2236_p7), %s387_s17, 256  }
 0x112   : > { %1743 = vsyncadd (%p2236_p7), %s387_s17, 4294967040  ;;  %s395_s1 = sand.u32 1, %s2090_s12   ;;  %s397_s24 = sand.u32 1, %s1810_s7  }
 0x113   : > { %s2421_s22 = sshll.u32 %s397_s24, 4  ;;  %s396_s26 = scalar_lea.sflag [#allocation7], %s395_s1 }
 0x114   : > { %s399_s5 = scalar_lea.vmem [#allocation6], %s2421_s22  ;;  %p2725_p9 = scmp.ne.s32.totalorder %s2671_s23, 0 }
 0x116   : > { %1745 = dma.done.wait (%p2725_p9), %s396_s26, 256  }
 0x117   : > { %1747 = vsyncadd (%p2725_p9), %s396_s26, 4294967040  ;;  %s2726_s6 = sld [smem:[#allocation28_spill]]  ;;  %p2727_p7 = scmp.ne.s32.totalorder %s2711_s2, 0 }
 0x11d   : > { %s406_s18 = sand.u32 1, %s2726_s6  }
 0x11e   : > { %s2429_s19 = sshll.u32 %s406_s18, 4 }
 0x11f   : > { %s408_s15 = scalar_lea.vmem [#allocation8], %s2429_s19 }
 0x120   : > { %1749 = dma.done.wait (%p2727_p7), %s396_s26, 256  }
 0x121   : > { %1751 = vsyncadd (%p2727_p7), %s396_s26, 4294967040  ;;  %s2728_s21 = sld [smem:[#allocation40_spill]]  ;;  %s415_s11 = sand.u32 1, %s1786_s25  }
 0x122   : > { %s2439_s30 = sshll.u32 %s415_s11, 3  ;;  %s414_s23 = scalar_lea.sflag [#allocation10], %s395_s1 }
 0x123   : > { %s417_s4 = scalar_lea.vmem [#allocation9], %s2439_s30 }
 0x127   : > { %p2729_p5 = scmp.ne.s32.totalorder %s2728_s21, 0 }
 0x129   : > { %1753 = dma.done.wait (%p2729_p5), %s414_s23, 128  }
 0x12a   : > { %1755 = vsyncadd (%p2729_p5), %s414_s23, 4294967168  ;;  %s2730_s8 = sld [smem:[#allocation23_spill]]  ;;  %p2731_p4 = scmp.ne.s32.totalorder %s2720_s13, 0 }
 0x130   : > { %s424_s9 = sand.u32 1, %s2730_s8  }
 0x131   : > { %s2447_s2 = sshll.u32 %s424_s9, 4 }
 0x132   : > { %s426_s17 = scalar_lea.vmem [#allocation11], %s2447_s2 }
 0x133   : > { %1757 = dma.done.wait (%p2731_p4), %s414_s23, 256  }
 0x134   : > { %1759 = vsyncadd (%p2731_p4), %s414_s23, 4294967040  ;;  %p2732_p2 = scmp.eq.s32.totalorder %s2090_s12, 0 }
 0x136   : > { %1761 = dma.done.wait (%p2732_p2), [#allocation13], 16   ;;  %p2733_p0 = pmov %p2732_p2 }
 0x137   : > { %s478_s1 = scalar_lea.vmem [#allocation14], %s2439_s30  ;;  %s2734_s24 = sld [smem:[#allocation33_spill]] }
 0x138   : > { %1763 = vsyncadd (%p2733_p0), [#allocation13], 4294967280 }
 0x13d   : > { %p1171_p13 = scmp.ne.s32.totalorder %s2734_s24, 0 }
 0x13e   : > { %vm488_vm0 = vcmask (!%p1171_p13), 258048   ;;  %v1856_v0 = vmov (!%p1171_p13), 0.0  }
 0x13f   : > { %487 = sbr.rel (%p1171_p13) target bundleno = 326 (0x146), region = 72  ;;  %489 = vst.msk [vmem:[#allocation2] sm:$0x1f] (!%p1171_p13), %vm488_vm0, %v1856_v0 }
 0x146 PF: > { %v492_v1 = vld [vmem:[%s399_s5] sm:$0x1f]  ;;  %vm494_vm1 = vcmask 64512   ;;  %v1857_v2 = vmov 0.0   ;;  %vm1858_vm2 = vmmov 0   ;;  %vm571_vm3 = vcmask 36864  }
 0x147   : > { %1202 = vmatprep.subr.mxu0 %v1857_v2  ;;  %1204 = vmatprep.mubr.msk.f32.mxu0 %vm1858_vm2, %v1857_v2  ;;  %v490_v3 = vld [vmem:[%s390_s27] sm:$0x1f]  ;;  %vm587_vm4 = vcmask 1044480   ;;  %vm583_vm5 = vcmask 39936   ;;  %v1176_v16 = vld [vmem:[%s390_s27 + $0x8] sm:$0x1f] }
 0x148   : > { %1203 = vmatpush3.xpose.msk.msra.mxu0 %vm494_vm1, %v492_v1  ;;  %v491_v4 = vmul.f32 0.35355338, %v490_v3  ;;  %1207 = vmatprep.subr.mxu1 %v1857_v2  ;;  %v493_v13 = vld [vmem:[%s408_s15] sm:$0x1f]  ;;  %v1177_v18 = vld [vmem:[%s399_s5 + $0x8] sm:$0x1f] }
 0x149   : > { %1209 = vmatprep.mubr.msk.f32.mxu1 %vm1858_vm2, %v1857_v2  ;;  %1217 = vmatprep.subr.mxu0 %v1857_v2  ;;  %v663_v19 = vmul.f32 0.35355338, %v1176_v16  ;;  %v1178_v30 = vld [vmem:[%s408_s15 + $0x8] sm:$0x1f]  ;;  %v837_v34 = vld [vmem:[%s426_s17] sm:$0xff]  ;;  %v838_v35 = vld [vmem:[%s426_s17 + $0x8] sm:$0xff] }
 0x14a   : > { %1208 = vmatpush3.msk.msra.mxu1 %vm587_vm4, %v493_v13  ;;  %v1859_v36 = vmov 0.0|0.0   ;;  %v1230_v37 = vpack.c.bf16 %v838_v35, %v837_v34  ;;  %s1860_s12 = smov 8   ;;  %vm839_vm6 = vcmask 130048   ;;  %v836_v42 = vld [vmem:[#allocation2] sm:$0x1f]  ;;  %vm914_vm7 = vcmask 258048  }
 0x14b   : > { %1205 = vmatmul.mubr.msk.f32.vlgmr.msra.gmra.mrb[0].mxu0 %vm494_vm1, %v491_v4  ;;  %1212 = vmatprep.subr.mxu1 %v1857_v2  ;;  %s2735_s13 = sld [smem:[#allocation33_spill]] }
 0x14c   : > { %1219 = vmatprep.mubr.msk.f32.mxu0 %vm1858_vm2, %v1857_v2  ;;  %1218 = vmatpush3.msk.msra.mxu0 %vm587_vm4, %v1178_v30 }
 0x151   : > { %p1184_p1 = scmp.ne.s32.totalorder %s2735_s13, 1 }
 0x152   : > { %v920_v46 = vld [vmem:[%s417_s4] sm:$0x1f] (!%p1184_p1)  ;;  %v1185_v48 = vld [vmem:[#allocation12] ss:$0 sm:$0xff] (!%p1184_p1) }
 0x21e   : > { %v567_v5 = vpop.f32.mrb[0].mxu0 }
 0x21f   : > { %v1206_v6 = vpop.f32.mrb[1].mxu0  ;;  %v572_v7 = vsel %vm571_vm3, %v567_v5, -inf }
 0x220   : > { %573 = vmax.xlane.f32.xlu0 %v572_v7 }
 0x2ad   : > { %v574_v8 = vpop.xlane.xlu0 %573 }
 0x2ae   : > { %v575_v9 = vsub.f32 %v567_v5, %v574_v8 }
 0x2b0   : > { %v576_v10 = vmul.f32 1.442695, %v575_v9 }
 0x2b2   : > { %1444 = vpow2.f32 %v576_v10 }
 0x2bc   : > { %v1445_v11 = vpop.eup %1444 }
 0x2bd   : > { %v578_v12 = vsel %vm571_vm3, %v1445_v11, 0.0 }
 0x2be   : > { %579 = vadd.xlane.f32.xlu0 %v578_v12 }
 0x34b   : > { %v580_v14 = vpop.xlane.xlu0 %579 }
 0x34c   : > { %1446 = vrcp.f32 %v580_v14 }
 0x356   : > { %v1447_v15 = vpop.eup %1446 }
 0x357   : > { %v582_v17 = vmul.f32 %v1447_v15, %v1445_v11 }
 0x359   : > { %1210 = vmatmul.mubr.msk.f32.vlgmr.msra.gmra.mrb[0].mxu1 %vm583_vm5, %v582_v17 }
 0x35a   : > { %1213 = vmatpush3.xpose.msk.msra.mxu1 %vm494_vm1, %v1177_v18  ;;  %1214 = vmatprep.mubr.msk.f32.mxu1 %vm1858_vm2, %v1857_v2 }
 0x35b   : > { %1229 = vmatprep.subr.bf16.mxu1 %v1859_v36 }
 0x35d   : > { %1215 = vmatmul.mubr.msk.f32.vlgmr.msra.gmra.mrb[2].mxu1 %vm494_vm1, %v663_v19 }
 0x35e   : > { %1226 = vmatprep.mubr.msk.f32.mxu1 %vm1858_vm2, %v1857_v2  ;;  %1231 = vmatpush3.bf16.msra.mxu1 %v1230_v37 }
 0x42c   : > { %v657_v20 = vpop.f32.mrb[0].mxu1 }
 0x42d   : > { %v1211_v21 = vpop.f32.mrb[1].mxu1 }
 0x430   : > { %v740_v22 = vpop.f32.mrb[2].mxu1 }
 0x431   : > { %v1216_v23 = vpop.f32.mrb[3].mxu1  ;;  %v744_v24 = vsel %vm571_vm3, %v740_v22, -inf }
 0x432   : > { %745 = vmax.xlane.f32.xlu1 %v744_v24 }
 0x4bf   : > { %v746_v25 = vpop.xlane.xlu1 %745 }
 0x4c0   : > { %v747_v26 = vsub.f32 %v740_v22, %v746_v25 }
 0x4c2   : > { %v748_v27 = vmul.f32 1.442695, %v747_v26 }
 0x4c4   : > { %1448 = vpow2.f32 %v748_v27 }
 0x4ce   : > { %v1449_v28 = vpop.eup %1448 }
 0x4cf   : > { %v750_v29 = vsel %vm571_vm3, %v1449_v28, 0.0 }
 0x4d0   : > { %751 = vadd.xlane.f32.xlu1 %v750_v29 }
 0x55d   : > { %v752_v31 = vpop.xlane.xlu1 %751 }
 0x55e   : > { %1450 = vrcp.f32 %v752_v31 }
 0x568   : > { %v1451_v32 = vpop.eup %1450 }
 0x569   : > { %v754_v33 = vmul.f32 %v1451_v32, %v1449_v28 }
 0x56b   : > { %1220 = vmatmul.mubr.msk.f32.vlgmr.msra.gmra.mrb[2].mxu0 %vm583_vm5, %v754_v33 }
 0x63e   : > { %v827_v38 = vpop.f32.mrb[2].mxu0 }
 0x63f   : > { %832 = vrot.lane.b32.xlu0 %v827_v38, %s1860_s12  ;;  %v1221_v39 = vpop.f32.mrb[3].mxu0 }
 0x6b1   : > { %v833_v40 = vpop.permute.xlu0 %832 }
 0x6b2   : > { %v835_v41 = vsel %vm494_vm1, %v657_v20, %v833_v40 }
 0x6b3   : > { %1227 = vmatmul.mubr.msk.f32.vlgmr.msra.gmra.mrb[4].mxu1 %vm839_vm6, %v835_v41 }
 0x783   : > { %919 = sbr.rel (%p1184_p1) target bundleno = 1942 (0x796), region = 76 }
 0x786   : > { %v909_v43 = vpop.f32.mrb[4].mxu1 }
 0x787   : > { %v913_v44 = vadd.f32 %v909_v43, %v836_v42  ;;  %v1228_v45 = vpop.f32.mrb[5].mxu1 }
 0x789   : > { %915 = vst.msk [vmem:[#allocation2] sm:$0x1f] %vm914_vm7, %v913_v44 }
 0x790   : > { %v921_v47 = vld [vmem:[#allocation2] sm:$0x1f] }
 0x791   : > { %v922_v49 = vadd.f32 %v921_v47, %v920_v46 }
 0x793   : > { %v930_v50 = vadd.f32 %v1185_v48, %v922_v49 }
 0x795   : > { %931 = vst.msk [vmem:[%s478_s1] sm:$0x1f] %vm914_vm7, %v930_v50 }
 0x796 PF: > { %s2736_s29 = sld [smem:[#allocation34_spill]]  ;;  %s2737_s27 = sld [smem:[#allocation41_spill]] }
 0x797   : > { %s2738_s6 = sld [smem:[#allocation50_spill]]  ;;  %s947_s19 = sshll.u32 %s478_s1, 4  ;;  %s948_s19 = int_to_ptr.vmem [resolvable:$true] %s947_s19 }
 0x798   : > { %s933_s15 = scalar_lea.sflag [#allocation5], %s415_s11  ;;  %s1632_s21 = scalar_lea.vmem %s948_s19, 128 }
 0x799   : > { %p1633_p12 = scmp.ne.s32.totalorder %s948_s19, %s1632_s21  ;;  %s1861_s23 = smov [#allocation14]  }
 0x79a   : > { %s1636_s4 = sshll.u32 %s1861_s23, 4  ;;  %s1637_s4 = int_to_ptr.vmem [resolvable:$false] %s1636_s4 }
 0x79b   : > { %s1638_s8 = scalar_lea.vmem %s1637_s4, 256  ;;  %p1639_p6 = scmp.lt.s32.totalorder %s948_s19, %s1637_s4 }
 0x79c   : > { %s1187_s22 = sshll.u32 %s2736_s29, 7  ;;  %p2739_p8 = scmp.ne.s32.totalorder %s2737_s27, 0 }
 0x79d   : > { %s2503_s18 = scalar_lea.hbm %s2738_s6, %s1187_s22  ;;  %p1640_p3 = scmp.lt.s32.totalorder %s1638_s8, %s1632_s21 }
 0x79e   : > { %p1634_p11 = pnand %p1633_p12, %p2739_p8 }
 0x79f   : > { %p1641_p9 = por %p1640_p3, %p1639_p6 }
 0x7a0   : > { %p1635_p10 = pneg %p1634_p11 }
 0x7a2   : > { %p1642_p7 = pnand %p1641_p9, %p1635_p10 }
 0x7a4   : > { %1645 = shalt.err (!%p1642_p7)
}
 0x7a5   : > { %s1646_s11 = scalar_lea.hbm %s2503_s18, 128  ;;  %s1650_s2 = scalar_lea.hbm %s2738_s6, 256 }
 0x7a6   : > { %p1647_p5 = scmp.ne.s32.totalorder %s2503_s18, %s1646_s11  ;;  %p1651_p0 = scmp.lt.u32.totalorder %s2503_s18, %s2738_s6 }
 0x7a7   : > { %p1652_p13 = scmp.lt.u32.totalorder %s1650_s2, %s1646_s11  ;;  %p1654_p12 = scmp.lt.u32.totalorder %s1646_s11, %s2503_s18 }
 0x7a8   : > { %p1648_p4 = pnand %p1647_p5, %p2739_p8 }
 0x7a9   : > { %p1653_p1 = por %p1652_p13, %p1651_p0 }
 0x7aa   : > { %p1649_p2 = pneg %p1648_p4 }
 0x7ab   : > { %p1655_p11 = por %p1654_p12, %p1653_p1 }
 0x7ad   : > { %p1656_p10 = pnand %p1655_p11, %p1649_p2 }
 0x7af   : > { %1659 = shalt.err (!%p1656_p10)
}
 0x7b0   : > { %1246 = dma.vmem_to_hbm [thread:$0]  (%p2739_p8), %s948_s19, 128, %s2503_s18, %s933_s15  }
 0x7b1 PF: > { %s2740_s24 = sld [smem:[#allocation25_spill]]  ;;  %s2741_s12 = sld [smem:[#allocation42_spill]] }
 0x7b2   : > { %p1275_p6 = scmp.ge.s32.totalorder %s1846_s16, 2 }
 0x7b7   : > { %s959_s13 = sand.u32 1, %s2740_s24   ;;  %p2742_p3 = scmp.ne.s32.totalorder %s2741_s12, 0 }
 0x7b8   : > { %s960_s29 = scalar_lea.sflag [#allocation5], %s959_s13 }
 0x7b9   : > { %p1269_p9 = pnand %p1275_p6, %p2742_p3 }
 0x7bb   : > { %1765 = dma.done.wait (!%p1269_p9), %s960_s29, 128  }
 0x7bc   : > { %1767 = vsyncadd (!%p1269_p9), %s960_s29, 4294967168  ;;  %s29_s16 = sadd.s32 1, %s1846_s16   ;;  %s2745_s21 = sld [smem:[#allocation23_spill]] }
 0x7bd   : > { %p2531_p7 = scmp.ge.s32.totalorder %s29_s16, 6   ;;  %s2746_s22 = sld [smem:[#allocation24_spill]] }
 0x7be   : > { %s2747_s27 = sld [smem:[#allocation26_spill]]  ;;  %s2748_s5 = sld [smem:[#allocation39_spill]] }
 0x7bf   : > { %s2749_s18 = sld [smem:[#allocation28_spill]]  ;;  %s2750_s19 = sld [smem:[#allocation29_spill]] }
 0x7c0   : > { %s2751_s15 = sld [smem:[#allocation30_spill]]  ;;  %s2752_s8 = sld [smem:[#allocation38_spill]] }
 0x7c1   : > { %s2753_s4 = sld [smem:[#allocation32_spill]]  ;;  %s2754_s11 = sld [smem:[#allocation43_spill]] }
 0x7c2   : > { %s2755_s13 = sld [smem:[#allocation35_spill]]  ;;  %s2756_s2 = sld [smem:[#allocation36_spill]] }
 0x7c3   : > { %s2757_s23 = smov %s2351_s28  ;;  %s2758_s17 = sld [smem:[#allocation37_spill]] }
 0x7c4   : > { %s2759_s24 = smov %s1786_s25  ;;  %s2760_s25 = smov %s2747_s27 }
 0x7c5   : > { %s2762_s26 = smov %s2748_s5  ;;  %s2763_s27 = smov %s2749_s18 }
 0x7c6   : > { %s2764_s28 = smov %s2750_s19  ;;  %s2765_s29 = smov %s2290_s20 }
 0x7c7   : > { %s2766_s30 = smov %s1810_s7  ;;  %s2767_s7 = smov %s2751_s15 }
 0x7c8   : > { %s2768_s9 = smov %s1822_s10  ;;  %s2769_s10 = smov %s2753_s4 }
 0x7c9   : > { %s2770_s12 = smov %s1838_s14  ;;  %s2771_s14 = smov %s2756_s2 }
 0x7ca   : > { %s2772_s15 = smov %s2758_s17  ;;  %28 = sbr.rel (!%p2531_p7) target bundleno = 26 (0x1a), region = 152 }
 0x7d1   :  { %965 = vsyncpa [#allocation4], 1 }
 0x7d2   :  { %967 = vsyncpa [#allocation4 + $0x1], 1 }
 0x7d3   :  { %968 = vsyncpa [#allocation7], 1 }
 0x7d4   :  { %970 = vsyncpa [#allocation7 + $0x1], 1 }
 0x7d5   :  { %971 = vsyncpa [#allocation10], 1 }
 0x7d6   :  { %973 = vsyncpa [#allocation10 + $0x1], 1 }
 0x7d7   :  { %974 = vsyncpa [#allocation13], 1 }
 0x7d8   :  { %975 = vsyncpa [#allocation5], 1 }
 0x7d9   :  { %977 = vsyncpa [#allocation5 + $0x1], 1 }

// kernel: clip_surgery_vision_forward.31
= control target key start
LH: loop header
LB: loop body
LE: loop exit
PB: predicated region body
PF: predicated region fallthrough
CT: control target
= control target key end

     0   :  { %12 = vsyncpa [#allocation4], 0  ;;  %s922_s0 = inlined_call_operand.hbm [shape: f32[10,32], index: 0, kind: input, shape index: {}]   ;;  %s923_s1 = inlined_call_operand.hbm [shape: f32[1,32], index: 1, kind: input, shape index: {}]   ;;  %s924_s2 = inlined_call_operand.hbm [shape: f32[1,32], index: 2, kind: input, shape index: {}]   ;;  %s925_s3 = inlined_call_operand.hbm [shape: f32[32,128], index: 3, kind: input, shape index: {}]   ;;  %s926_s4 = inlined_call_operand.hbm [shape: f32[1,128], index: 4, kind: input, shape index: {}]   ;;  %s927_s5 = inlined_call_operand.hbm [shape: f32[128,32], index: 5, kind: input, shape index: {}]   ;;  %s928_s6 = inlined_call_operand.hbm [shape: f32[1,32], index: 6, kind: input, shape index: {}]   ;;  %s929_s7 = inlined_call_operand.hbm [shape: f32[10,32], index: 7, kind: output, shape index: {}]  }
   0x1   :  { %13 = vsyncpa [#allocation7], 0 }
   0x2   :  { %14 = vsyncpa [#allocation10], 0 }
   0x3   :  { %15 = vsyncpa [#allocation13], 0 }
   0x4   :  { %16 = vsyncpa [#allocation5], 0  ;;  %s741_s24 = smov [#allocation6]   ;;  %s555_s28 = scalar_lea.hbm %s923_s1, 16 }
   0x5   :  { %s35_s25 = sshll.u32 %s741_s24, 4  ;;  %p556_p0 = scmp.ne.s32.totalorder %s923_s1, %s555_s28  ;;  %s36_s25 = int_to_ptr.vmem [resolvable:$true] %s35_s25 }
   0x6   :  { %p559_p1 = scmp.lt.u32.totalorder %s555_s28, %s923_s1 }
   0x8   :  { %p561_p2 = pnand %p559_p1, %p556_p0 }
   0xa   :  { %564 = shalt.err (!%p561_p2)
}
   0xb   :  { %s565_s10 = scalar_lea.vmem %s36_s25, 16  ;;  %s569_s11 = scalar_lea.vmem %s36_s25, 32 }
   0xc   :  { %p566_p3 = scmp.ne.s32.totalorder %s36_s25, %s565_s10  ;;  %p570_p4 = scmp.lt.s32.totalorder %s36_s25, %s36_s25 }
   0xd   :  { %p571_p5 = scmp.lt.s32.totalorder %s569_s11, %s565_s10 }
   0xf   :  { %p572_p6 = por %p571_p5, %p570_p4 }
  0x11   :  { %p573_p7 = pnand %p572_p6, %p566_p3 }
  0x13   :  { %576 = shalt.err (!%p573_p7)
}
  0x14   :  { %38 = dma.hbm_to_vmem [thread:$0]  %s923_s1, 16, %s36_s25, [#allocation7]  }
  0x15   :  { %s742_s14 = smov [#allocation9]   ;;  %s743_s16 = smov [#allocation12]  }
  0x16   :  { %s54_s15 = sshll.u32 %s742_s14, 4  ;;  %s76_s17 = sshll.u32 %s743_s16, 4  ;;  %s55_s15 = int_to_ptr.vmem [resolvable:$true] %s54_s15  ;;  %s77_s17 = int_to_ptr.vmem [resolvable:$true] %s76_s17 }
  0x17   :  { %s577_s20 = scalar_lea.hbm %s925_s3, 512 }
  0x18   :  { %p578_p8 = scmp.ne.s32.totalorder %s925_s3, %s577_s20  ;;  %p581_p9 = scmp.lt.u32.totalorder %s577_s20, %s925_s3 }
  0x1a   :  { %p583_p10 = pnand %p581_p9, %p578_p8 }
  0x1c   :  { %586 = shalt.err (!%p583_p10)
}
  0x1d   :  { %s587_s1 = scalar_lea.vmem %s55_s15, 512  ;;  %p592_p12 = scmp.lt.s32.totalorder %s55_s15, %s55_s15 }
  0x1e   :  { %p588_p11 = scmp.ne.s32.totalorder %s55_s15, %s587_s1  ;;  %p593_p13 = scmp.lt.s32.totalorder %s587_s1, %s587_s1 }
  0x20   :  { %p594_p0 = por %p593_p13, %p592_p12 }
  0x22   :  { %p595_p1 = pnand %p594_p0, %p588_p11 }
  0x24   :  { %598 = shalt.err (!%p595_p1)
}
  0x25   :  { %s744_s25 = smov 128   ;;  %s745_s26 = smov 8  }
  0x26   :  { %60 = dma.hbm_to_vmem [thread:$0]  %s925_s3, 512, %s55_s15, [#allocation10], %s744_s25, %s744_s25, %s745_s26  }
  0x27   :  { %s599_s8 = scalar_lea.hbm %s927_s5, 2048 }
  0x28   :  { %p600_p2 = scmp.ne.s32.totalorder %s927_s5, %s599_s8  ;;  %p603_p3 = scmp.lt.u32.totalorder %s599_s8, %s927_s5 }
  0x2a   :  { %p605_p4 = pnand %p603_p3, %p600_p2 }
  0x2c   :  { %608 = shalt.err (!%p605_p4)
}
  0x2d   :  { %s609_s13 = scalar_lea.vmem %s77_s17, 2048  ;;  %p614_p6 = scmp.lt.s32.totalorder %s77_s17, %s77_s17 }
  0x2e   :  { %p610_p5 = scmp.ne.s32.totalorder %s77_s17, %s609_s13  ;;  %p615_p7 = scmp.lt.s32.totalorder %s609_s13, %s609_s13 }
  0x30   :  { %p616_p8 = por %p615_p7, %p614_p6 }
  0x32   :  { %p617_p9 = pnand %p616_p8, %p610_p5 }
  0x34   :  { %620 = shalt.err (!%p617_p9)
}
  0x35   :  { %82 = dma.hbm_to_vmem [thread:$0]  %s927_s5, 2048, %s77_s17, [#allocation13], %s744_s25, %s744_s25, %s745_s26  }
  0x36   :  { %s746_s15 = smov [#allocation3]   ;;  %s747_s18 = smov [#allocation8]  }
  0x37   :  { %s22_s16 = sshll.u32 %s746_s15, 4  ;;  %s45_s19 = sshll.u32 %s747_s18, 4  ;;  %s23_s16 = int_to_ptr.vmem [resolvable:$true] %s22_s16  ;;  %s46_s19 = int_to_ptr.vmem [resolvable:$true] %s45_s19 }
  0x38   :  { %s621_s22 = scalar_lea.hbm %s922_s0, 256 }
  0x39   :  { %p622_p10 = scmp.ne.s32.totalorder %s922_s0, %s621_s22  ;;  %p625_p11 = scmp.lt.u32.totalorder %s621_s22, %s922_s0 }
  0x3b   :  { %p627_p12 = pnand %p625_p11, %p622_p10 }
  0x3d   :  { %630 = shalt.err (!%p627_p12)
}
  0x3e   :  { %s631_s5 = scalar_lea.vmem %s23_s16, 256  ;;  %p636_p0 = scmp.lt.s32.totalorder %s23_s16, %s23_s16 }
  0x3f   :  { %p632_p13 = scmp.ne.s32.totalorder %s23_s16, %s631_s5  ;;  %p637_p1 = scmp.lt.s32.totalorder %s631_s5, %s631_s5 }
  0x41   :  { %p638_p2 = por %p637_p1, %p636_p0 }
  0x43   :  { %p639_p3 = pnand %p638_p2, %p632_p13 }
  0x45   :  { %642 = shalt.err (!%p639_p3)
}
  0x46   :  { %28 = dma.hbm_to_vmem [thread:$0]  %s922_s0, 256, %s23_s16, [#allocation4], %s744_s25, %s744_s25, %s745_s26  }
  0x47   :  { %s643_s8 = scalar_lea.hbm %s924_s2, 16 }
  0x48   :  { %p644_p4 = scmp.ne.s32.totalorder %s924_s2, %s643_s8  ;;  %p647_p5 = scmp.lt.u32.totalorder %s643_s8, %s924_s2 }
  0x4a   :  { %p649_p6 = pnand %p647_p5, %p644_p4 }
  0x4c   :  { %652 = shalt.err (!%p649_p6)
}
  0x4d   :  { %s653_s13 = scalar_lea.vmem %s46_s19, 16  ;;  %s657_s3 = scalar_lea.vmem %s46_s19, 32 }
  0x4e   :  { %p654_p7 = scmp.ne.s32.totalorder %s46_s19, %s653_s13  ;;  %p658_p8 = scmp.lt.s32.totalorder %s46_s19, %s46_s19 }
  0x4f   :  { %p659_p9 = scmp.lt.s32.totalorder %s657_s3, %s653_s13 }
  0x51   :  { %p660_p10 = por %p659_p9, %p658_p8 }
  0x53   :  { %p661_p11 = pnand %p660_p10, %p654_p7 }
  0x55   :  { %664 = shalt.err (!%p661_p11)
}
  0x56   :  { %48 = dma.hbm_to_vmem [thread:$0]  %s924_s2, 16, %s46_s19, [#allocation7]  }
  0x57   :  { %s748_s15 = smov [#allocation11]   ;;  %s749_s18 = smov [#allocation14]  }
  0x58   :  { %s67_s16 = sshll.u32 %s748_s15, 4  ;;  %s89_s20 = sshll.u32 %s749_s18, 4  ;;  %s68_s16 = int_to_ptr.vmem [resolvable:$true] %s67_s16  ;;  %s90_s20 = int_to_ptr.vmem [resolvable:$true] %s89_s20 }
  0x59   :  { %s665_s23 = scalar_lea.hbm %s926_s4, 16 }
  0x5a   :  { %p666_p12 = scmp.ne.s32.totalorder %s926_s4, %s665_s23  ;;  %p669_p13 = scmp.lt.u32.totalorder %s665_s23, %s926_s4 }
  0x5c   :  { %p671_p0 = pnand %p669_p13, %p666_p12 }
  0x5e   :  { %674 = shalt.err (!%p671_p0)
}
  0x5f   :  { %s675_s2 = scalar_lea.vmem %s68_s16, 16  ;;  %s679_s19 = scalar_lea.vmem %s68_s16, 32 }
  0x60   :  { %p676_p1 = scmp.ne.s32.totalorder %s68_s16, %s675_s2  ;;  %p680_p2 = scmp.lt.s32.totalorder %s68_s16, %s68_s16 }
  0x61   :  { %p681_p3 = scmp.lt.s32.totalorder %s679_s19, %s675_s2 }
  0x63   :  { %p682_p4 = por %p681_p3, %p680_p2 }
  0x65   :  { %p683_p5 = pnand %p682_p4, %p676_p1 }
  0x67   :  { %686 = shalt.err (!%p683_p5)
}
  0x68   :  { %70 = dma.hbm_to_vmem [thread:$0]  %s926_s4, 16, %s68_s16, [#allocation10]  }
  0x69   :  { %s687_s8 = scalar_lea.hbm %s928_s6, 16 }
  0x6a   :  { %p688_p6 = scmp.ne.s32.totalorder %s928_s6, %s687_s8  ;;  %p691_p7 = scmp.lt.u32.totalorder %s687_s8, %s928_s6 }
  0x6c   :  { %p693_p8 = pnand %p691_p7, %p688_p6 }
  0x6e   :  { %696 = shalt.err (!%p693_p8)
}
  0x6f   :  { %s697_s13 = scalar_lea.vmem %s90_s20, 16  ;;  %s701_s3 = scalar_lea.vmem %s90_s20, 32 }
  0x70   :  { %p698_p9 = scmp.ne.s32.totalorder %s90_s20, %s697_s13  ;;  %p702_p10 = scmp.lt.s32.totalorder %s90_s20, %s90_s20 }
  0x71   :  { %p703_p11 = scmp.lt.s32.totalorder %s701_s3, %s697_s13 }
  0x73   :  { %p704_p12 = por %p703_p11, %p702_p10 }
  0x75   :  { %p705_p13 = pnand %p704_p12, %p698_p9 }
  0x77   :  { %708 = shalt.err (!%p705_p13)
}
  0x78   :  { %92 = dma.hbm_to_vmem [thread:$0]  %s928_s6, 16, %s90_s20, [#allocation13]  }
  0x79   :  { %731 = dma.done.wait [#allocation4], 256  }
  0x7a   :  { %732 = vsyncadd [#allocation4], 4294967040 }
  0x7b   :  { %733 = dma.done.wait [#allocation7], 32  }
  0x7c   :  { %734 = vsyncadd [#allocation7], 4294967264 }
  0x7d   :  { %735 = dma.done.wait [#allocation10], 528  }
  0x7e   :  { %736 = vsyncadd [#allocation10], 4294966768 }
  0x7f   :  { %737 = dma.done.wait [#allocation13], 2064  }
  0x80   :  { %738 = vsyncadd [#allocation13], 4294965232  ;;  %vm118_vm0 = vcmask 261120   ;;  %vm120_vm1 = vcmask 254976   ;;  %v750_v0 = vmov 0.0   ;;  %v887_v1 = vld [vmem:[#allocation3] sm:$0xff] }
  0x81   :  { %121 = vst.msk [vmem:[#allocation2 + $0x8] sm:$0x3] %vm120_vm1, %v750_v0  ;;  %v889_v2 = vld [vmem:[#allocation3 + $0x8] sm:$0x3]  ;;  %v127_v3 = vsel %vm118_vm0, %v887_v1, 0.0  ;;  %v171_v15 = vld [vmem:[#allocation9] sm:$0xff] }
  0x82   :  { %119 = vst.msk [vmem:[#allocation2] sm:$0xff] %vm118_vm0, %v750_v0  ;;  %128 = vadd.xlane.f32.xlu0 %v127_v3  ;;  %v131_v4 = vsel %vm120_vm1, %v889_v2, 0.0  ;;  %v172_v16 = vld [vmem:[#allocation9 + $0x8] sm:$0xff]  ;;  %v173_v17 = vld [vmem:[#allocation9 + $0x10] sm:$0xff]  ;;  %v174_v19 = vld [vmem:[#allocation9 + $0x18] sm:$0xff]  ;;  %s751_s6 = smov [#allocation15]  }
  0x83   :  { %v492_v18 = vpack.c.bf16 %v172_v16, %v171_v15  ;;  %v496_v20 = vpack.c.bf16 %v174_v19, %v173_v17  ;;  %v414_v28 = vld [vmem:[#allocation6] ss:$0 sm:$0xff]  ;;  %v415_v30 = vld [vmem:[#allocation8] ss:$0 sm:$0xff]  ;;  %v281_v37 = vld [vmem:[#allocation12] sm:$0xff]  ;;  %s399_s14 = sshll.u32 %s751_s6, 4  ;;  %s400_s14 = int_to_ptr.vmem [resolvable:$true] %s399_s14 }
  0x84   :  { %v282_v38 = vld [vmem:[#allocation12 + $0x8] sm:$0xff]  ;;  %v283_v40 = vld [vmem:[#allocation12 + $0x10] sm:$0xff]  ;;  %v284_v41 = vld [vmem:[#allocation12 + $0x18] sm:$0xff]  ;;  %s709_s15 = scalar_lea.vmem %s400_s14, 256  ;;  %p714_p1 = scmp.lt.s32.totalorder %s400_s14, %s400_s14 }
  0x85   :  { %493 = vmatprep.subr.bf16.mxu0 %v492_v18  ;;  %v500_v39 = vpack.c.bf16 %v282_v38, %v281_v37  ;;  %v504_v42 = vpack.c.bf16 %v284_v41, %v283_v40  ;;  %v285_v43 = vld [vmem:[#allocation12 + $0x20] sm:$0xff]  ;;  %v286_v44 = vld [vmem:[#allocation12 + $0x28] sm:$0xff]  ;;  %v287_v46 = vld [vmem:[#allocation12 + $0x30] sm:$0xff]  ;;  %p710_p0 = scmp.ne.s32.totalorder %s400_s14, %s709_s15  ;;  %p715_p2 = scmp.lt.s32.totalorder %s709_s15, %s709_s15 }
  0x86   :  { %132 = vadd.xlane.f32.xlu0 %v131_v4  ;;  %495 = vmatpush3.bf16.msra.mxu0 %v492_v18  ;;  %v508_v45 = vpack.c.bf16 %v286_v44, %v285_v43  ;;  %v288_v47 = vld [vmem:[#allocation12 + $0x38] sm:$0xff]  ;;  %v289_v49 = vld [vmem:[#allocation12 + $0x40] sm:$0xff]  ;;  %v290_v50 = vld [vmem:[#allocation12 + $0x48] sm:$0xff] }
  0x87   :  { %497 = vmatprep.subr.bf16.mxu0 %v496_v20  ;;  %501 = vmatprep.subr.bf16.mxu1 %v500_v39  ;;  %v512_v48 = vpack.c.bf16 %v288_v47, %v287_v46  ;;  %v516_v51 = vpack.c.bf16 %v290_v50, %v289_v49  ;;  %v291_v52 = vld [vmem:[#allocation12 + $0x50] sm:$0xff]  ;;  %v292_v53 = vld [vmem:[#allocation12 + $0x58] sm:$0xff]  ;;  %v293_v55 = vld [vmem:[#allocation12 + $0x60] sm:$0xff]  ;;  %p716_p3 = por %p715_p2, %p714_p1 }
  0x88   :  { %503 = vmatpush3.bf16.msra.mxu1 %v500_v39  ;;  %v520_v54 = vpack.c.bf16 %v292_v53, %v291_v52  ;;  %v294_v56 = vld [vmem:[#allocation12 + $0x68] sm:$0xff]  ;;  %v295_v58 = vld [vmem:[#allocation12 + $0x70] sm:$0xff]  ;;  %v296_v59 = vld [vmem:[#allocation12 + $0x78] sm:$0xff] }
  0x89   :  { %505 = vmatprep.subr.bf16.mxu1 %v504_v42  ;;  %v524_v57 = vpack.c.bf16 %v294_v56, %v293_v55  ;;  %v528_v60 = vpack.c.bf16 %v296_v59, %v295_v58  ;;  %v416_v61 = vld [vmem:[#allocation11] ss:$0 sm:$0xff]  ;;  %v280_v16 = vld [vmem:[#allocation2 + $0x8] sm:$0x3]  ;;  %p717_p4 = pnand %p716_p3, %p710_p0 }
  0x8a   :  { %499 = vmatpush3.bf16.msra.mxu0 %v496_v20  ;;  %v279_v17 = vld [vmem:[#allocation2] sm:$0xff] }
  0x8c   :  { %507 = vmatpush3.bf16.msra.mxu1 %v504_v42 }
  0x8d   :  { %509 = vmatprep.subr.bf16.mxu1 %v508_v45 }
  0x90   :  { %511 = vmatpush3.bf16.msra.mxu1 %v508_v45 }
  0x91   :  { %513 = vmatprep.subr.bf16.mxu1 %v512_v48 }
  0x94   :  { %515 = vmatpush3.bf16.msra.mxu1 %v512_v48 }
  0x95   :  { %517 = vmatprep.subr.bf16.mxu1 %v516_v51 }
  0x98   :  { %519 = vmatpush3.bf16.msra.mxu1 %v516_v51 }
  0x99   :  { %521 = vmatprep.subr.bf16.mxu1 %v520_v54 }
  0x9c   :  { %523 = vmatpush3.bf16.msra.mxu1 %v520_v54 }
  0x9d   :  { %525 = vmatprep.subr.bf16.mxu1 %v524_v57 }
  0xa0   :  { %527 = vmatpush3.bf16.msra.mxu1 %v524_v57 }
  0xa1   :  { %529 = vmatprep.subr.bf16.mxu1 %v528_v60 }
  0xa4   :  { %531 = vmatpush3.bf16.msra.mxu1 %v528_v60 }
 0x10f   :  { %v129_v5 = vpop.xlane.xlu0 %128 }
 0x110   :  { %v135_v6 = vmul.f32 0.03125, %v129_v5 }
 0x112   :  { %v137_v7 = vsub.f32 %v887_v1, %v135_v6 }
 0x113   :  { %v133_v8 = vpop.xlane.xlu0 %132 }
 0x114   :  { %v136_v9 = vmul.f32 0.03125, %v133_v8  ;;  %v139_v10 = vmul.f32 %v137_v7, %v137_v7 }
 0x116   :  { %v138_v11 = vsub.f32 %v889_v2, %v136_v9  ;;  %v141_v12 = vsel %vm118_vm0, %v139_v10, 0.0 }
 0x117   :  { %142 = vadd.xlane.f32.xlu1 %v141_v12 }
 0x118   :  { %v140_v13 = vmul.f32 %v138_v11, %v138_v11 }
 0x11a   :  { %v144_v14 = vsel %vm120_vm1, %v140_v13, 0.0 }
 0x11b   :  { %145 = vadd.xlane.f32.xlu1 %v144_v14 }
 0x1a4   :  { %v143_v21 = vpop.xlane.xlu1 %142 }
 0x1a5   :  { %v147_v22 = vmul.f32 0.03125, %v143_v21 }
 0x1a7   :  { %v149_v23 = vadd.f32 1e-05, %v147_v22 }
 0x1a8   :  { %v146_v24 = vpop.xlane.xlu1 %145 }
 0x1a9   :  { %543 = vrsqrt.f32 %v149_v23  ;;  %v148_v25 = vmul.f32 0.03125, %v146_v24  ;;  %v421_v23 = vld [vmem:[#allocation14] ss:$0 sm:$0xff] }
 0x1ab   :  { %v150_v26 = vadd.f32 1e-05, %v148_v25 }
 0x1ad   :  { %545 = vrsqrt.f32 %v150_v26 }
 0x1b3   :  { %v544_v27 = vpop.eup %543 }
 0x1b4   :  { %v153_v29 = vmul.f32 %v544_v27, %v137_v7 }
 0x1b6   :  { %v161_v31 = vmul.f32 %v414_v28, %v153_v29 }
 0x1b7   :  { %v546_v32 = vpop.eup %545 }
 0x1b8   :  { %v154_v33 = vmul.f32 %v546_v32, %v138_v11  ;;  %v169_v34 = vadd.f32 %v415_v30, %v161_v31 }
 0x1ba   :  { %v162_v35 = vmul.f32 %v414_v28, %v154_v33  ;;  %454 = vmatprep.mubr.msk.f32.mxu0 %vm118_vm0, %v169_v34 }
 0x1bc   :  { %v170_v36 = vadd.f32 %v415_v30, %v162_v35 }
 0x1be   :  { %455 = vmatmul.mubr.msk.f32.vlgmr.msra.gmra.mrb[0].mxu0 %vm118_vm0, %v170_v36 }
 0x291   :  { %v456_v62 = vpop.f32.mrb[0].mxu0 }
 0x292   :  { %v260_v63 = vadd.f32 %v456_v62, %v416_v61  ;;  %v254_v0 = vpop.f32.mrb[1].mxu0 }
 0x293   :  { %v255_v3 = vadd.f32 %v416_v61, %v254_v0 }
 0x294   :  { %v420_v4 = vmul.f32 -1.702, %v260_v63 }
 0x295   :  { %v419_v5 = vmul.f32 -1.702, %v255_v3 }
 0x296   :  { %v269_v6 = vmul.f32 1.442695, %v420_v4 }
 0x297   :  { %v267_v7 = vmul.f32 1.442695, %v419_v5 }
 0x298   :  { %547 = vpow2.f32 %v269_v6 }
 0x299   :  { %549 = vpow2.f32 %v267_v7 }
 0x2a2   :  { %v548_v8 = vpop.eup %547 }
 0x2a3   :  { %v550_v9 = vpop.eup %549  ;;  %v272_v10 = vadd.f32 1.0, %v548_v8 }
 0x2a4   :  { %v271_v11 = vadd.f32 1.0, %v550_v9 }
 0x2a5   :  { %551 = vrcp.f32 %v272_v10 }
 0x2a6   :  { %553 = vrcp.f32 %v271_v11 }
 0x2af   :  { %v552_v12 = vpop.eup %551 }
 0x2b0   :  { %v554_v13 = vpop.eup %553  ;;  %v278_v15 = vmul.f32 %v552_v12, %v260_v63 }
 0x2b1   :  { %v277_v14 = vmul.f32 %v554_v13, %v255_v3 }
 0x2b3   :  { %489 = vmatprep.mubr.f32.mxu1 %v277_v14 }
 0x2b4   :  { %490 = vmatmul.mubr.f32.vlgmr.msra.gmra.mrb[0].mxu1 %v278_v15 }
 0x387   :  { %v491_v18 = vpop.f32.mrb[0].mxu1 }
 0x388   :  { %v373_v19 = vadd.f32 %v491_v18, %v280_v16  ;;  %v363_v20 = vpop.f32.mrb[1].mxu1 }
 0x389   :  { %v372_v21 = vadd.f32 %v363_v20, %v279_v17 }
 0x38a   :  { %375 = vst.msk [vmem:[#allocation2 + $0x8] sm:$0x3] %vm120_vm1, %v373_v19 }
 0x38b   :  { %374 = vst.msk [vmem:[#allocation2] sm:$0xff] %vm118_vm0, %v372_v21 }
 0x391   :  { %v380_v22 = vld [vmem:[#allocation2 + $0x8] sm:$0x3] }
 0x392   :  { %v379_v24 = vld [vmem:[#allocation2] sm:$0xff]  ;;  %v382_v25 = vadd.f32 %v380_v22, %v889_v2 }
 0x393   :  { %v381_v26 = vadd.f32 %v379_v24, %v887_v1 }
 0x394   :  { %v391_v27 = vadd.f32 %v421_v23, %v382_v25 }
 0x395   :  { %v390_v28 = vadd.f32 %v421_v23, %v381_v26 }
 0x396   :  { %393 = vst.msk [vmem:[#allocation15 + $0x8] sm:$0x3] %vm120_vm1, %v391_v27 }
 0x397   :  { %392 = vst.msk [vmem:[#allocation15] sm:$0xff] %vm118_vm0, %v390_v28 }
 0x398   :  { %720 = shalt.err (!%p717_p4)
}
 0x399   :  { %s721_s20 = scalar_lea.hbm %s929_s7, 256 }
 0x39a   :  { %p722_p5 = scmp.ne.s32.totalorder %s929_s7, %s721_s20  ;;  %p725_p6 = scmp.lt.u32.totalorder %s721_s20, %s929_s7 }
 0x39c   :  { %p727_p7 = pnand %p725_p6, %p722_p5 }
 0x39e   :  { %730 = shalt.err (!%p727_p7)
}
 0x39f   :  { %405 = dma.vmem_to_hbm [thread:$0]  %s400_s14, 256, %s929_s7, [#allocation5], %s744_s25, %s744_s25, %s745_s26  }
 0x3a0   :  { %739 = dma.done.wait [#allocation5], 256  }
 0x3a1   :  { %740 = vsyncadd [#allocation5], 4294967040 }
 0x3a2   :  { %409 = vsyncpa [#allocation4], 1 }
 0x3a3   :  { %410 = vsyncpa [#allocation7], 1 }
 0x3a4   :  { %411 = vsyncpa [#allocation10], 1 }
 0x3a5   :  { %412 = vsyncpa [#allocation13], 1 }
 0x3a6   :  { %413 = vsyncpa [#allocation5], 1 }

// kernel: clip_surgery_vision_forward.36
= control target key start
LH: loop header
LB: loop body
LE: loop exit
PB: predicated region body
PF: predicated region fallthrough
CT: control target
= control target key end

     0   :  { %s3641_s0 = inlined_call_operand.hbm [shape: f32[6,4,5,8], index: 0, kind: input, shape index: {}, may-alias: {0,1,2,3}]   ;;  %s3642_s1 = inlined_call_operand.hbm [shape: f32[6,4,5,8], index: 1, kind: input, shape index: {}, may-alias: {0,1,2,3}]   ;;  %s3643_s2 = inlined_call_operand.hbm [shape: f32[6,4,5,8], index: 2, kind: input, shape index: {}, may-alias: {0,1,2,3}]   ;;  %s3644_s3 = inlined_call_operand.hbm [shape: f32[6,4,5,8], index: 3, kind: input, shape index: {}, may-alias: {0,1,2,3}]   ;;  %s3645_s4 = inlined_call_operand.hbm [shape: f32[2,5,32], index: 4, kind: input, shape index: {}, may-alias: {4,5}]   ;;  %s3646_s5 = inlined_call_operand.hbm [shape: f32[2,5,32], index: 5, kind: input, shape index: {}, may-alias: {4,5}]   ;;  %s3647_s6 = inlined_call_operand.hbm [shape: f32[2,16,32], index: 6, kind: input, shape index: {}]   ;;  %s3648_s7 = inlined_call_operand.hbm [shape: f32[1,32], index: 7, kind: input, shape index: {}]   ;;  %s3649_s8 = inlined_call_operand.hbm [shape: f32[2,5,32], index: 8, kind: output, shape index: {0}]   ;;  %s3650_s9 = inlined_call_operand.hbm [shape: f32[2,5,32], index: 9, kind: output, shape index: {1}]  }
   0x1   :  { %3703 = sst [smem:[#allocation56_spill]] %s3641_s0 }
   0x2   :  { %3704 = sst [smem:[#allocation57_spill]] %s3642_s1 }
   0x3   :  { %3705 = sst [smem:[#allocation58_spill]] %s3643_s2 }
   0x4   :  { %3706 = sst [smem:[#allocation59_spill]] %s3644_s3 }
   0x5   :  { %3707 = sst [smem:[#allocation60_spill]] %s3645_s4 }
   0x6   :  { %3708 = sst [smem:[#allocation61_spill]] %s3646_s5 }
   0x7   :  { %3709 = sst [smem:[#allocation62_spill]] %s3647_s6 }
   0x8   :  { %3710 = sst [smem:[#allocation63_spill]] %s3648_s7 }
   0x9   :  { %3711 = sst [smem:[#allocation64_spill]] %s3649_s8 }
   0xa   :  { %3712 = sst [smem:[#allocation65_spill]] %s3650_s9 }
   0xb   :  { %15 = vsyncpa [#allocation5], 0 }
   0xc   :  { %17 = vsyncpa [#allocation5 + $0x1], 0 }
   0xd   :  { %18 = vsyncpa [#allocation8], 0 }
   0xe   :  { %20 = vsyncpa [#allocation8 + $0x1], 0 }
   0xf   :  { %21 = vsyncpa [#allocation11], 0 }
  0x10   :  { %23 = vsyncpa [#allocation11 + $0x1], 0 }
  0x11   :  { %24 = vsyncpa [#allocation14], 0 }
  0x12   :  { %26 = vsyncpa [#allocation14 + $0x1], 0 }
  0x13   :  { %27 = vsyncpa [#allocation17], 0 }
  0x14   :  { %28 = vsyncpa [#allocation6], 0 }
  0x15   :  { %30 = vsyncpa [#allocation6 + $0x1], 0 }
  0x16   :  { %31 = vsyncpa [#allocation20], 0 }
  0x17   :  { %33 = vsyncpa [#allocation20 + $0x1], 0  ;;  %s2795_s30 = smov 0   ;;  %s2797_s10 = smov 0  }
  0x18   :  { %s2799_s11 = smov 0   ;;  %s2801_s12 = smov 0  }
  0x19   :  { %s2803_s13 = smov 0   ;;  %s2805_s14 = smov 0  }
  0x1a   :  { %s2807_s15 = smov 0   ;;  %s2809_s16 = smov 0  }
  0x1b   :  { %s2811_s17 = smov 0   ;;  %s2813_s18 = smov 0  }
  0x1c   :  { %s2815_s19 = smov 0   ;;  %s2817_s20 = smov 0  }
  0x1d   :  { %s2819_s21 = smov 0   ;;  %s2821_s22 = smov 0  }
  0x1e   :  { %s2823_s23 = smov 0   ;;  %s2825_s24 = smov 0  }
  0x1f   :  { %s2827_s25 = smov 0   ;;  %s2829_s26 = smov 0  }
  0x20   :  { %s2831_s27 = smov 0   ;;  %s2833_s28 = smov 0  }
  0x21 LB: > { %3713 = sst [smem:[#allocation31_spill]] %s2650_s30  ;;  %s51_s29 = sadd.s32 1, %s2718_s26  ;;  %s2726_s28 = sphi %s2833_s28, %s39_s28   ;;  %s2722_s27 = sphi %s2831_s27, %s3844_s27   ;;  %s2718_s26 = sphi %s2829_s26, %s3843_s26   ;;  %s2714_s25 = sphi %s2827_s25, %s3834_s25   ;;  %s2710_s24 = sphi %s2825_s24, %s3833_s24   ;;  %s2706_s23 = sphi %s2823_s23, %s3832_s23   ;;  %s2702_s22 = sphi %s2821_s22, %s3831_s22   ;;  %s2698_s21 = sphi %s2819_s21, %s3830_s21   ;;  %s2694_s20 = sphi %s2817_s20, %s3829_s20   ;;  %s2690_s19 = sphi %s2815_s19, %s3842_s19   ;;  %s2686_s18 = sphi %s2813_s18, %s3841_s18   ;;  %s2682_s17 = sphi %s2811_s17, %s3827_s17   ;;  %s2678_s16 = sphi %s2809_s16, %s3840_s16   ;;  %s2674_s15 = sphi %s2807_s15, %s3839_s15   ;;  %s2670_s14 = sphi %s2805_s14, %s3825_s14   ;;  %s2666_s13 = sphi %s2803_s13, %s3824_s13   ;;  %s2662_s12 = sphi %s2801_s12, %s3823_s12   ;;  %s2658_s11 = sphi %s2799_s11, %s3836_s11   ;;  %s2654_s10 = sphi %s2797_s10, %s3822_s10   ;;  %s2650_s30 = sphi %s2795_s30, %s3821_s30  }
  0x22   : > { %3714 = sst [smem:[#allocation32_spill]] %s2654_s10  ;;  %s58_s9 = sadd.s32 1, %s2722_s27 }
  0x23   : > { %3715 = sst [smem:[#allocation33_spill]] %s2658_s11  ;;  %p52_p0 = scmp.ge.s32.totalorder %s51_s29, 2 }
  0x24   : > { %3716 = sst [smem:[#allocation34_spill]] %s2662_s12  ;;  %p3669_p1 = scmp.eq.s32.totalorder %s2726_s28, 0 }
  0x25   : > { %3717 = sst [smem:[#allocation35_spill]] %s2666_s13  ;;  %s92_s8 = sadd.s32 2, %s2722_s27 }
  0x26   : > { %3718 = sst [smem:[#allocation36_spill]] %s2670_s14  ;;  %s3846_s29 = smov (%p52_p0, %s51_s29), 0 }
  0x27   : > { %3719 = sst [smem:[#allocation37_spill]] %s2682_s17  ;;  %s3848_s9 = smov (!%p52_p0, %s58_s9), %s2722_s27 }
  0x28   : > { %3720 = sst [smem:[#allocation38_spill]] %s2694_s20  ;;  %p106_p2 = scmp.ne.s32.totalorder %s2694_s20, %s2690_s19 }
  0x29   : > { %3721 = sst [smem:[#allocation39_spill]] %s2698_s21  ;;  %p60_p3 = scmp.ge.s32.totalorder %s3848_s9, 2 }
  0x2a   : > { %3722 = sst [smem:[#allocation40_spill]] %s2702_s22  ;;  %p2913_p5 = por %p106_p2, %p3669_p1 }
  0x2b   : > { %3723 = sst [smem:[#allocation41_spill]] %s2706_s23  ;;  %s3850_s9 = smov (%p60_p3, %s3848_s9), 0 }
  0x2c   : > { %3724 = sst [smem:[#allocation42_spill]] %s2710_s24  ;;  %s2905_s24 = ssub.s32 %s2718_s26, %s3846_s29 }
  0x2d   : > { %3725 = sst [smem:[#allocation43_spill]] %s2714_s25  ;;  %s99_s25 = sadd.s32 1, %s2694_s20 }
  0x2e   : > { %3726 = sst [smem:[#allocation44_spill]] %s2718_s26  ;;  %p3667_p6 = scmp.lt.s32.totalorder %s2726_s28, 4 }
  0x2f   : > { %3727 = sst [smem:[#allocation45_spill]] %s2722_s27  ;;  %s1841_s30 = sshll.u32 %s2718_s26, 1 }
  0x30   : > { %3728 = sst [smem:[#allocation46_spill]] %s3846_s29  ;;  %s93_s29 = sadd.s32 2, %s3850_s9 }
  0x31   : > { %3730 = sst [smem:[#allocation47_spill]] %s3850_s9  ;;  %s1842_s10 = sshll.u32 %s2722_s27, 2 }
  0x32   : > { %s94_s11 = ssub.s32 %s92_s8, %s93_s29  ;;  %s379_s2 = sadd.s32 %s1842_s10, %s1841_s30 }
  0x33   : > { %s96_s0 = sor.u32 %s94_s11, %s2905_s24  ;;  %s2924_s21 = sshll.u32 %s379_s2, 7 }
  0x34   : > { %p97_p7 = scmp.eq.s32.totalorder %s96_s0, 0  ;;  %s2927_s7 = sand.u32 1, %s2726_s28  }
  0x35   : > { %s394_s23 = sand.u32 1, %s2694_s20   ;;  %s3732_s1 = sld [smem:[#allocation57_spill]] }
  0x36   : > { %s2930_s22 = scalar_select %p97_p7, %s2694_s20, %s99_s25  }
  0x37   : > { %s1844_s5 = sshll.u32 %s394_s23, 4  ;;  %p2943_p8 = pnand %p3667_p6, %p2913_p5 }
  0x38   : > { %3731 = sst [smem:[#allocation48_spill]] %s2930_s22  ;;  %s396_s2 = scalar_lea.vmem [#allocation7], %s1844_s5 }
  0x39   : > { %s406_s8 = sshll.u32 %s396_s2, 4  ;;  %s3668_s30 = scalar_lea.sflag [#allocation8], %s2927_s7  ;;  %s2947_s8 = int_to_ptr.vmem [resolvable:$true] %s406_s8 }
  0x3a   : > { %p2233_p10 = pneg %p2943_p8 }
  0x3b   : > { %s1621_s12 = scalar_lea.hbm %s3732_s1, %s2924_s21  ;;  %s2236_s10 = scalar_lea.hbm %s3732_s1, 3072 }
  0x3c   : > { %s2937_s13 = scalar_lea.hbm %s1621_s12, 1024  ;;  %s2261_s4 = scalar_lea.hbm %s1621_s12, 1280 }
  0x3d   : > { %p2232_p9 = scmp.ne.s32.totalorder %s2937_s13, %s2261_s4  ;;  %p2237_p13 = scmp.lt.u32.totalorder %s2937_s13, %s3732_s1 }
  0x3e   : > { %p2238_p0 = scmp.lt.u32.totalorder %s2236_s10, %s2261_s4  ;;  %p2240_p3 = scmp.lt.u32.totalorder %s2261_s4, %s2937_s13 }
  0x3f   : > { %p2234_p11 = pnand %p2233_p10, %p2232_p9 }
  0x40   : > { %p2239_p2 = por %p2238_p0, %p2237_p13 }
  0x41   : > { %p2235_p12 = pneg %p2234_p11 }
  0x42   : > { %p2241_p5 = por %p2240_p3, %p2239_p2 }
  0x44   : > { %p2242_p7 = pnand %p2241_p5, %p2235_p12 }
  0x46   : > { %2245 = shalt.err (!%p2242_p7)
}
  0x47   : > { %s2246_s12 = scalar_lea.vmem %s2947_s8, 256  ;;  %s2728_s25 = smov [#allocation7]  }
  0x48   : > { %p2247_p9 = scmp.ne.s32.totalorder %s2947_s8, %s2246_s12  ;;  %s2251_s26 = sshll.u32 %s2728_s25, 4  ;;  %s2252_s26 = int_to_ptr.vmem [resolvable:$false] %s2251_s26 }
  0x49   : > { %s2253_s29 = scalar_lea.vmem %s2252_s26, 512  ;;  %p2254_p6 = scmp.lt.s32.totalorder %s2947_s8, %s2252_s26 }
  0x4a   : > { %p2249_p11 = pnand %p2247_p9, %p2233_p10  ;;  %p2255_p13 = scmp.lt.s32.totalorder %s2253_s29, %s2246_s12 }
  0x4c   : > { %p2250_p4 = pneg %p2249_p11  ;;  %p2256_p0 = por %p2255_p13, %p2254_p6 }
  0x4e   : > { %p2257_p2 = pnand %p2256_p0, %p2250_p4 }
  0x50   : > { %2260 = shalt.err (!%p2257_p2)
}
  0x51   : > { %s3673_s2 = smov 128   ;;  %s3675_s4 = smov 8  }
  0x52   : > { %2020 = dma.hbm_to_vmem [thread:$0]  (!%p2943_p8), %s2937_s13, 256, %s2947_s8, %s3668_s30, %s3673_s2, %s3673_s2, %s3675_s4  }
  0x53   : > { %s122_s5 = sadd.s32 4, %s2722_s27  ;;  %s123_s6 = sadd.s32 4, %s3850_s9 }
  0x54   : > { %s124_s10 = ssub.s32 %s122_s5, %s123_s6  ;;  %s129_s11 = sadd.s32 1, %s2682_s17 }
  0x55   : > { %s126_s23 = sor.u32 %s124_s10, %s2905_s24  ;;  %p136_p4 = scmp.ne.s32.totalorder %s2682_s17, %s2678_s16 }
  0x56   : > { %p127_p6 = scmp.eq.s32.totalorder %s126_s23, 0  ;;  %p142_p10 = scmp.ne.s32.totalorder %s2678_s16, %s2674_s15 }
  0x57   : > { %p138_p12 = por %p136_p4, %p3669_p1  ;;  %s418_s12 = sand.u32 1, %s2682_s17  }
  0x58   : > { %s2991_s25 = scalar_select %p127_p6, %s2682_s17, %s129_s11  }
  0x59   : > { %s1848_s0 = sshll.u32 %s418_s12, 4  ;;  %p3735_p3 = scmp.lt.s32.totalorder %s2726_s28, 4 }
  0x5a   : > { %3734 = sst [smem:[#allocation49_spill]] %s2991_s25  ;;  %s420_s13 = scalar_lea.vmem [#allocation9], %s1848_s0 }
  0x5b   : > { %p2995_p5 = pnand %p3735_p3, %p138_p12  ;;  %s430_s8 = sshll.u32 %s420_s13, 4  ;;  %s2999_s8 = int_to_ptr.vmem [resolvable:$true] %s430_s8 }
  0x5c   : > { %3737 = sst [smem:[#allocation50_spill]] %s2999_s8  ;;  %s3738_s3 = sld [smem:[#allocation59_spill]] }
  0x5d   : > { %s3736_s26 = scalar_select %p2995_p5, 1, 0 }
  0x5e   : > { %s444_s10 = scalar_lea.vmem [#allocation10], %s1848_s0  ;;  %s3670_s12 = scalar_lea.sflag [#allocation11], %s2927_s7 }
  0x5f   : > { %s455_s23 = sshll.u32 %s444_s10, 4  ;;  %p3671_p7 = pneg %p2995_p5  ;;  %s3007_s23 = int_to_ptr.vmem [resolvable:$true] %s455_s23 }
  0x62   : > { %s1640_s6 = scalar_lea.hbm %s3738_s3, %s2924_s21  ;;  %s2267_s0 = scalar_lea.hbm %s3738_s3, 3072 }
  0x63   : > { %s3005_s11 = scalar_lea.hbm %s1640_s6, 2048  ;;  %s2292_s30 = scalar_lea.hbm %s1640_s6, 2304 }
  0x64   : > { %p2263_p8 = scmp.ne.s32.totalorder %s3005_s11, %s2292_s30  ;;  %p2268_p13 = scmp.lt.u32.totalorder %s3005_s11, %s3738_s3 }
  0x65   : > { %p2269_p0 = scmp.lt.u32.totalorder %s2267_s0, %s2292_s30  ;;  %p2271_p4 = scmp.lt.u32.totalorder %s2292_s30, %s3005_s11 }
  0x66   : > { %p2265_p9 = pnand %p3671_p7, %p2263_p8 }
  0x67   : > { %p2270_p2 = por %p2269_p0, %p2268_p13 }
  0x68   : > { %p2266_p11 = pneg %p2265_p9 }
  0x69   : > { %p2272_p6 = por %p2271_p4, %p2270_p2 }
  0x6b   : > { %p2273_p12 = pnand %p2272_p6, %p2266_p11 }
  0x6d   : > { %2276 = shalt.err (!%p2273_p12)
}
  0x6e   : > { %s2277_s6 = scalar_lea.vmem %s3007_s23, 256  ;;  %s2731_s13 = smov [#allocation10]  }
  0x6f   : > { %p2278_p3 = scmp.ne.s32.totalorder %s3007_s23, %s2277_s6  ;;  %s2282_s29 = sshll.u32 %s2731_s13, 4  ;;  %s2283_s29 = int_to_ptr.vmem [resolvable:$false] %s2282_s29 }
  0x70   : > { %s2284_s5 = scalar_lea.vmem %s2283_s29, 512  ;;  %p2285_p1 = scmp.lt.s32.totalorder %s3007_s23, %s2283_s29 }
  0x71   : > { %p2280_p8 = pnand %p2278_p3, %p3671_p7  ;;  %p2286_p13 = scmp.lt.s32.totalorder %s2284_s5, %s2277_s6 }
  0x73   : > { %p2281_p9 = pneg %p2280_p8  ;;  %p2287_p0 = por %p2286_p13, %p2285_p1 }
  0x75   : > { %p2288_p2 = pnand %p2287_p0, %p2281_p9 }
  0x77   : > { %2291 = shalt.err (!%p2288_p2)
}
  0x78   : > { %s3739_s30 = sld [smem:[#allocation35_spill]]  ;;  %s3740_s0 = sld [smem:[#allocation34_spill]] }
  0x79   : > { %2026 = dma.hbm_to_vmem [thread:$0]  (!%p2995_p5), %s3005_s11, 256, %s3007_s23, %s3670_s12, %s3673_s2, %s3673_s2, %s3675_s4  }
  0x7a   : > { %s3040_s10 = sadd.s32 4294967295, %s2726_s28   ;;  %s1836_s6 = sadd.s32 4294967294, %s2726_s28  }
  0x7b   : > { %s62_s13 = ssub.s32 %s2722_s27, %s3850_s9  ;;  %p3682_p1 = scmp.eq.s32.totalorder %s3040_s10, 0 }
  0x7c   : > { %s64_s29 = sor.u32 %s2905_s24, %s62_s13  ;;  %p187_p11 = scmp.eq.s32.totalorder %s62_s13, 0 }
  0x7d   : > { %p3047_p4 = scmp.eq.s32.totalorder %s64_s29, 0  ;;  %p3742_p6 = scmp.ne.s32.totalorder %s2690_s19, %s2686_s18 }
  0x7e   : > { %p3065_p3 = por %p142_p10, %p3682_p1  ;;  %s189_s12 = sadd.s32 1, %s2670_s14 }
  0x7f   : > { %p3056_p12 = por %p3742_p6, %p3682_p1  ;;  %p196_p8 = scmp.ne.s32.totalorder %s2670_s14, %s3739_s30 }
  0x80   : > { %s3744_s11 = scalar_select %p3065_p3, 1, 0 }
  0x81   : > { %s3743_s23 = scalar_select %p3056_p12, 1, 0 }
  0x82   : > { %s3071_s13 = scalar_select %p187_p11, %s2670_s14, %s189_s12  }
  0x83   : > { %p202_p9 = scmp.ne.s32.totalorder %s3739_s30, %s3740_s0  ;;  %p303_p13 = scmp.eq.s32.totalorder %s3040_s10, 3 }
  0x84   : > { %3745 = sst [smem:[#allocation51_spill]] %s3071_s13  ;;  %p309_p0 = scmp.eq.s32.totalorder %s1836_s6, 3 }
  0x85   : > { %p3746_p2 = scmp.eq.s32.totalorder %s2726_s28, 0  ;;  %p3082_p7 = por %p202_p9, %p3682_p1 }
  0x86   : > { %p3086_p12 = por %p303_p13, %p196_p8  ;;  %p3090_p10 = por %p309_p0, %p202_p9 }
  0x87   : > { %p198_p6 = por %p196_p8, %p3746_p2  ;;  %s467_s12 = sand.u32 1, %s2670_s14  }
  0x88   : > { %s3747_s18 = scalar_select %p3082_p7, 1, 0 }
  0x89   : > { %s3749_s15 = scalar_select %p3086_p12, 1, 0 }
  0x8a   : > { %3748 = sst [smem:[#allocation52_spill]] %s3747_s18  ;;  %s3095_s30 = sshll.u32 %s467_s12, 3 }
  0x8b   : > { %3750 = sst [smem:[#allocation53_spill]] %s3749_s15  ;;  %s1857_s0 = sshll.u32 %s2722_s27, 7 }
  0x8c   : > { %s3751_s29 = scalar_select %p3090_p10, 1, 0 }
  0x8d   : > { %s3753_s4 = sld [smem:[#allocation60_spill]]  ;;  %p3754_p11 = scmp.lt.s32.totalorder %s2726_s28, 4 }
  0x8e   : > { %3752 = sst [smem:[#allocation54_spill]] %s3751_s29  ;;  %s3756_s20 = sld [smem:[#allocation61_spill]] }
  0x8f   : > { %p3105_p2 = pnand %p3754_p11, %p198_p6  ;;  %s488_s12 = scalar_lea.vmem [#allocation13], %s3095_s30 }
  0x90   : > { %s496_s2 = sshll.u32 %s488_s12, 4  ;;  %s3688_s6 = scalar_lea.sflag [#allocation14], %s2927_s7  ;;  %s3115_s2 = int_to_ptr.vmem [resolvable:$true] %s496_s2 }
  0x91   : > { %s3755_s3 = scalar_select %p3105_p2, 1, 0 }
  0x92   : > { %p3694_p9 = pneg %p3105_p2 }
  0x93   : > { %s3101_s1 = scalar_lea.hbm %s3753_s4, %s1857_s0 }
  0x94   : > { %s3757_s8 = smov %s3756_s20  ;;  %s3112_s25 = scalar_lea.hbm %s3756_s20, %s1857_s0 }
  0x95   : > { %s2293_s27 = scalar_lea.hbm %s3112_s25, 128  ;;  %s2298_s22 = scalar_lea.hbm %s3757_s8, 256 }
  0x96   : > { %p2294_p8 = scmp.ne.s32.totalorder %s3112_s25, %s2293_s27  ;;  %p2299_p6 = scmp.lt.u32.totalorder %s3112_s25, %s3757_s8 }
  0x97   : > { %p2300_p11 = scmp.lt.u32.totalorder %s2298_s22, %s2293_s27  ;;  %p2302_p10 = scmp.lt.u32.totalorder %s2293_s27, %s3112_s25 }
  0x98   : > { %p2296_p13 = pnand %p3694_p9, %p2294_p8 }
  0x99   : > { %p2301_p1 = por %p2300_p11, %p2299_p6 }
  0x9a   : > { %p2297_p0 = pneg %p2296_p13 }
  0x9b   : > { %p2303_p12 = por %p2302_p10, %p2301_p1 }
  0x9d   : > { %p2304_p7 = pnand %p2303_p12, %p2297_p0 }
  0x9f   : > { %2307 = shalt.err (!%p2304_p7)
}
  0xa0   : > { %s2308_s12 = scalar_lea.vmem %s3115_s2, 128  ;;  %s2732_s9 = smov [#allocation13]  }
  0xa1   : > { %p2309_p8 = scmp.ne.s32.totalorder %s3115_s2, %s2308_s12  ;;  %s2313_s20 = sshll.u32 %s2732_s9, 4  ;;  %s2314_s20 = int_to_ptr.vmem [resolvable:$false] %s2313_s20 }
  0xa2   : > { %s2315_s17 = scalar_lea.vmem %s2314_s20, 256  ;;  %p2316_p5 = scmp.lt.s32.totalorder %s3115_s2, %s2314_s20 }
  0xa3   : > { %p2311_p13 = pnand %p2309_p8, %p3694_p9  ;;  %p2317_p6 = scmp.lt.s32.totalorder %s2315_s17, %s2308_s12 }
  0xa5   : > { %p2312_p3 = pneg %p2311_p13  ;;  %p2318_p11 = por %p2317_p6, %p2316_p5 }
  0xa7   : > { %p2319_p1 = pnand %p2318_p11, %p2312_p3 }
  0xa9   : > { %2322 = shalt.err (!%p2319_p1)
}
  0xaa   : > { %s3758_s27 = sld [smem:[#allocation41_spill]]  ;;  %s3759_s22 = sld [smem:[#allocation40_spill]] }
  0xab   : > { %2032 = dma.hbm_to_vmem [thread:$0]  (!%p3105_p2), %s3112_s25, 128, %s3115_s2, %s3688_s6  }
  0xac   : > { %p1837_p7 = scmp.ge.s32.totalorder %s2726_s28, 1  ;;  %p344_p12 = scmp.lt.s32.totalorder %s2726_s28, 5 }
  0xad   : > { %s2733_s0 = smov [#allocation16]   ;;  %p3761_p10 = scmp.eq.s32.totalorder %s3040_s10, 0 }
  0xae   : > { %s357_s12 = sshll.u32 %s2733_s0, 4  ;;  %p3147_p5 = pnand %p1837_p7, %p344_p12  ;;  %s358_s12 = int_to_ptr.vmem [resolvable:$true] %s357_s12 }
  0xaf   : > { %s3764_s6 = sld [smem:[#allocation63_spill]] }
  0xb0   : > { %s3760_s9 = scalar_select %p3147_p5, 1, 0 }
  0xb1   : > { %p2010_p3 = pneg %p3147_p5  ;;  %s69_s17 = sadd.s32 1, %s3758_s27 }
  0xb2   : > { %s3163_s25 = scalar_select %p3047_p4, %s3758_s27, %s69_s17  }
  0xb3   : > { %p3155_p0 = pnand %p2010_p3, %p3761_p10 }
  0xb4   : > { %3763 = sst [smem:[#allocation55_spill]] %s3163_s25 }
  0xb5   : > { %s2323_s8 = scalar_lea.hbm %s3764_s6, 16  ;;  %p2325_p6 = pneg %p3155_p0 }
  0xb6   : > { %p2324_p13 = scmp.ne.s32.totalorder %s3764_s6, %s2323_s8  ;;  %p2330_p7 = scmp.lt.u32.totalorder %s2323_s8, %s3764_s6 }
  0xb8   : > { %p2326_p11 = pnand %p2325_p6, %p2324_p13 }
  0xba   : > { %p2327_p1 = pneg %p2326_p11 }
  0xbc   : > { %p2332_p12 = pnand %p2330_p7, %p2327_p1 }
  0xbe   : > { %2335 = shalt.err (!%p2332_p12)
}
  0xbf   : > { %s2336_s5 = scalar_lea.vmem %s358_s12, 16  ;;  %s2343_s17 = scalar_lea.vmem %s358_s12, 32 }
  0xc0   : > { %p2337_p4 = scmp.ne.s32.totalorder %s358_s12, %s2336_s5  ;;  %p2344_p9 = scmp.lt.s32.totalorder %s358_s12, %s358_s12 }
  0xc1   : > { %p2345_p8 = scmp.lt.s32.totalorder %s2343_s17, %s2336_s5 }
  0xc2   : > { %p2339_p3 = pnand %p2337_p4, %p2325_p6 }
  0xc3   : > { %p2346_p5 = por %p2345_p8, %p2344_p9 }
  0xc4   : > { %p2340_p10 = pneg %p2339_p3 }
  0xc6   : > { %p2347_p2 = pnand %p2346_p5, %p2340_p10 }
  0xc8   : > { %2350 = shalt.err (!%p2347_p2)
}
  0xc9   : > { %s3765_s8 = sld [smem:[#allocation39_spill]]  ;;  %p3766_p13 = scmp.ne.s32.totalorder %s3758_s27, %s3759_s22 }
  0xca   : > { %2013 = dma.hbm_to_vmem [thread:$0]  (!%p3155_p0), %s3764_s6, 16, %s358_s12, [#allocation17]  }
  0xcb   : > { %p3767_p9 = scmp.eq.s32.totalorder %s2726_s28, 0  ;;  %s368_s15 = sand.u32 1, %s3758_s27  }
  0xcc   : > { %s3768_s2 = sld [smem:[#allocation56_spill]]  ;;  %p3769_p8 = scmp.eq.s32.totalorder %s3040_s10, 0 }
  0xcd   : > { %p78_p5 = por %p3767_p9, %p3766_p13  ;;  %s1840_s17 = sshll.u32 %s368_s15, 4 }
  0xce   : > { %p3771_p0 = scmp.lt.s32.totalorder %s2726_s28, 4  ;;  %s3773_s14 = sld [smem:[#allocation58_spill]] }
  0xcf   : > { %p82_p2 = scmp.ne.s32.totalorder %s3759_s22, %s3765_s8  ;;  %s372_s29 = scalar_lea.vmem [#allocation4], %s1840_s17 }
  0xd0   : > { %p3205_p11 = pnand %p3771_p0, %p78_p5  ;;  %s382_s20 = sshll.u32 %s372_s29, 4  ;;  %s3215_s20 = int_to_ptr.vmem [resolvable:$true] %s382_s20 }
  0xd1   : > { %p3199_p6 = por %p3769_p8, %p82_p2  ;;  %s3220_s25 = scalar_lea.sflag [#allocation5], %s368_s15 }
  0xd2   : > { %s3195_s0 = scalar_lea.hbm %s3768_s2, %s2924_s21  ;;  %p2353_p7 = pneg %p3205_p11 }
  0xd3   : > { %s3770_s5 = scalar_select %p3199_p6, 1, 0 }
  0xd4   : > { %s3774_s8 = smov %s3773_s14  ;;  %s3213_s13 = scalar_lea.hbm %s3773_s14, %s2924_s21 }
  0xd5   : > { %s3218_s6 = scalar_lea.hbm %s3213_s13, 2048  ;;  %s2351_s18 = scalar_lea.hbm %s3195_s0, 256 }
  0xd6   : > { %p2352_p1 = scmp.ne.s32.totalorder %s3195_s0, %s2351_s18  ;;  %s2356_s22 = scalar_lea.hbm %s3768_s2, 3072 }
  0xd7   : > { %p2357_p3 = scmp.lt.u32.totalorder %s3195_s0, %s3768_s2  ;;  %p2358_p10 = scmp.lt.u32.totalorder %s2356_s22, %s2351_s18 }
  0xd8   : > { %p2354_p12 = pnand %p2353_p7, %p2352_p1  ;;  %p2360_p9 = scmp.lt.u32.totalorder %s2351_s18, %s3195_s0 }
  0xd9   : > { %p2359_p13 = por %p2358_p10, %p2357_p3 }
  0xda   : > { %p2355_p4 = pneg %p2354_p12 }
  0xdb   : > { %p2361_p5 = por %p2360_p9, %p2359_p13 }
  0xdd   : > { %p2362_p2 = pnand %p2361_p5, %p2355_p4 }
  0xdf   : > { %2365 = shalt.err (!%p2362_p2)
}
  0xe0   : > { %s2366_s15 = scalar_lea.vmem %s3215_s20, 256  ;;  %s2734_s29 = smov [#allocation4]  }
  0xe1   : > { %p2367_p8 = scmp.ne.s32.totalorder %s3215_s20, %s2366_s15  ;;  %s2371_s27 = sshll.u32 %s2734_s29, 4  ;;  %s2372_s27 = int_to_ptr.vmem [resolvable:$false] %s2371_s27 }
  0xe2   : > { %s2373_s21 = scalar_lea.vmem %s2372_s27, 512  ;;  %p2374_p12 = scmp.lt.s32.totalorder %s3215_s20, %s2372_s27 }
  0xe3   : > { %p2369_p0 = pnand %p2367_p8, %p2353_p7  ;;  %p2375_p3 = scmp.lt.s32.totalorder %s2373_s21, %s2366_s15 }
  0xe5   : > { %p2370_p1 = pneg %p2369_p0  ;;  %p2376_p10 = por %p2375_p3, %p2374_p12 }
  0xe7   : > { %p2377_p13 = pnand %p2376_p10, %p2370_p1 }
  0xe9   : > { %2380 = shalt.err (!%p2377_p13)
}
  0xea   : > { %s3775_s18 = smov 8   ;;  %s3776_s22 = smov 128  }
  0xeb   : > { %2017 = dma.hbm_to_vmem [thread:$0]  (!%p3205_p11), %s3195_s0, 256, %s3215_s20, %s3220_s25, %s3776_s22, %s3776_s22, %s3775_s18  }
  0xec   : > { %s2411_s17 = scalar_lea.hbm %s3213_s13, 2304  ;;  %p3777_p4 = scmp.ne.s32.totalorder %s3736_s26, 0 }
  0xed   : > { %p2382_p7 = scmp.ne.s32.totalorder %s3218_s6, %s2411_s17  ;;  %s2386_s15 = scalar_lea.hbm %s3774_s8, 3072 }
  0xee   : > { %p3778_p9 = pneg %p3777_p4  ;;  %p2387_p8 = scmp.lt.u32.totalorder %s3218_s6, %s3774_s8 }
  0xef   : > { %p2388_p0 = scmp.lt.u32.totalorder %s2386_s15, %s2411_s17  ;;  %p2390_p12 = scmp.lt.u32.totalorder %s2411_s17, %s3218_s6 }
  0xf0   : > { %p2384_p5 = pnand %p2382_p7, %p3778_p9 }
  0xf1   : > { %p2389_p1 = por %p2388_p0, %p2387_p8 }
  0xf2   : > { %p2385_p2 = pneg %p2384_p5 }
  0xf3   : > { %p2391_p3 = por %p2390_p12, %p2389_p1 }
  0xf5   : > { %p2392_p10 = pnand %p2391_p3, %p2385_p2 }
  0xf7   : > { %2395 = shalt.err (!%p2392_p10)
}
  0xf8   : > { %s3779_s25 = sld [smem:[#allocation50_spill]]  ;;  %p3780_p13 = pmov %p3778_p9 }
  0xf9   : > { %s2735_s13 = smov [#allocation9]  }
  0xfa   : > { %s2401_s20 = sshll.u32 %s2735_s13, 4  ;;  %s2402_s20 = int_to_ptr.vmem [resolvable:$false] %s2401_s20 }
  0xfb   : > { %s2403_s21 = scalar_lea.vmem %s2402_s20, 512 }
  0xfe   : > { %s2396_s0 = scalar_lea.vmem %s3779_s25, 256  ;;  %p2404_p5 = scmp.lt.s32.totalorder %s3779_s25, %s2402_s20 }
  0xff   : > { %p2397_p11 = scmp.ne.s32.totalorder %s3779_s25, %s2396_s0  ;;  %p2405_p8 = scmp.lt.s32.totalorder %s2403_s21, %s2396_s0 }
 0x101   : > { %p2399_p7 = pnand %p2397_p11, %p3780_p13  ;;  %p2406_p0 = por %p2405_p8, %p2404_p5 }
 0x103   : > { %p2400_p9 = pneg %p2399_p7 }
 0x105   : > { %p2407_p1 = pnand %p2406_p0, %p2400_p9 }
 0x107   : > { %2410 = shalt.err (!%p2407_p1)
}
 0x108   : > { %s3781_s17 = scalar_lea.sflag [#allocation8], %s2927_s7  ;;  %s469_s14 = scalar_lea.vmem [#allocation12], %s3095_s30 }
 0x109   : > { %2023 = dma.hbm_to_vmem [thread:$0]  (!%p3777_p4), %s3218_s6, 256, %s3779_s25, %s3781_s17, %s3776_s22, %s3776_s22, %s3775_s18  }
 0x10a   : > { %s477_s12 = sshll.u32 %s469_s14, 4  ;;  %s2412_s15 = scalar_lea.hbm %s3101_s1, 128  ;;  %s478_s12 = int_to_ptr.vmem [resolvable:$true] %s477_s12 }
 0x10b   : > { %p2413_p2 = scmp.ne.s32.totalorder %s3101_s1, %s2412_s15  ;;  %p3782_p12 = scmp.ne.s32.totalorder %s3755_s3, 0 }
 0x10c   : > { %s2417_s27 = scalar_lea.hbm %s3753_s4, 256  ;;  %p2418_p13 = scmp.lt.u32.totalorder %s3101_s1, %s3753_s4 }
 0x10d   : > { %p3783_p3 = pneg %p3782_p12  ;;  %p2419_p7 = scmp.lt.u32.totalorder %s2417_s27, %s2412_s15 }
 0x10e   : > { %p2421_p4 = scmp.lt.u32.totalorder %s2412_s15, %s3101_s1 }
 0x10f   : > { %p2415_p10 = pnand %p2413_p2, %p3783_p3  ;;  %p2420_p9 = por %p2419_p7, %p2418_p13 }
 0x111   : > { %p2416_p11 = pneg %p2415_p10  ;;  %p2422_p5 = por %p2421_p4, %p2420_p9 }
 0x113   : > { %p2423_p8 = pnand %p2422_p5, %p2416_p11 }
 0x115   : > { %2426 = shalt.err (!%p2423_p8)
}
 0x116   : > { %s2427_s30 = scalar_lea.vmem %s478_s12, 128  ;;  %p3784_p1 = pmov %p3783_p3 }
 0x117   : > { %p2428_p0 = scmp.ne.s32.totalorder %s478_s12, %s2427_s30  ;;  %s2736_s6 = smov [#allocation12]  }
 0x118   : > { %s2432_s25 = sshll.u32 %s2736_s6, 4  ;;  %s2433_s25 = int_to_ptr.vmem [resolvable:$false] %s2432_s25 }
 0x119   : > { %p2430_p2 = pnand %p2428_p0, %p3784_p1  ;;  %s2434_s20 = scalar_lea.vmem %s2433_s25, 256 }
 0x11a   : > { %p2435_p10 = scmp.lt.s32.totalorder %s478_s12, %s2433_s25  ;;  %p2436_p6 = scmp.lt.s32.totalorder %s2434_s20, %s2427_s30 }
 0x11b   : > { %p2431_p3 = pneg %p2430_p2 }
 0x11c   : > { %p2437_p7 = por %p2436_p6, %p2435_p10 }
 0x11e   : > { %p2438_p13 = pnand %p2437_p7, %p2431_p3 }
 0x120   : > { %2441 = shalt.err (!%p2438_p13)
}
 0x121   : > { %s3785_s21 = scalar_lea.sflag [#allocation11], %s2927_s7  ;;  %s3786_s17 = sld [smem:[#allocation33_spill]] }
 0x122   : > { %s3787_s14 = sld [smem:[#allocation32_spill]]  ;;  %p241_p6 = scmp.eq.s32.totalorder %s2905_s24, 0 }
 0x123   : > { %s3788_s15 = sld [smem:[#allocation31_spill]]  ;;  %p3790_p4 = scmp.eq.s32.totalorder %s2726_s28, 0 }
 0x124   : > { %s3789_s26 = sld [smem:[#allocation44_spill]]  ;;  %p3791_p8 = scmp.eq.s32.totalorder %s3040_s10, 0 }
 0x125   : > { %2029 = dma.hbm_to_vmem [thread:$0]  (!%p3782_p12), %s3101_s1, 128, %s478_s12, %s3785_s21  }
 0x126   : > { %s3793_s20 = sld [smem:[#allocation62_spill]]  ;;  %p3795_p12 = scmp.lt.s32.totalorder %s2726_s28, 4 }
 0x127   : > { %s243_s29 = sadd.s32 1, %s3786_s17  ;;  %s505_s0 = sand.u32 1, %s3786_s17  }
 0x128   : > { %p250_p11 = scmp.ne.s32.totalorder %s3786_s17, %s3787_s14  ;;  %s1860_s30 = sshll.u32 %s505_s0, 4 }
 0x129   : > { %p256_p9 = scmp.ne.s32.totalorder %s3787_s14, %s3788_s15  ;;  %s507_s12 = scalar_lea.vmem [#allocation15], %s1860_s30 }
 0x12a   : > { %s3308_s3 = scalar_select %p241_p6, %s3786_s17, %s243_s29  }
 0x12b   : > { %p252_p5 = por %p250_p11, %p3790_p4  ;;  %p3314_p0 = por %p256_p9, %p3791_p8 }
 0x12c   : > { %s1905_s13 = sshll.u32 %s3789_s26, 8  ;;  %s3794_s2 = smov %s3793_s20 }
 0x12d   : > { %s3323_s1 = scalar_lea.hbm %s3793_s20, %s1905_s13  ;;  %p3327_p1 = pnand %p3795_p12, %p252_p5 }
 0x12e   : > { %s514_s21 = sshll.u32 %s507_s12, 4  ;;  %s2442_s17 = scalar_lea.hbm %s3323_s1, 256  ;;  %s3331_s21 = int_to_ptr.vmem [resolvable:$true] %s514_s21 }
 0x12f   : > { %p2443_p2 = scmp.ne.s32.totalorder %s3323_s1, %s2442_s17  ;;  %p2444_p3 = pneg %p3327_p1 }
 0x130   : > { %s2447_s26 = scalar_lea.hbm %s3794_s2, 512  ;;  %p2448_p13 = scmp.lt.u32.totalorder %s3323_s1, %s3794_s2 }
 0x131   : > { %p2445_p10 = pnand %p2444_p3, %p2443_p2  ;;  %p2449_p6 = scmp.lt.u32.totalorder %s2447_s26, %s2442_s17 }
 0x132   : > { %p2451_p9 = scmp.lt.u32.totalorder %s2442_s17, %s3323_s1 }
 0x133   : > { %p2446_p7 = pneg %p2445_p10  ;;  %p2450_p11 = por %p2449_p6, %p2448_p13 }
 0x135   : > { %p2452_p4 = por %p2451_p9, %p2450_p11 }
 0x137   : > { %p2453_p5 = pnand %p2452_p4, %p2446_p7 }
 0x139   : > { %2456 = shalt.err (!%p2453_p5)
}
 0x13a   : > { %s2457_s13 = scalar_lea.vmem %s3331_s21, 256  ;;  %s2737_s30 = smov [#allocation15]  }
 0x13b   : > { %p2458_p8 = scmp.ne.s32.totalorder %s3331_s21, %s2457_s13  ;;  %s2462_s6 = sshll.u32 %s2737_s30, 4  ;;  %s2463_s6 = int_to_ptr.vmem [resolvable:$false] %s2462_s6 }
 0x13c   : > { %s2464_s25 = scalar_lea.vmem %s2463_s6, 512  ;;  %p2465_p10 = scmp.lt.s32.totalorder %s3331_s21, %s2463_s6 }
 0x13d   : > { %p2460_p12 = pnand %p2458_p8, %p2444_p3  ;;  %p2466_p13 = scmp.lt.s32.totalorder %s2464_s25, %s2457_s13 }
 0x13f   : > { %p2461_p2 = pneg %p2460_p12  ;;  %p2467_p6 = por %p2466_p13, %p2465_p10 }
 0x141   : > { %p2468_p11 = pnand %p2467_p6, %p2461_p2 }
 0x143   : > { %2471 = shalt.err (!%p2468_p11)
}
 0x144   : > { %s3797_s20 = scalar_lea.sflag [#allocation14], %s2927_s7  ;;  %p3798_p3 = scmp.ne.s32.totalorder %s3760_s9, 0 }
 0x145   : > { %2035 = dma.hbm_to_vmem [thread:$0]  (!%p3327_p1), %s3323_s1, 256, %s3331_s21, %s3797_s20, %s3776_s22, %s3776_s22, %s3775_s18  }
 0x146   : > { %526 = sbr.rel (%p3798_p3) target bundleno = 2063 (0x80f), region = 52  ;;  %s3799_s12 = sld [smem:[#allocation40_spill]] (!%p3798_p3) }
 0x147   : > { %p3800_p7 = scmp.ne.s32.totalorder (!%p3798_p3), %s3770_s5, 0 }
 0x14c   : > { %s528_s17 = sand.u32 (!%p3798_p3), 1, %s3799_s12  }
 0x14d   : > { %s3366_s14 = sshll.u32 %s528_s17, 4  ;;  %s529_s15 = scalar_lea.sflag [#allocation5], %s528_s17 }
 0x14e   : > { %s532_s26 = scalar_lea.vmem [#allocation4], %s3366_s14 }
 0x14f   : > { %2609 = dma.done.wait (%p3800_p7), %s529_s15, 256  }
 0x150   : > { %2611 = vsyncadd (%p3800_p7), %s529_s15, 4294967040  ;;  %s537_s7 = sand.u32 1, %s3040_s10   ;;  %s539_s18 = sand.u32 1, %s2690_s19  }
 0x151   : > { %s3375_s9 = sshll.u32 %s539_s18, 4  ;;  %s538_s22 = scalar_lea.sflag [#allocation8], %s537_s7 }
 0x152   : > { %s541_s1 = scalar_lea.vmem [#allocation7], %s3375_s9  ;;  %p3801_p1 = scmp.ne.s32.totalorder %s3743_s23, 0 }
 0x154   : > { %2613 = dma.done.wait (%p3801_p1), %s538_s22, 256  }
 0x155   : > { %2615 = vsyncadd (%p3801_p1), %s538_s22, 4294967040  ;;  %s548_s24 = sand.u32 1, %s2678_s16   ;;  %p3802_p9 = scmp.ne.s32.totalorder %s3744_s11, 0 }
 0x156   : > { %s3383_s5 = sshll.u32 %s548_s24, 4 }
 0x157   : > { %s550_s21 = scalar_lea.vmem [#allocation9], %s3383_s5 }
 0x158   : > { %2617 = dma.done.wait (%p3802_p9), %s538_s22, 256  }
 0x159   : > { %2619 = vsyncadd (%p3802_p9), %s538_s22, 4294967040  ;;  %s556_s29 = scalar_lea.sflag [#allocation11], %s537_s7  ;;  %s559_s0 = scalar_lea.vmem [#allocation10], %s3383_s5 }
 0x15a   : > { %2621 = dma.done.wait (%p3802_p9), %s556_s29, 256  }
 0x15b   : > { %2623 = vsyncadd (%p3802_p9), %s556_s29, 4294967040  ;;  %s3803_s23 = sld [smem:[#allocation35_spill]]  ;;  %s3804_s13 = sld [smem:[#allocation52_spill]] }
 0x161   : > { %s3396_s30 = sand.u32 1, %s3803_s23   ;;  %p3805_p4 = scmp.ne.s32.totalorder %s3804_s13, 0 }
 0x162   : > { %s3399_s6 = sshll.u32 %s3396_s30, 3 }
 0x163   : > { %s568_s25 = scalar_lea.vmem [#allocation12], %s3399_s6 }
 0x164   : > { %2625 = dma.done.wait (%p3805_p4), %s556_s29, 128  }
 0x165   : > { %2627 = vsyncadd (%p3805_p4), %s556_s29, 4294967168  ;;  %s574_s20 = scalar_lea.sflag [#allocation14], %s537_s7  ;;  %s577_s12 = scalar_lea.vmem [#allocation13], %s3399_s6 }
 0x166   : > { %2629 = dma.done.wait (%p3805_p4), %s574_s20, 128  }
 0x167   : > { %2631 = vsyncadd (%p3805_p4), %s574_s20, 4294967168  ;;  %s3806_s11 = sld [smem:[#allocation32_spill]] }
 0x16d   : > { %s584_s17 = sand.u32 1, %s3806_s11  }
 0x16e   : > { %s3412_s15 = sshll.u32 %s584_s17, 4 }
 0x16f   : > { %s586_s18 = scalar_lea.vmem [#allocation15], %s3412_s15 }
 0x170   : > { %2633 = dma.done.wait (%p3314_p0), %s574_s20, 256  }
 0x171   : > { %2635 = vsyncadd (%p3314_p0), %s574_s20, 4294967040  ;;  %p3807_p5 = scmp.eq.s32.totalorder %s3040_s10, 0 }
 0x173   : > { %2637 = dma.done.wait (%p3807_p5), [#allocation17], 16   ;;  %p3808_p8 = pmov %p3807_p5 }
 0x174   : > { %s652_s7 = scalar_lea.vmem [#allocation18], %s3399_s6  ;;  %s659_s22 = scalar_lea.vmem [#allocation19], %s3399_s6 }
 0x175   : > { %2639 = vsyncadd (%p3808_p8), [#allocation17], 4294967280  ;;  %s3809_s24 = sld [smem:[#allocation42_spill]] }
 0x17b   : > { %p1874_p12 = scmp.ne.s32.totalorder %s3809_s24, 0 }
 0x17c   : > { %vm671_vm0 = vcmask (!%p1874_p12), 258048   ;;  %v2738_v0 = vmov (!%p1874_p12), 0.0  }
 0x17d   : > { %670 = sbr.rel (%p1874_p12) target bundleno = 388 (0x184), region = 88  ;;  %672 = vst.msk [vmem:[#allocation2] sm:$0x1f] (!%p1874_p12), %vm671_vm0, %v2738_v0  ;;  %673 = vst.msk [vmem:[#allocation3] sm:$0x1f] (!%p1874_p12), %vm671_vm0, %v2738_v0 }
 0x184 PF: > { %v676_v1 = vld [vmem:[%s541_s1] sm:$0x1f]  ;;  %vm680_vm1 = vcmask 64512   ;;  %v2739_v2 = vmov 0.0   ;;  %vm2740_vm2 = vmmov 0   ;;  %vm757_vm3 = vcmask 36864  }
 0x185   : > { %1928 = vmatprep.subr.mxu0 %v2739_v2  ;;  %1930 = vmatprep.mubr.msk.f32.mxu0 %vm2740_vm2, %v2739_v2  ;;  %v674_v3 = vld [vmem:[%s532_s26] sm:$0x1f]  ;;  %vm773_vm4 = vcmask 1044480   ;;  %vm769_vm5 = vcmask 39936   ;;  %v1883_v19 = vld [vmem:[%s532_s26 + $0x8] sm:$0x1f] }
 0x186   : > { %1929 = vmatpush3.xpose.msk.msra.mxu0 %vm680_vm1, %v676_v1  ;;  %v675_v4 = vmul.f32 0.35355338, %v674_v3  ;;  %1933 = vmatprep.subr.mxu1 %v2739_v2  ;;  %v677_v13 = vld [vmem:[%s550_s21] sm:$0x1f]  ;;  %v1884_v20 = vld [vmem:[%s541_s1 + $0x8] sm:$0x1f] }
 0x187   : > { %1935 = vmatprep.mubr.msk.f32.mxu1 %vm2740_vm2, %v2739_v2  ;;  %1943 = vmatprep.subr.mxu0 %v2739_v2  ;;  %v678_v16 = vld [vmem:[%s559_s0] sm:$0x1f]  ;;  %v1008_v21 = vmul.f32 0.35355338, %v1883_v19  ;;  %v1886_v22 = vld [vmem:[%s559_s0 + $0x8] sm:$0x1f] }
 0x188   : > { %1934 = vmatpush3.msk.msra.mxu1 %vm773_vm4, %v677_v13  ;;  %v679_v18 = vmul.f32 0.35355338, %v678_v16  ;;  %v1885_v23 = vld [vmem:[%s550_s21 + $0x8] sm:$0x1f]  ;;  %v1015_v24 = vmul.f32 0.35355338, %v1886_v22 }
 0x189   : > { %1931 = vmatmul.mubr.msk.f32.vlgmr.msra.gmra.mrb[0].mxu0 %vm680_vm1, %v675_v4  ;;  %1938 = vmatprep.subr.mxu1 %v2739_v2  ;;  %v1348_v60 = vld [vmem:[%s586_s18] sm:$0xff]  ;;  %v1349_v61 = vld [vmem:[%s586_s18 + $0x8] sm:$0xff]  ;;  %v2741_v62 = vmov 0.0|0.0   ;;  %s2742_s10 = smov 8   ;;  %vm1351_vm6 = vcmask 130048   ;;  %vm1426_vm7 = vcmask 258048  }
 0x18a   : > { %1945 = vmatprep.mubr.msk.f32.mxu0 %vm2740_vm2, %v2739_v2  ;;  %1944 = vmatpush3.msk.msra.mxu0 %vm773_vm4, %v677_v13  ;;  %v1983_v63 = vpack.c.bf16 %v1349_v61, %v1348_v60  ;;  %s3810_s27 = sld [smem:[#allocation42_spill]] }
 0x18b   : > { %1953 = vmatprep.subr.mxu0 %v2739_v2 }
 0x190   : > { %p1897_p0 = scmp.ne.s32.totalorder %s3810_s27, 1 }
 0x191   : > { %v1509_v19 = vld [vmem:[%s568_s25] sm:$0x1f] (!%p1897_p0)  ;;  %v1520_v22 = vld [vmem:[%s577_s12] sm:$0x1f] (!%p1897_p0) }
 0x25c   : > { %v753_v5 = vpop.f32.mrb[0].mxu0 }
 0x25d   : > { %v1932_v6 = vpop.f32.mrb[1].mxu0  ;;  %v758_v7 = vsel %vm757_vm3, %v753_v5, -inf }
 0x25e   : > { %759 = vmax.xlane.f32.xlu0 %v758_v7 }
 0x2eb   : > { %v760_v8 = vpop.xlane.xlu0 %759 }
 0x2ec   : > { %v761_v9 = vsub.f32 %v753_v5, %v760_v8 }
 0x2ee   : > { %v762_v10 = vmul.f32 1.442695, %v761_v9 }
 0x2f0   : > { %2215 = vpow2.f32 %v762_v10  ;;  %v1428_v10 = vld [vmem:[#allocation3] sm:$0x1f] }
 0x2fa   : > { %v2216_v11 = vpop.eup %2215 }
 0x2fb   : > { %v764_v12 = vsel %vm757_vm3, %v2216_v11, 0.0 }
 0x2fc   : > { %765 = vadd.xlane.f32.xlu0 %v764_v12 }
 0x389   : > { %v766_v14 = vpop.xlane.xlu0 %765 }
 0x38a   : > { %2217 = vrcp.f32 %v766_v14  ;;  %v1350_v14 = vld [vmem:[#allocation2] sm:$0x1f] }
 0x394   : > { %v2218_v15 = vpop.eup %2217 }
 0x395   : > { %v768_v17 = vmul.f32 %v2218_v15, %v2216_v11 }
 0x397   : > { %1936 = vmatmul.mubr.msk.f32.vlgmr.msra.gmra.mrb[0].mxu1 %vm769_vm5, %v768_v17 }
 0x398   : > { %1939 = vmatpush3.xpose.msk.msra.mxu1 %vm680_vm1, %v677_v13  ;;  %1940 = vmatprep.mubr.msk.f32.mxu1 %vm2740_vm2, %v2739_v2 }
 0x399   : > { %1948 = vmatprep.subr.mxu1 %v2739_v2 }
 0x39b   : > { %1941 = vmatmul.mubr.msk.f32.vlgmr.msra.gmra.mrb[2].mxu1 %vm680_vm1, %v679_v18  ;;  %v1898_v18 = vld [vmem:[#allocation16] ss:$0 sm:$0xff] (!%p1897_p0) }
 0x39c   : > { %1949 = vmatpush3.xpose.msk.msra.mxu1 %vm680_vm1, %v1884_v20  ;;  %1950 = vmatprep.mubr.msk.f32.mxu1 %vm2740_vm2, %v2739_v2 }
 0x39d   : > { %1958 = vmatprep.subr.mxu1 %v2739_v2 }
 0x39f   : > { %1951 = vmatmul.mubr.msk.f32.vlgmr.msra.gmra.mrb[4].mxu1 %vm680_vm1, %v1008_v21 }
 0x3a0   : > { %1959 = vmatpush3.xpose.msk.msra.mxu1 %vm680_vm1, %v1885_v23  ;;  %1960 = vmatprep.mubr.msk.f32.mxu1 %vm2740_vm2, %v2739_v2 }
 0x3a1   : > { %1982 = vmatprep.subr.bf16.mxu1 %v2741_v62 }
 0x3a3   : > { %1961 = vmatmul.mubr.msk.f32.vlgmr.msra.gmra.mrb[6].mxu1 %vm680_vm1, %v1015_v24 }
 0x3a4   : > { %1972 = vmatprep.mubr.msk.f32.mxu1 %vm2740_vm2, %v2739_v2  ;;  %1984 = vmatpush3.bf16.msra.mxu1 %v1983_v63 }
 0x46a   : > { %v3476_v25 = vpop.f32.mrb[0].mxu1 }
 0x46b   : > { %v1937_v26 = vpop.f32.mrb[1].mxu1 }
 0x46e   : > { %v918_v27 = vpop.f32.mrb[2].mxu1 }
 0x46f   : > { %v1942_v28 = vpop.f32.mrb[3].mxu1  ;;  %v922_v29 = vsel %vm757_vm3, %v918_v27, -inf }
 0x470   : > { %923 = vmax.xlane.f32.xlu1 %v922_v29 }
 0x472   : > { %v1088_v30 = vpop.f32.mrb[4].mxu1 }
 0x473   : > { %v1952_v31 = vpop.f32.mrb[5].mxu1  ;;  %v1092_v32 = vsel %vm757_vm3, %v1088_v30, -inf }
 0x474   : > { %1093 = vmax.xlane.f32.xlu1 %v1092_v32 }
 0x476   : > { %v1250_v33 = vpop.f32.mrb[6].mxu1 }
 0x477   : > { %v1962_v34 = vpop.f32.mrb[7].mxu1  ;;  %v1254_v35 = vsel %vm757_vm3, %v1250_v33, -inf }
 0x478   : > { %1255 = vmax.xlane.f32.xlu0 %v1254_v35 }
 0x4fd   : > { %v924_v36 = vpop.xlane.xlu1 %923 }
 0x4fe   : > { %v925_v37 = vsub.f32 %v918_v27, %v924_v36 }
 0x500   : > { %v926_v38 = vmul.f32 1.442695, %v925_v37 }
 0x501   : > { %v1094_v39 = vpop.xlane.xlu1 %1093 }
 0x502   : > { %2219 = vpow2.f32 %v926_v38  ;;  %v1095_v40 = vsub.f32 %v1088_v30, %v1094_v39 }
 0x504   : > { %v1096_v41 = vmul.f32 1.442695, %v1095_v40 }
 0x505   : > { %v1256_v42 = vpop.xlane.xlu0 %1255 }
 0x506   : > { %2221 = vpow2.f32 %v1096_v41  ;;  %v1257_v43 = vsub.f32 %v1250_v33, %v1256_v42 }
 0x508   : > { %v1258_v44 = vmul.f32 1.442695, %v1257_v43 }
 0x50a   : > { %2223 = vpow2.f32 %v1258_v44 }
 0x50c   : > { %v2220_v45 = vpop.eup %2219 }
 0x50d   : > { %v928_v46 = vsel %vm757_vm3, %v2220_v45, 0.0 }
 0x50e   : > { %929 = vadd.xlane.f32.xlu1 %v928_v46 }
 0x510   : > { %v2222_v47 = vpop.eup %2221 }
 0x511   : > { %v1098_v48 = vsel %vm757_vm3, %v2222_v47, 0.0 }
 0x512   : > { %1099 = vadd.xlane.f32.xlu0 %v1098_v48 }
 0x514   : > { %v2224_v49 = vpop.eup %2223 }
 0x515   : > { %v1260_v50 = vsel %vm757_vm3, %v2224_v49, 0.0 }
 0x516   : > { %1261 = vadd.xlane.f32.xlu1 %v1260_v50 }
 0x59b   : > { %v930_v51 = vpop.xlane.xlu1 %929 }
 0x59c   : > { %2225 = vrcp.f32 %v930_v51 }
 0x59f   : > { %v1100_v52 = vpop.xlane.xlu0 %1099 }
 0x5a0   : > { %2227 = vrcp.f32 %v1100_v52 }
 0x5a3   : > { %v1262_v53 = vpop.xlane.xlu1 %1261 }
 0x5a4   : > { %2229 = vrcp.f32 %v1262_v53 }
 0x5a6   : > { %v2226_v54 = vpop.eup %2225 }
 0x5a7   : > { %v932_v55 = vmul.f32 %v2226_v54, %v2220_v45 }
 0x5a9   : > { %1946 = vmatmul.mubr.msk.f32.vlgmr.msra.gmra.mrb[2].mxu0 %vm769_vm5, %v932_v55 }
 0x5aa   : > { %v2228_v56 = vpop.eup %2227  ;;  %1954 = vmatpush3.msk.msra.mxu0 %vm773_vm4, %v1885_v23  ;;  %1955 = vmatprep.mubr.msk.f32.mxu0 %vm2740_vm2, %v2739_v2 }
 0x5ab   : > { %v1102_v57 = vmul.f32 %v2228_v56, %v2222_v47  ;;  %1963 = vmatprep.subr.mxu0 %v2739_v2 }
 0x5ad   : > { %1956 = vmatmul.mubr.msk.f32.vlgmr.msra.gmra.mrb[4].mxu0 %vm769_vm5, %v1102_v57 }
 0x5ae   : > { %v2230_v58 = vpop.eup %2229  ;;  %1964 = vmatpush3.msk.msra.mxu0 %vm773_vm4, %v1885_v23  ;;  %1965 = vmatprep.mubr.msk.f32.mxu0 %vm2740_vm2, %v2739_v2 }
 0x5af   : > { %v1264_v59 = vmul.f32 %v2230_v58, %v2224_v49  ;;  %1985 = vmatprep.subr.bf16.mxu0 %v2741_v62 }
 0x5b1   : > { %1966 = vmatmul.mubr.msk.f32.vlgmr.msra.gmra.mrb[6].mxu0 %vm769_vm5, %v1264_v59 }
 0x5b2   : > { %1979 = vmatprep.mubr.msk.f32.mxu0 %vm2740_vm2, %v2739_v2  ;;  %1987 = vmatpush3.bf16.msra.mxu0 %v1983_v63 }
 0x67c   : > { %v1002_v0 = vpop.f32.mrb[2].mxu0 }
 0x67d   : > { %v1947_v1 = vpop.f32.mrb[3].mxu0 }
 0x680   : > { %v1175_v3 = vpop.f32.mrb[4].mxu0 }
 0x681   : > { %1344 = vrot.lane.b32.xlu1 %v1175_v3, %s2742_s10  ;;  %v1957_v4 = vpop.f32.mrb[5].mxu0 }
 0x684   : > { %v1334_v5 = vpop.f32.mrb[6].mxu0 }
 0x685   : > { %1339 = vrot.lane.b32.xlu0 %v1334_v5, %s2742_s10  ;;  %v1967_v6 = vpop.f32.mrb[7].mxu0 }
 0x6f3   : > { %v1345_v2 = vpop.permute.xlu1 %1344 }
 0x6f4   : > { %v1347_v7 = vsel %vm680_vm1, %v3476_v25, %v1345_v2 }
 0x6f5   : > { %1980 = vmatmul.mubr.msk.f32.vlgmr.msra.gmra.mrb[8].mxu0 %vm1351_vm6, %v1347_v7 }
 0x6f7   : > { %v1340_v8 = vpop.permute.xlu0 %1339 }
 0x6f8   : > { %v1342_v9 = vsel %vm680_vm1, %v1002_v0, %v1340_v8 }
 0x6f9   : > { %1973 = vmatmul.mubr.msk.f32.vlgmr.msra.gmra.mrb[8].mxu1 %vm1351_vm6, %v1342_v9 }
 0x7c8   : > { %v1498_v11 = vpop.f32.mrb[8].mxu0 }
 0x7c9   : > { %v1502_v12 = vadd.f32 %v1498_v11, %v1428_v10  ;;  %v1981_v13 = vpop.f32.mrb[9].mxu0  ;;  %1507 = sbr.rel (%p1897_p0) target bundleno = 2012 (0x7dc), region = 92 }
 0x7cb   : > { %1503 = vst.msk [vmem:[#allocation3] sm:$0x1f] %vm1426_vm7, %v1502_v12 }
 0x7cc   : > { %v1421_v15 = vpop.f32.mrb[8].mxu1 }
 0x7cd   : > { %v1425_v16 = vadd.f32 %v1421_v15, %v1350_v14  ;;  %v1974_v17 = vpop.f32.mrb[9].mxu1 }
 0x7cf   : > { %1427 = vst.msk [vmem:[#allocation2] sm:$0x1f] %vm1426_vm7, %v1425_v16 }
 0x7d2   : > { %v1521_v23 = vld [vmem:[#allocation3] sm:$0x1f] }
 0x7d3   : > { %v1522_v24 = vadd.f32 %v1521_v23, %v1520_v22 }
 0x7d5   : > { %v1523_v26 = vadd.f32 %v1898_v18, %v1522_v24 }
 0x7d6   : > { %v1510_v20 = vld [vmem:[#allocation2] sm:$0x1f] }
 0x7d7   : > { %v1511_v21 = vadd.f32 %v1510_v20, %v1509_v19  ;;  %1524 = vst.msk [vmem:[%s659_s22] sm:$0x1f] %vm1426_vm7, %v1523_v26 }
 0x7d9   : > { %v1518_v25 = vadd.f32 %v1898_v18, %v1511_v21 }
 0x7db   : > { %1519 = vst.msk [vmem:[%s652_s7] sm:$0x1f] %vm1426_vm7, %v1518_v25 }
 0x7dc PF: > { %s3811_s14 = sld [smem:[#allocation43_spill]]  ;;  %s3812_s26 = sld [smem:[#allocation53_spill]] }
 0x7dd   : > { %s3813_s21 = sld [smem:[#allocation64_spill]]  ;;  %s1545_s23 = sshll.u32 %s652_s7, 4  ;;  %s1546_s23 = int_to_ptr.vmem [resolvable:$true] %s1545_s23 }
 0x7de   : > { %s1526_s13 = scalar_lea.sflag [#allocation6], %s3396_s30  ;;  %s2472_s25 = scalar_lea.vmem %s1546_s23, 128 }
 0x7df   : > { %p2473_p2 = scmp.ne.s32.totalorder %s1546_s23, %s2472_s25  ;;  %s2743_s20 = smov [#allocation18]  }
 0x7e0   : > { %s2476_s12 = sshll.u32 %s2743_s20, 4  ;;  %s2477_s12 = int_to_ptr.vmem [resolvable:$false] %s2476_s12 }
 0x7e1   : > { %s2478_s11 = scalar_lea.vmem %s2477_s12, 256  ;;  %p2479_p11 = scmp.lt.s32.totalorder %s1546_s23, %s2477_s12 }
 0x7e2   : > { %s1901_s9 = sshll.u32 %s3811_s14, 7  ;;  %p3815_p10 = scmp.ne.s32.totalorder %s3812_s26, 0 }
 0x7e3   : > { %s3814_s29 = smov %s3813_s21  ;;  %s3522_s0 = scalar_lea.hbm %s3813_s21, %s1901_s9 }
 0x7e4   : > { %p2474_p13 = pnand %p2473_p2, %p3815_p10  ;;  %p2480_p3 = scmp.lt.s32.totalorder %s2478_s11, %s2472_s25 }
 0x7e6   : > { %p2475_p6 = pneg %p2474_p13  ;;  %p2481_p7 = por %p2480_p3, %p2479_p11 }
 0x7e8   : > { %p2482_p1 = pnand %p2481_p7, %p2475_p6 }
 0x7ea   : > { %2485 = shalt.err (!%p2482_p1)
}
 0x7eb   : > { %s2486_s17 = scalar_lea.hbm %s3522_s0, 128  ;;  %s2490_s7 = scalar_lea.hbm %s3814_s29, 256 }
 0x7ec   : > { %p2487_p9 = scmp.ne.s32.totalorder %s3522_s0, %s2486_s17  ;;  %p2491_p8 = scmp.lt.u32.totalorder %s3522_s0, %s3814_s29 }
 0x7ed   : > { %p2492_p12 = scmp.lt.u32.totalorder %s2490_s7, %s2486_s17  ;;  %p2494_p2 = scmp.lt.u32.totalorder %s2486_s17, %s3522_s0 }
 0x7ee   : > { %p2488_p4 = pnand %p2487_p9, %p3815_p10 }
 0x7ef   : > { %p2493_p0 = por %p2492_p12, %p2491_p8 }
 0x7f0   : > { %p2489_p5 = pneg %p2488_p4 }
 0x7f1   : > { %p2495_p13 = por %p2494_p2, %p2493_p0 }
 0x7f3   : > { %p2496_p6 = pnand %p2495_p13, %p2489_p5 }
 0x7f5   : > { %2499 = shalt.err (!%p2496_p6)
}
 0x7f6   : > { %2006 = dma.vmem_to_hbm [thread:$0]  (%p3815_p10), %s1546_s23, 128, %s3522_s0, %s1526_s13  }
 0x7f7   : > { %s3816_s5 = sld [smem:[#allocation65_spill]]  ;;  %s1559_s25 = sshll.u32 %s659_s22, 4  ;;  %s1560_s25 = int_to_ptr.vmem [resolvable:$true] %s1559_s25 }
 0x7f8   : > { %s1531_s20 = scalar_lea.sflag [#allocation20], %s3396_s30  ;;  %s2500_s12 = scalar_lea.vmem %s1560_s25, 128 }
 0x7f9   : > { %p2501_p11 = scmp.ne.s32.totalorder %s1560_s25, %s2500_s12  ;;  %s2744_s11 = smov [#allocation19]  }
 0x7fa   : > { %s2504_s17 = sshll.u32 %s2744_s11, 4  ;;  %s2505_s17 = int_to_ptr.vmem [resolvable:$false] %s2504_s17 }
 0x7fb   : > { %p2502_p3 = pnand %p2501_p11, %p3815_p10  ;;  %s2506_s15 = scalar_lea.vmem %s2505_s17, 256 }
 0x7fc   : > { %p2507_p1 = scmp.lt.s32.totalorder %s1560_s25, %s2505_s17  ;;  %p2508_p9 = scmp.lt.s32.totalorder %s2506_s15, %s2500_s12 }
 0x7fd   : > { %s3549_s21 = scalar_lea.hbm %s3816_s5, %s1901_s9  ;;  %p2503_p7 = pneg %p2502_p3 }
 0x7fe   : > { %p2509_p4 = por %p2508_p9, %p2507_p1 }
 0x800   : > { %p2510_p5 = pnand %p2509_p4, %p2503_p7 }
 0x802   : > { %2513 = shalt.err (!%p2510_p5)
}
 0x803   : > { %s2514_s30 = scalar_lea.hbm %s3549_s21, 128  ;;  %s2518_s14 = scalar_lea.hbm %s3816_s5, 256 }
 0x804   : > { %p2515_p8 = scmp.ne.s32.totalorder %s3549_s21, %s2514_s30  ;;  %p2519_p2 = scmp.lt.u32.totalorder %s3549_s21, %s3816_s5 }
 0x805   : > { %p2520_p13 = scmp.lt.u32.totalorder %s2518_s14, %s2514_s30  ;;  %p2522_p11 = scmp.lt.u32.totalorder %s2514_s30, %s3549_s21 }
 0x806   : > { %p2516_p12 = pnand %p2515_p8, %p3815_p10 }
 0x807   : > { %p2521_p6 = por %p2520_p13, %p2519_p2 }
 0x808   : > { %p2517_p0 = pneg %p2516_p12 }
 0x809   : > { %p2523_p3 = por %p2522_p11, %p2521_p6 }
 0x80b   : > { %p2524_p7 = pnand %p2523_p3, %p2517_p0 }
 0x80d   : > { %2527 = shalt.err (!%p2524_p7)
}
 0x80e   : > { %2007 = dma.vmem_to_hbm [thread:$0]  (%p3815_p10), %s1560_s25, 128, %s3549_s21, %s1531_s20  }
 0x80f PF: > { %s3817_s23 = sld [smem:[#allocation34_spill]]  ;;  %s3818_s13 = sld [smem:[#allocation54_spill]] }
 0x810   : > { %p2046_p1 = scmp.ge.s32.totalorder %s2726_s28, 2 }
 0x815   : > { %s1571_s18 = sand.u32 1, %s3817_s23   ;;  %p3819_p9 = scmp.ne.s32.totalorder %s3818_s13, 0 }
 0x816   : > { %s1572_s7 = scalar_lea.sflag [#allocation6], %s1571_s18 }
 0x817   : > { %p2037_p4 = pnand %p2046_p1, %p3819_p9 }
 0x819   : > { %2641 = dma.done.wait (!%p2037_p4), %s1572_s7, 128  }
 0x81a   : > { %2643 = vsyncadd (!%p2037_p4), %s1572_s7, 4294967168  ;;  %s1581_s24 = scalar_lea.sflag [#allocation20], %s1571_s18 }
 0x81b   : > { %2645 = dma.done.wait (!%p2037_p4), %s1581_s24, 128  }
 0x81c   : > { %2647 = vsyncadd (!%p2037_p4), %s1581_s24, 4294967168  ;;  %s39_s28 = sadd.s32 1, %s2726_s28   ;;  %s3821_s30 = sld [smem:[#allocation32_spill]] }
 0x81d   : > { %p3576_p5 = scmp.ge.s32.totalorder %s39_s28, 6   ;;  %s3822_s10 = sld [smem:[#allocation33_spill]] }
 0x81e   : > { %s3823_s12 = sld [smem:[#allocation35_spill]]  ;;  %s3824_s13 = sld [smem:[#allocation36_spill]] }
 0x81f   : > { %s3825_s14 = sld [smem:[#allocation51_spill]]  ;;  %s3826_s27 = sld [smem:[#allocation37_spill]] }
 0x820   : > { %s3827_s17 = sld [smem:[#allocation49_spill]]  ;;  %s3829_s20 = sld [smem:[#allocation48_spill]] }
 0x821   : > { %s3828_s1 = sld [smem:[#allocation38_spill]]  ;;  %s3830_s21 = sld [smem:[#allocation40_spill]] }
 0x822   : > { %s3831_s22 = sld [smem:[#allocation41_spill]]  ;;  %s3833_s24 = sld [smem:[#allocation44_spill]] }
 0x823   : > { %s3832_s23 = sld [smem:[#allocation55_spill]]  ;;  %s3834_s25 = sld [smem:[#allocation45_spill]] }
 0x824   : > { %s3835_s6 = sld [smem:[#allocation46_spill]]  ;;  %s3836_s11 = smov %s3308_s3 }
 0x825   : > { %s3837_s9 = sld [smem:[#allocation47_spill]]  ;;  %s3839_s15 = smov %s2678_s16 }
 0x826   : > { %s3840_s16 = smov %s3826_s27  ;;  %s3841_s18 = smov %s2690_s19 }
 0x827   : > { %s3842_s19 = smov %s3828_s1  ;;  %38 = sbr.rel (!%p3576_p5) target bundleno = 33 (0x21), region = 202 }
 0x82a   : > { %s3843_s26 = smov %s3835_s6 }
 0x82b   : > { %s3844_s27 = smov %s3837_s9 }
 0x82e   :  { %1586 = vsyncpa [#allocation5], 1 }
 0x82f   :  { %1588 = vsyncpa [#allocation5 + $0x1], 1 }
 0x830   :  { %1589 = vsyncpa [#allocation8], 1 }
 0x831   :  { %1591 = vsyncpa [#allocation8 + $0x1], 1 }
 0x832   :  { %1592 = vsyncpa [#allocation11], 1 }
 0x833   :  { %1594 = vsyncpa [#allocation11 + $0x1], 1 }
 0x834   :  { %1595 = vsyncpa [#allocation14], 1 }
 0x835   :  { %1597 = vsyncpa [#allocation14 + $0x1], 1 }
 0x836   :  { %1598 = vsyncpa [#allocation17], 1 }
 0x837   :  { %1599 = vsyncpa [#allocation6], 1 }
 0x838   :  { %1601 = vsyncpa [#allocation6 + $0x1], 1 }
 0x839   :  { %1602 = vsyncpa [#allocation20], 1 }
 0x83a   :  { %1604 = vsyncpa [#allocation20 + $0x1], 1 }

// kernel: clip_surgery_vision_forward.53
= control target key start
LH: loop header
LB: loop body
LE: loop exit
PB: predicated region body
PF: predicated region fallthrough
CT: control target
= control target key end

     0   :  { %10 = vsyncpa [#allocation3], 0  ;;  %s603_s0 = inlined_call_operand.hbm [shape: f32[20,32], index: 0, kind: input, shape index: {}]   ;;  %s604_s1 = inlined_call_operand.hbm [shape: f32[1,32], index: 1, kind: input, shape index: {}]   ;;  %s605_s2 = inlined_call_operand.hbm [shape: f32[1,32], index: 2, kind: input, shape index: {}]   ;;  %s606_s3 = inlined_call_operand.hbm [shape: f32[32,16], index: 3, kind: input, shape index: {}]   ;;  %s607_s4 = inlined_call_operand.hbm [shape: f32[1,16], index: 4, kind: input, shape index: {}]   ;;  %s608_s5 = inlined_call_operand.hbm [shape: f32[20,16], index: 5, kind: output, shape index: {}]  }
   0x1   :  { %11 = vsyncpa [#allocation6], 0 }
   0x2   :  { %12 = vsyncpa [#allocation9], 0 }
   0x3   :  { %13 = vsyncpa [#allocation4], 0  ;;  %s469_s18 = smov [#allocation5]   ;;  %s329_s22 = scalar_lea.hbm %s604_s1, 16 }
   0x4   :  { %s32_s19 = sshll.u32 %s469_s18, 4  ;;  %p330_p0 = scmp.ne.s32.totalorder %s604_s1, %s329_s22  ;;  %s33_s19 = int_to_ptr.vmem [resolvable:$true] %s32_s19 }
   0x5   :  { %p333_p1 = scmp.lt.u32.totalorder %s329_s22, %s604_s1 }
   0x7   :  { %p335_p2 = pnand %p333_p1, %p330_p0 }
   0x9   :  { %338 = shalt.err (!%p335_p2)
}
   0xa   :  { %s339_s27 = scalar_lea.vmem %s33_s19, 16  ;;  %s343_s28 = scalar_lea.vmem %s33_s19, 32 }
   0xb   :  { %p340_p3 = scmp.ne.s32.totalorder %s33_s19, %s339_s27  ;;  %p344_p4 = scmp.lt.s32.totalorder %s33_s19, %s33_s19 }
   0xc   :  { %p345_p5 = scmp.lt.s32.totalorder %s343_s28, %s339_s27 }
   0xe   :  { %p346_p6 = por %p345_p5, %p344_p4 }
  0x10   :  { %p347_p7 = pnand %p346_p6, %p340_p3 }
  0x12   :  { %350 = shalt.err (!%p347_p7)
}
  0x13   :  { %35 = dma.hbm_to_vmem [thread:$0]  %s604_s1, 16, %s33_s19, [#allocation6]  }
  0x14   :  { %s470_s6 = smov [#allocation8]   ;;  %s471_s8 = smov [#allocation2]  }
  0x15   :  { %s51_s7 = sshll.u32 %s470_s6, 4  ;;  %s19_s9 = sshll.u32 %s471_s8, 4  ;;  %s52_s7 = int_to_ptr.vmem [resolvable:$true] %s51_s7  ;;  %s20_s9 = int_to_ptr.vmem [resolvable:$true] %s19_s9 }
  0x16   :  { %s351_s12 = scalar_lea.hbm %s606_s3, 512 }
  0x17   :  { %p352_p8 = scmp.ne.s32.totalorder %s606_s3, %s351_s12  ;;  %p355_p9 = scmp.lt.u32.totalorder %s351_s12, %s606_s3 }
  0x19   :  { %p357_p10 = pnand %p355_p9, %p352_p8 }
  0x1b   :  { %360 = shalt.err (!%p357_p10)
}
  0x1c   :  { %s361_s1 = scalar_lea.vmem %s52_s7, 512  ;;  %p366_p12 = scmp.lt.s32.totalorder %s52_s7, %s52_s7 }
  0x1d   :  { %p362_p11 = scmp.ne.s32.totalorder %s52_s7, %s361_s1  ;;  %p367_p13 = scmp.lt.s32.totalorder %s361_s1, %s361_s1 }
  0x1f   :  { %p368_p0 = por %p367_p13, %p366_p12 }
  0x21   :  { %p369_p1 = pnand %p368_p0, %p362_p11 }
  0x23   :  { %372 = shalt.err (!%p369_p1)
}
  0x24   :  { %s472_s17 = smov 128   ;;  %s473_s18 = smov 8  }
  0x25   :  { %57 = dma.hbm_to_vmem [thread:$0]  %s606_s3, 512, %s52_s7, [#allocation9], %s472_s17, %s472_s17, %s473_s18  }
  0x26   :  { %s373_s23 = scalar_lea.hbm %s603_s0, 384 }
  0x27   :  { %p374_p2 = scmp.ne.s32.totalorder %s603_s0, %s373_s23  ;;  %p377_p3 = scmp.lt.u32.totalorder %s373_s23, %s603_s0 }
  0x29   :  { %p379_p4 = pnand %p377_p3, %p374_p2 }
  0x2b   :  { %382 = shalt.err (!%p379_p4)
}
  0x2c   :  { %s383_s28 = scalar_lea.vmem %s20_s9, 384  ;;  %p388_p6 = scmp.lt.s32.totalorder %s20_s9, %s20_s9 }
  0x2d   :  { %p384_p5 = scmp.ne.s32.totalorder %s20_s9, %s383_s28  ;;  %p389_p7 = scmp.lt.s32.totalorder %s383_s28, %s383_s28 }
  0x2f   :  { %p390_p8 = por %p389_p7, %p388_p6 }
  0x31   :  { %p391_p9 = pnand %p390_p8, %p384_p5 }
  0x33   :  { %394 = shalt.err (!%p391_p9)
}
  0x34   :  { %25 = dma.hbm_to_vmem [thread:$0]  %s603_s0, 384, %s20_s9, [#allocation3], %s472_s17, %s472_s17, %s473_s18  }
  0x35   :  { %s474_s30 = smov [#allocation7]   ;;  %s475_s7 = smov [#allocation10]  }
  0x36   :  { %s42_s6 = sshll.u32 %s474_s30, 4  ;;  %s64_s8 = sshll.u32 %s475_s7, 4  ;;  %s43_s6 = int_to_ptr.vmem [resolvable:$true] %s42_s6  ;;  %s65_s8 = int_to_ptr.vmem [resolvable:$true] %s64_s8 }
  0x37   :  { %s395_s12 = scalar_lea.hbm %s605_s2, 16 }
  0x38   :  { %p396_p10 = scmp.ne.s32.totalorder %s605_s2, %s395_s12  ;;  %p399_p11 = scmp.lt.u32.totalorder %s395_s12, %s605_s2 }
  0x3a   :  { %p401_p12 = pnand %p399_p11, %p396_p10 }
  0x3c   :  { %404 = shalt.err (!%p401_p12)
}
  0x3d   :  { %s405_s0 = scalar_lea.vmem %s43_s6, 16  ;;  %s409_s9 = scalar_lea.vmem %s43_s6, 32 }
  0x3e   :  { %p406_p13 = scmp.ne.s32.totalorder %s43_s6, %s405_s0  ;;  %p410_p0 = scmp.lt.s32.totalorder %s43_s6, %s43_s6 }
  0x3f   :  { %p411_p1 = scmp.lt.s32.totalorder %s409_s9, %s405_s0 }
  0x41   :  { %p412_p2 = por %p411_p1, %p410_p0 }
  0x43   :  { %p413_p3 = pnand %p412_p2, %p406_p13 }
  0x45   :  { %416 = shalt.err (!%p413_p3)
}
  0x46   :  { %45 = dma.hbm_to_vmem [thread:$0]  %s605_s2, 16, %s43_s6, [#allocation6]  }
  0x47   :  { %s417_s22 = scalar_lea.hbm %s607_s4, 16 }
  0x48   :  { %p418_p4 = scmp.ne.s32.totalorder %s607_s4, %s417_s22  ;;  %p421_p5 = scmp.lt.u32.totalorder %s417_s22, %s607_s4 }
  0x4a   :  { %p423_p6 = pnand %p421_p5, %p418_p4 }
  0x4c   :  { %426 = shalt.err (!%p423_p6)
}
  0x4d   :  { %s427_s27 = scalar_lea.vmem %s65_s8, 16  ;;  %s431_s28 = scalar_lea.vmem %s65_s8, 32 }
  0x4e   :  { %p428_p7 = scmp.ne.s32.totalorder %s65_s8, %s427_s27  ;;  %p432_p8 = scmp.lt.s32.totalorder %s65_s8, %s65_s8 }
  0x4f   :  { %p433_p9 = scmp.lt.s32.totalorder %s431_s28, %s427_s27 }
  0x51   :  { %p434_p10 = por %p433_p9, %p432_p8 }
  0x53   :  { %p435_p11 = pnand %p434_p10, %p428_p7 }
  0x55   :  { %438 = shalt.err (!%p435_p11)
}
  0x56   :  { %67 = dma.hbm_to_vmem [thread:$0]  %s607_s4, 16, %s65_s8, [#allocation9]  }
  0x57   :  { %461 = dma.done.wait [#allocation3], 384  }
  0x58   :  { %462 = vsyncadd [#allocation3], 4294966912 }
  0x59   :  { %463 = dma.done.wait [#allocation6], 32  }
  0x5a   :  { %464 = vsyncadd [#allocation6], 4294967264 }
  0x5b   :  { %465 = dma.done.wait [#allocation9], 528  }
  0x5c   :  { %466 = vsyncadd [#allocation9], 4294966768  ;;  %vm88_vm0 = vcmask 261120   ;;  %vm95_vm1 = vcmask 257024   ;;  %v84_v0 = vld [vmem:[#allocation2 + $0x8] sm:$0xff]  ;;  %v83_v2 = vld [vmem:[#allocation2] sm:$0xff] }
  0x5d   :  { %v85_v1 = vld [vmem:[#allocation2 + $0x10] sm:$0xf]  ;;  %v92_v3 = vsel %vm88_vm0, %v84_v0, 0.0  ;;  %v89_v5 = vsel %vm88_vm0, %v83_v2, 0.0  ;;  %v148_v21 = vld [vmem:[#allocation8] sm:$0xff]  ;;  %v149_v22 = vld [vmem:[#allocation8 + $0x8] sm:$0xff] }
  0x5e   :  { %v96_v4 = vsel %vm95_vm1, %v85_v1, 0.0  ;;  %93 = vadd.xlane.f32.xlu0 %v92_v3  ;;  %v150_v23 = vld [vmem:[#allocation8 + $0x10] sm:$0xff]  ;;  %v476_v24 = vmov 0.0|0.0   ;;  %v303_v25 = vpack.c.bf16 %v149_v22, %v148_v21  ;;  %v151_v26 = vld [vmem:[#allocation8 + $0x18] sm:$0xff]  ;;  %vm477_vm2 = vmmov 0   ;;  %s479_s4 = smov [#allocation11]  }
  0x5f   :  { %97 = vadd.xlane.f32.xlu1 %v96_v4  ;;  %308 = vmatprep.subr.bf16.mxu1 %v476_v24  ;;  %v478_v27 = vmov 0.0   ;;  %v306_v28 = vpack.c.bf16 %v151_v26, %v150_v23  ;;  %v272_v39 = vld [vmem:[#allocation5] ss:$0 sm:$0xff]  ;;  %v273_v41 = vld [vmem:[#allocation7] ss:$0 sm:$0xff]  ;;  %vm248_vm3 = vcmask 130048  }
  0x60   :  { %302 = vmatprep.subr.bf16.mxu0 %v476_v24  ;;  %296 = vmatprep.mubr.msk.f32.mxu1 %vm477_vm2, %v478_v27  ;;  %v274_v52 = vld [vmem:[#allocation10] ss:$0 sm:$0xff]  ;;  %s258_s29 = sshll.u32 %s479_s4, 4  ;;  %vm251_vm4 = vcmask 125952   ;;  %s259_s29 = int_to_ptr.vmem [resolvable:$true] %s258_s29 }
  0x61   :  { %293 = vmatprep.mubr.msk.f32.mxu0 %vm477_vm2, %v478_v27  ;;  %310 = vmatpush3.bf16.msra.mxu1 %v303_v25  ;;  %s439_s30 = scalar_lea.vmem %s259_s29, 384  ;;  %p444_p13 = scmp.lt.s32.totalorder %s259_s29, %s259_s29 }
  0x62   :  { %90 = vadd.xlane.f32.xlu0 %v89_v5  ;;  %304 = vmatpush3.bf16.msra.mxu0 %v303_v25  ;;  %p440_p12 = scmp.ne.s32.totalorder %s259_s29, %s439_s30  ;;  %p445_p0 = scmp.lt.s32.totalorder %s439_s30, %s439_s30 }
  0x63   :  { %309 = vmatprep.subr.bf16.mxu1 %v476_v24  ;;  %305 = vmatprep.subr.bf16.mxu0 %v476_v24 }
  0x64   :  { %p446_p1 = por %p445_p0, %p444_p13 }
  0x65   :  { %311 = vmatpush3.bf16.msra.mxu1 %v306_v28 }
  0x66   :  { %307 = vmatpush3.bf16.msra.mxu0 %v306_v28  ;;  %p447_p2 = pnand %p446_p1, %p440_p12 }
  0xeb   :  { %v94_v6 = vpop.xlane.xlu0 %93 }
  0xec   :  { %v98_v7 = vpop.xlane.xlu1 %97  ;;  %v101_v8 = vmul.f32 0.03125, %v94_v6 }
  0xed   :  { %v102_v9 = vmul.f32 0.03125, %v98_v7 }
  0xee   :  { %v104_v10 = vsub.f32 %v84_v0, %v101_v8 }
  0xef   :  { %v105_v11 = vsub.f32 %v85_v1, %v102_v9  ;;  %v91_v12 = vpop.xlane.xlu0 %90 }
  0xf0   :  { %v100_v13 = vmul.f32 0.03125, %v91_v12  ;;  %v107_v14 = vmul.f32 %v104_v10, %v104_v10 }
  0xf1   :  { %v108_v15 = vmul.f32 %v105_v11, %v105_v11 }
  0xf2   :  { %v103_v16 = vsub.f32 %v83_v2, %v100_v13  ;;  %v112_v17 = vsel %vm88_vm0, %v107_v14, 0.0 }
  0xf3   :  { %113 = vadd.xlane.f32.xlu1 %v112_v17  ;;  %v115_v18 = vsel %vm95_vm1, %v108_v15, 0.0 }
  0xf4   :  { %v106_v19 = vmul.f32 %v103_v16, %v103_v16 }
  0xf6   :  { %v109_v20 = vsel %vm88_vm0, %v106_v19, 0.0 }
  0xf7   :  { %116 = vadd.xlane.f32.xlu1 %v115_v18  ;;  %110 = vadd.xlane.f32.xlu0 %v109_v20 }
 0x180   :  { %v114_v29 = vpop.xlane.xlu1 %113 }
 0x181   :  { %v119_v30 = vmul.f32 0.03125, %v114_v29 }
 0x183   :  { %v122_v31 = vadd.f32 1e-05, %v119_v30 }
 0x184   :  { %v117_v32 = vpop.xlane.xlu1 %116  ;;  %v111_v33 = vpop.xlane.xlu0 %110 }
 0x185   :  { %323 = vrsqrt.f32 %v122_v31  ;;  %v120_v34 = vmul.f32 0.03125, %v117_v32  ;;  %v118_v35 = vmul.f32 0.03125, %v111_v33 }
 0x187   :  { %v123_v36 = vadd.f32 1e-05, %v120_v34  ;;  %v121_v37 = vadd.f32 1e-05, %v118_v35 }
 0x189   :  { %325 = vrsqrt.f32 %v123_v36 }
 0x18a   :  { %327 = vrsqrt.f32 %v121_v37 }
 0x18f   :  { %v324_v38 = vpop.eup %323 }
 0x190   :  { %v128_v40 = vmul.f32 %v324_v38, %v104_v10 }
 0x192   :  { %v137_v42 = vmul.f32 %v272_v39, %v128_v40 }
 0x193   :  { %v326_v43 = vpop.eup %325 }
 0x194   :  { %v328_v44 = vpop.eup %327  ;;  %v146_v45 = vadd.f32 %v273_v41, %v137_v42  ;;  %v129_v46 = vmul.f32 %v326_v43, %v105_v11 }
 0x195   :  { %v127_v47 = vmul.f32 %v328_v44, %v103_v16 }
 0x196   :  { %297 = vmatmul.mubr.msk.f32.vlgmr.msra.gmra.mrb[0].mxu1 %vm88_vm0, %v146_v45  ;;  %v138_v48 = vmul.f32 %v272_v39, %v129_v46 }
 0x197   :  { %299 = vmatprep.mubr.msk.f32.mxu1 %vm477_vm2, %v478_v27  ;;  %v136_v49 = vmul.f32 %v272_v39, %v127_v47 }
 0x198   :  { %v147_v50 = vadd.f32 %v273_v41, %v138_v48 }
 0x199   :  { %v145_v51 = vadd.f32 %v273_v41, %v136_v49 }
 0x19a   :  { %300 = vmatmul.mubr.msk.f32.gmra.mrb[2].mxu1 %vm88_vm0, %v147_v50 }
 0x19b   :  { %294 = vmatmul.mubr.msk.f32.vlgmr.msra.gmra.mrb[0].mxu0 %vm88_vm0, %v145_v51 }
 0x269   :  { %v239_v53 = vpop.f32.mrb[0].mxu1 }
 0x26a   :  { %v240_v54 = vadd.f32 %v274_v52, %v239_v53  ;;  %v298_v55 = vpop.f32.mrb[1].mxu1 }
 0x26c   :  { %250 = vst.msk [vmem:[#allocation11 + $0x8] sm:$0xff] %vm248_vm3, %v240_v54 }
 0x26d   :  { %v244_v56 = vpop.f32.mrb[2].mxu1 }
 0x26e   :  { %v234_v57 = vpop.f32.mrb[0].mxu0  ;;  %v245_v58 = vadd.f32 %v274_v52, %v244_v56  ;;  %v301_v59 = vpop.f32.mrb[3].mxu1 }
 0x26f   :  { %v235_v60 = vadd.f32 %v274_v52, %v234_v57  ;;  %v295_v61 = vpop.f32.mrb[1].mxu0 }
 0x270   :  { %252 = vst.msk [vmem:[#allocation11 + $0x10] sm:$0xf] %vm251_vm4, %v245_v58 }
 0x271   :  { %249 = vst.msk [vmem:[#allocation11] sm:$0xff] %vm248_vm3, %v235_v60 }
 0x272   :  { %450 = shalt.err (!%p447_p2)
}
 0x273   :  { %s451_s8 = scalar_lea.hbm %s608_s5, 384 }
 0x274   :  { %p452_p3 = scmp.ne.s32.totalorder %s608_s5, %s451_s8  ;;  %p455_p4 = scmp.lt.u32.totalorder %s451_s8, %s608_s5 }
 0x276   :  { %p457_p5 = pnand %p455_p4, %p452_p3 }
 0x278   :  { %460 = shalt.err (!%p457_p5)
}
 0x279   :  { %264 = dma.vmem_to_hbm [thread:$0]  %s259_s29, 384, %s608_s5, [#allocation4], %s472_s17, %s472_s17, %s473_s18  }
 0x27a   :  { %467 = dma.done.wait [#allocation4], 384  }
 0x27b   :  { %468 = vsyncadd [#allocation4], 4294966912 }
 0x27c   :  { %268 = vsyncpa [#allocation3], 1 }
 0x27d   :  { %269 = vsyncpa [#allocation6], 1 }
 0x27e   :  { %270 = vsyncpa [#allocation9], 1 }
 0x27f   :  { %271 = vsyncpa [#allocation4], 1 }

</bundles_post_ra>
